<compile_context>
chip_gen: v6e
topology: v6e:2x2x1
jax: 0.10.0
libtpu: 0.0.40
codegen_flags: <defaults>
</compile_context>

<pallas_src>
import functools

import jax
import jax.numpy as jnp
from jax.experimental import pallas as pl
from jax.experimental.pallas import tpu as pltpu

INI = 0.01


def _pick_block(n, target):
    """Largest block <= target that divides n and keeps (8,*) alignment."""
    if n <= target:
        return n
    for b in range(target, 7, -1):
        if n % b == 0 and b % 8 == 0:
            return b
    return n


# ----------------------------------------------------------------------------
# Kernel 1: ConvSentEncoder — conv1d (k=3,4,5) as im2col matmul + ReLU + max
# One call for ALL sentences of ALL articles, grid tiles the sentence axis.
# ----------------------------------------------------------------------------
def _conv_sent_kernel(emb_ref, w3_ref, b3_ref, w4_ref, b4_ref, w5_ref, b5_ref,
                      out_ref):
    emb = emb_ref[...]                                   # (N, L, E)
    n, seq_len, e = emb.shape
    for idx, (w_ref, b_ref) in enumerate(
            ((w3_ref, b3_ref), (w4_ref, b4_ref), (w5_ref, b5_ref))):
        k, _, h = w_ref.shape
        lo = seq_len - k + 1
        # im2col: windows (N, lo, k*E) -> one MXU contraction per kernel width.
        win = jnp.concatenate([emb[:, j:j + lo, :] for j in range(k)], axis=-1)
        acc = jnp.dot(win.reshape(n * lo, k * e), w_ref[...].reshape(k * e, h),
                      preferred_element_type=jnp.float32)
        acc = jnp.maximum(acc + b_ref[...], 0.0)         # bias + ReLU
        pooled = jnp.max(acc.reshape(n, lo, h), axis=1)  # max-over-time (one pass)
        out_ref[:, idx * h:(idx + 1) * h] = pooled       # static lane-slice write


def conv_sent_encoder(emb, conv_params, *, block_n=256):
    (w3, b3), (w4, b4), (w5, b5) = conv_params
    n, seq_len, e = emb.shape
    h = w3.shape[-1]
    bn = _pick_block(n, block_n)
    wspec = lambda s: pl.BlockSpec(s, lambda i: (0,) * len(s))
    return pl.pallas_call(
        _conv_sent_kernel,
        out_shape=jax.ShapeDtypeStruct((n, 3 * h), jnp.float32),
        grid=(n // bn,),
        in_specs=[pl.BlockSpec((bn, seq_len, e), lambda i: (i, 0, 0)),
                  wspec(w3.shape), wspec(b3.shape),
                  wspec(w4.shape), wspec(b4.shape),
                  wspec(w5.shape), wspec(b5.shape)],
        out_specs=pl.BlockSpec((bn, 3 * h), lambda i: (i, 0)),
        compiler_params=pltpu.CompilerParams(dimension_semantics=("parallel",)),
    )(emb, w3, b3, w4, b4, w5, b5)


# ----------------------------------------------------------------------------
# Kernel 2: tiled matmul (+ optional fused bias).  Used for the hoisted LSTM
# input projections (all timesteps at once) and the fused attn/hop projections.
# ----------------------------------------------------------------------------
def _matmul_kernel(a_ref, b_ref, o_ref):
    o_ref[...] = jnp.dot(a_ref[...], b_ref[...], preferred_element_type=jnp.float32)


def _matmul_bias_kernel(a_ref, b_ref, bias_ref, o_ref):
    o_ref[...] = (jnp.dot(a_ref[...], b_ref[...], preferred_element_type=jnp.float32)
                  + bias_ref[...])


def pallas_matmul(a, b, bias=None, *, block_m=256):
    m, k = a.shape
    _, n = b.shape
    bm = _pick_block(m, block_m)
    in_specs = [pl.BlockSpec((bm, k), lambda i: (i, 0)),
                pl.BlockSpec((k, n), lambda i: (0, 0))]
    args = [a, b]
    if bias is None:
        kern = _matmul_kernel
    else:
        in_specs.append(pl.BlockSpec((1, n), lambda i: (0, 0)))
        args.append(bias.reshape(1, n))
        kern = _matmul_bias_kernel
    return pl.pallas_call(
        kern,
        out_shape=jax.ShapeDtypeStruct((m, n), jnp.float32),
        grid=(m // bm,),
        in_specs=in_specs,
        out_specs=pl.BlockSpec((bm, n), lambda i: (i, 0)),
        compiler_params=pltpu.CompilerParams(dimension_semantics=("parallel",)),
    )(*args)


# ----------------------------------------------------------------------------
# Kernel 3: LSTM recurrence (PyTorch gate order i, f, g, o).
# Input projection (x@W_ih + b) is PRE-computed; both directions are fused on a
# leading D axis; the whole (small, static) time loop runs inside one call.
# ----------------------------------------------------------------------------
def _lstm_recurrence_kernel(xp_ref, whh_ref, h0_ref, c0_ref, y_ref):
    # xp: (T, D, B, 4H) pre-projected inputs; whh: (D, H, 4H); h0/c0: (D, B, H)
    seq_t = xp_ref.shape[0]
    hd = h0_ref.shape[-1]
    whh = whh_ref[...]
    h = h0_ref[...]
    c = c0_ref[...]
    for t in range(seq_t):                               # T is small & static: unroll
        gates = xp_ref[t] + jax.lax.dot_general(
            h, whh, dimension_numbers=(((2,), (1,)), ((0,), (0,))),
            preferred_element_type=jnp.float32)          # (D, B, 4H)
        i_g = jax.nn.sigmoid(gates[..., 0 * hd:1 * hd])
        f_g = jax.nn.sigmoid(gates[..., 1 * hd:2 * hd])
        g_g = jnp.tanh(gates[..., 2 * hd:3 * hd])
        o_g = jax.nn.sigmoid(gates[..., 3 * hd:4 * hd])
        c = f_g * c + i_g * g_g
        h = o_g * jnp.tanh(c)
        y_ref[t] = h


def lstm_recurrence(xp, whh, h0, c0):
    seq_t, ndir, bsz, _ = xp.shape
    hid = h0.shape[-1]
    full = lambda s: pl.BlockSpec(s, lambda i: (0,) * len(s))
    return pl.pallas_call(
        _lstm_recurrence_kernel,
        out_shape=jax.ShapeDtypeStruct((seq_t, ndir, bsz, hid), jnp.float32),
        grid=(1,),
        in_specs=[full(xp.shape), full(whh.shape), full(h0.shape), full(c0.shape)],
        out_specs=full((seq_t, ndir, bsz, hid)),
        compiler_params=pltpu.CompilerParams(dimension_semantics=("arbitrary",)),
    )(xp, whh, h0, c0)


# ----------------------------------------------------------------------------
# Kernel 4: pointer-net attention hops + final unnormalized attention score.
# Fully vectorized score: one broadcast tanh + one H-reduction (no per-q loop).
# ----------------------------------------------------------------------------
def _ptr_attn_kernel(attn_feat_ref, hop_feat_ref, query_ref, hop_wq_ref,
                     hop_v_ref, attn_wq_ref, attn_v_ref, out_ref, *, n_hop):
    attn_feat = attn_feat_ref[...]                       # (B, M, H)
    hop_feat = hop_feat_ref[...]                         # (B, M, H)
    query = query_ref[...]                               # (B, Q, H)
    b, _, hd = attn_feat.shape
    q = query.shape[1]

    def attn_score(feat, qry, wq, v2):                   # v2: (1, H)
        qw = jnp.dot(qry.reshape(b * q, hd), wq,
                     preferred_element_type=jnp.float32).reshape(b, q, hd)
        s = jnp.tanh(feat[:, None, :, :] + qw[:, :, None, :])   # (B, Q, M, H)
        return jnp.sum(s * v2.reshape(1, 1, 1, hd), axis=-1)    # (B, Q, M)

    for _ in range(n_hop):
        score = attn_score(hop_feat, query, hop_wq_ref[...], hop_v_ref[...])
        # NOTE: faithfully reproduces the reference where `norm_score = score`
        # overrides the softmax / masked normalization (no softmax applied).
        query = jax.lax.dot_general(score, hop_feat,
                                    dimension_numbers=(((2,), (1,)), ((0,), (0,))),
                                    preferred_element_type=jnp.float32)  # (B,Q,H)

    out_ref[...] = attn_score(attn_feat, query, attn_wq_ref[...], attn_v_ref[...])


def ptr_attention(attn_feat, hop_feat, query, hop_wq, hop_v, attn_wq, attn_v,
                  *, n_hop):
    bsz, m, hid = attn_feat.shape
    q = query.shape[1]
    hop_v2 = hop_v.reshape(1, hid)
    attn_v2 = attn_v.reshape(1, hid)
    full = lambda s: pl.BlockSpec(s, lambda i: (0,) * len(s))
    return pl.pallas_call(
        functools.partial(_ptr_attn_kernel, n_hop=n_hop),
        out_shape=jax.ShapeDtypeStruct((bsz, q, m), jnp.float32),
        grid=(1,),
        in_specs=[full(attn_feat.shape), full(hop_feat.shape), full(query.shape),
                  full(hop_wq.shape), full((1, hid)),
                  full(attn_wq.shape), full((1, hid))],
        out_specs=full((bsz, q, m)),
    )(attn_feat, hop_feat, query, hop_wq, hop_v2, attn_wq, attn_v2)


# ----------------------------------------------------------------------------
# Parameter construction (deterministic, synthetic — no checkpoint loading)
# ----------------------------------------------------------------------------
def init_params(key, *, emb_dim, vocab_size, conv_hidden, lstm_hidden,
                lstm_layer, bidirectional):
    keys = iter(jax.random.split(key, 64))
    nxt = lambda: next(keys)
    ndir = 2 if bidirectional else 1
    hid = lstm_hidden
    enc_out_dim = hid * ndir
    p = {}

    emb = jax.random.normal(nxt(), (vocab_size, emb_dim), jnp.float32) * 0.1
    p['embedding'] = emb.at[0].set(0.0)                  # padding_idx=0

    convs = []
    for k in (3, 4, 5):
        w = jax.random.normal(nxt(), (k, emb_dim, conv_hidden), jnp.float32) * 0.1
        b = jax.random.normal(nxt(), (1, conv_hidden), jnp.float32) * 0.1
        convs.append((w, b))
    p['convs'] = convs

    p['art_init_h'] = jax.random.uniform(nxt(), (lstm_layer * ndir, hid),
                                         jnp.float32, -INI, INI)
    p['art_init_c'] = jax.random.uniform(nxt(), (lstm_layer * ndir, hid),
                                         jnp.float32, -INI, INI)
    art_lstm = []
    for layer in range(lstm_layer):
        din = 3 * conv_hidden if layer == 0 else ndir * hid
        dirs = []
        for _ in range(ndir):
            dirs.append(dict(
                w_ih=jax.random.normal(nxt(), (din, 4 * hid), jnp.float32) * 0.1,
                w_hh=jax.random.normal(nxt(), (hid, 4 * hid), jnp.float32) * 0.1,
                b=jax.random.normal(nxt(), (1, 4 * hid), jnp.float32) * 0.1))
        art_lstm.append(dirs)
    p['art_lstm'] = art_lstm

    d = enc_out_dim
    p['ptr_init_h'] = jax.random.uniform(nxt(), (lstm_layer, hid), jnp.float32, -INI, INI)
    p['ptr_init_c'] = jax.random.uniform(nxt(), (lstm_layer, hid), jnp.float32, -INI, INI)
    p['ptr_init_i'] = jax.random.uniform(nxt(), (d,), jnp.float32, -0.1, 0.1)
    ptr_lstm = []
    for layer in range(lstm_layer):
        din = d if layer == 0 else hid
        ptr_lstm.append(dict(
            w_ih=jax.random.normal(nxt(), (din, 4 * hid), jnp.float32) * 0.1,
            w_hh=jax.random.normal(nxt(), (hid, 4 * hid), jnp.float32) * 0.1,
            b=jax.random.normal(nxt(), (1, 4 * hid), jnp.float32) * 0.1))
    p['ptr_lstm'] = ptr_lstm
    p['attn_wm'] = jax.random.normal(nxt(), (d, hid), jnp.float32) * 0.1
    p['attn_wq'] = jax.random.normal(nxt(), (hid, hid), jnp.float32) * 0.1
    p['attn_v'] = jax.random.uniform(nxt(), (hid,), jnp.float32, -INI, INI)
    p['hop_wm'] = jax.random.normal(nxt(), (d, hid), jnp.float32) * 0.1
    p['hop_wq'] = jax.random.normal(nxt(), (hid, hid), jnp.float32) * 0.1
    p['hop_v'] = jax.random.uniform(nxt(), (hid,), jnp.float32, -INI, INI)
    return p


# ----------------------------------------------------------------------------
# PtrExtractSumm.forward
# ----------------------------------------------------------------------------
def ptr_extract_summ_forward(params, article_sents, sent_nums, target, cfg,
                             target_org=None, target_nums=None):
    del target_org, target_nums                          # unused in the reference forward
    bs = len(article_sents)
    max_n = max(sent_nums)
    ndir = 2 if cfg['bidirectional'] else 1
    hid = cfg['lstm_hidden']

    # --- _encode: conv sentence encoder, batched over ALL articles' sentences -
    # TODO(synk): assumes all articles share the same word-length padding L;
    # fall back to per-article calls when L differs.
    tokens = jnp.concatenate(list(article_sents), axis=0)    # (sum_n, L)
    emb = params['embedding'][tokens]                        # gather (glue)
    enc_all = conv_sent_encoder(emb, params['convs'])        # (sum_n, 3*conv_hidden)
    feat_dim = enc_all.shape[-1]
    enc_sents, off = [], 0
    for n in sent_nums:
        enc = enc_all[off:off + n]
        off += n
        if n != max_n:
            enc = jnp.concatenate(
                [enc, jnp.zeros((max_n - n, feat_dim), jnp.float32)], axis=0)
        enc_sents.append(enc)
    enc_sent = jnp.stack(enc_sents, axis=0)                  # (bs, max_n, 3*conv_hidden)

    # --- article-level (bi)LSTM over sentences --------------------------------
    # TODO(synk): pack_padded_sequence length handling is omitted; the example
    # uses sent_nums == max_n for all articles so it matches.
    inp = jnp.transpose(enc_sent, (1, 0, 2))                 # (T, bs, Din)
    seq_t = inp.shape[0]
    for layer in range(cfg['lstm_layer']):
        dirs = params['art_lstm'][layer]
        din = inp.shape[-1]
        # hoisted input projection for BOTH directions in one matmul
        w_ih_cat = jnp.concatenate([dd['w_ih'] for dd in dirs], axis=1)  # (Din, ndir*4H)
        b_cat = jnp.concatenate([dd['b'] for dd in dirs], axis=1)        # (1, ndir*4H)
        xp_all = pallas_matmul(inp.reshape(seq_t * bs, din), w_ih_cat, b_cat)
        xp = jnp.transpose(xp_all.reshape(seq_t, bs, ndir, 4 * hid),
                           (0, 2, 1, 3))                                 # (T, ndir, bs, 4H)
        if ndir == 2:
            xp = jnp.stack([xp[:, 0], xp[:, 1][::-1]], axis=1)           # reverse bwd dir in time
        whh = jnp.stack([dd['w_hh'] for dd in dirs], axis=0)             # (ndir, H, 4H)
        h0 = jnp.stack([jnp.broadcast_to(params['art_init_h'][layer * ndir + d_],
                                         (bs, hid)) for d_ in range(ndir)], axis=0)
        c0 = jnp.stack([jnp.broadcast_to(params['art_init_c'][layer * ndir + d_],
                                         (bs, hid)) for d_ in range(ndir)], axis=0)
        y = lstm_recurrence(xp, whh, h0, c0)                             # (T, ndir, bs, H)
        if ndir == 2:
            inp = jnp.concatenate([y[:, 0], y[:, 1][::-1]], axis=-1)     # (T, bs, 2H)
        else:
            inp = y[:, 0]
    enc_out = jnp.transpose(inp, (1, 0, 2))                              # (bs, max_n, d)

    # --- gather pointer inputs (torch.gather along dim=1) ----------------------
    d = enc_out.shape[2]
    nt = target.shape[1]
    idx = jnp.broadcast_to(target[:, :, None], (bs, nt, d))
    ptr_in = jnp.take_along_axis(enc_out, idx, axis=1)                   # (bs, nt, d)

    # --- LSTMPointerNet._prepare: fused attn/hop projections -------------------
    enc_flat = enc_out.reshape(bs * max_n, d)
    wm_cat = jnp.concatenate([params['attn_wm'], params['hop_wm']], axis=1)
    feats = pallas_matmul(enc_flat, wm_cat)                              # (bs*max_n, 2*hid)
    attn_feat = feats[:, :hid].reshape(bs, max_n, hid)
    hop_feat = feats[:, hid:].reshape(bs, max_n, hid)

    init_i = jnp.broadcast_to(params['ptr_init_i'][None, None, :], (bs, 1, d))
    lstm_in = jnp.concatenate([init_i, ptr_in], axis=1)                  # (bs, nt+1, d)

    # --- pointer LSTM (unidirectional) -----------------------------------------
    xs = jnp.transpose(lstm_in, (1, 0, 2))                               # (T2, bs, d)
    t2 = xs.shape[0]
    for layer in range(cfg['lstm_layer']):
        pr = params['ptr_lstm'][layer]
        din = xs.shape[-1]
        xp = pallas_matmul(xs.reshape(t2 * bs, din), pr['w_ih'], pr['b'])
        xp = xp.reshape(t2, bs, 4 * hid)[:, None]                        # (T2, 1, bs, 4H)
        whh = pr['w_hh'][None]                                           # (1, H, 4H)
        h0 = jnp.broadcast_to(params['ptr_init_h'][layer][None, None, :], (1, bs, hid))
        c0 = jnp.broadcast_to(params['ptr_init_c'][layer][None, None, :], (1, bs, hid))
        y = lstm_recurrence(xp, whh, h0, c0)                             # (T2, 1, bs, H)
        xs = y[:, 0]
    query = jnp.transpose(xs, (1, 0, 2))                                 # (bs, nt+1, hid)

    # --- attention hops + final pointer scores ---------------------------------
    output = ptr_attention(attn_feat, hop_feat, query,
                           params['hop_wq'], params['hop_v'],
                           params['attn_wq'], params['attn_v'],
                           n_hop=cfg['n_hop'])
    return output                                                        # (bs, nt+1, max_n)


# ----------------------------------------------------------------------------
if __name__ == "__main__":
    emb_dim, vocab_size, conv_hidden = 32, 100, 8
    lstm_hidden, n_lstm_layers, use_bidir, n_hop = 16, 1, True, 1
    bs, max_n, seq_len, nt = 2, 6, 12, 3
    cfg = dict(lstm_hidden=lstm_hidden, lstm_layer=n_lstm_layers,
               bidirectional=use_bidir, n_hop=n_hop)

    root = jax.random.PRNGKey(0)
    k_param, k_a0, k_a1, k_tgt = jax.random.split(root, 4)

    params = init_params(k_param, emb_dim=emb_dim, vocab_size=vocab_size,
                         conv_hidden=conv_hidden, lstm_hidden=lstm_hidden,
                         lstm_layer=n_lstm_layers, bidirectional=use_bidir)

    article_sents = [
        jax.random.randint(k_a0, (max_n, seq_len), 1, vocab_size, dtype=jnp.int32),
        jax.random.randint(k_a1, (max_n, seq_len), 1, vocab_size, dtype=jnp.int32),
    ]
    sent_nums = [max_n, max_n]
    target = jax.random.randint(k_tgt, (bs, nt), 0, max_n, dtype=jnp.int32)

    out = ptr_extract_summ_forward(params, article_sents, sent_nums, target, cfg)
    out = jax.block_until_ready(out)
    assert out.shape == (bs, nt + 1, max_n), out.shape
    assert bool(jnp.all(jnp.isfinite(out)))
    print("KERNEL_OK")
</pallas_src>

<mosaic_0001>
module attributes {stable_mosaic.version = 11 : i64} {
  func.func @_conv_sent_kernel(%arg0: i32, %arg1: memref<12x12x32xf32, #tpu.memory_space<vmem>>, %arg2: memref<3x32x8xf32, #tpu.memory_space<vmem>>, %arg3: memref<1x8xf32, #tpu.memory_space<vmem>>, %arg4: memref<4x32x8xf32, #tpu.memory_space<vmem>>, %arg5: memref<1x8xf32, #tpu.memory_space<vmem>>, %arg6: memref<5x32x8xf32, #tpu.memory_space<vmem>>, %arg7: memref<1x8xf32, #tpu.memory_space<vmem>>, %arg8: memref<12x24xf32, #tpu.memory_space<vmem>>) attributes {dimension_semantics = [#tpu.dimension_semantics<parallel>], iteration_bounds = array<i64: 1>, scalar_prefetch = 0 : i64, scratch_operands = 0 : i64, tpu.core_type = #tpu.core_type<tc>, window_params = [{transform_indices = @transform_0, window_bounds = array<i64: 12, 12, 32>}, {pipeline_mode = #tpu.pipeline_mode<synchronous>, transform_indices = @transform_1, window_bounds = array<i64: 3, 32, 8>}, {pipeline_mode = #tpu.pipeline_mode<synchronous>, transform_indices = @transform_2, window_bounds = array<i64: 1, 8>}, {pipeline_mode = #tpu.pipeline_mode<synchronous>, transform_indices = @transform_3, window_bounds = array<i64: 4, 32, 8>}, {pipeline_mode = #tpu.pipeline_mode<synchronous>, transform_indices = @transform_4, window_bounds = array<i64: 1, 8>}, {pipeline_mode = #tpu.pipeline_mode<synchronous>, transform_indices = @transform_5, window_bounds = array<i64: 5, 32, 8>}, {pipeline_mode = #tpu.pipeline_mode<synchronous>, transform_indices = @transform_6, window_bounds = array<i64: 1, 8>}, {transform_indices = @transform_7, window_bounds = array<i64: 12, 24>}]} {
    %c0 = arith.constant 0 : index
    %c0_0 = arith.constant 0 : index
    %c0_1 = arith.constant 0 : index
    %0 = vector.load %arg1[%c0, %c0_0, %c0_1] : memref<12x12x32xf32, #tpu.memory_space<vmem>>, vector<12x12x32xf32>
    %1 = vector.extract_strided_slice %0 {offsets = [0, 0, 0], sizes = [12, 10, 32], strides = [1, 1, 1]} : vector<12x12x32xf32> to vector<12x10x32xf32>
    %2 = vector.extract_strided_slice %0 {offsets = [0, 1, 0], sizes = [12, 10, 32], strides = [1, 1, 1]} : vector<12x12x32xf32> to vector<12x10x32xf32>
    %3 = vector.extract_strided_slice %0 {offsets = [0, 2, 0], sizes = [12, 10, 32], strides = [1, 1, 1]} : vector<12x12x32xf32> to vector<12x10x32xf32>
    %4 = tpu.concatenate %1, %2, %3 in 2 : vector<12x10x32xf32>, vector<12x10x32xf32>, vector<12x10x32xf32> -> vector<12x10x96xf32>
    %5 = vector.shape_cast %4 : vector<12x10x96xf32> to vector<120x96xf32>
    %c0_2 = arith.constant 0 : index
    %c0_3 = arith.constant 0 : index
    %c0_4 = arith.constant 0 : index
    %6 = vector.load %arg2[%c0_2, %c0_3, %c0_4] : memref<3x32x8xf32, #tpu.memory_space<vmem>>, vector<3x32x8xf32>
    %7 = vector.shape_cast %6 : vector<3x32x8xf32> to vector<96x8xf32>
    %cst = arith.constant dense<0.000000e+00> : vector<120x8xf32>
    %8 = tpu.matmul %5, %7, %cst {dimension_numbers = #tpu.dot_dimension_numbers<[1], [0], [0], [1], [0, 0, 1, 1], [], []>} : vector<120x96xf32>, vector<96x8xf32>, vector<120x8xf32> -> vector<120x8xf32>
    %c0_5 = arith.constant 0 : index
    %c0_6 = arith.constant 0 : index
    %9 = vector.load %arg3[%c0_5, %c0_6] : memref<1x8xf32, #tpu.memory_space<vmem>>, vector<1x8xf32>
    %10 = vector.broadcast %9 : vector<1x8xf32> to vector<120x8xf32>
    %11 = arith.addf %8, %10 : vector<120x8xf32>
    %cst_7 = arith.constant 0.000000e+00 : f32
    %12 = vector.broadcast %cst_7 : f32 to vector<120x8xf32>
    %13 = arith.maximumf %11, %12 : vector<120x8xf32>
    %14 = vector.shape_cast %13 : vector<120x8xf32> to vector<12x10x8xf32>
    %cst_8 = arith.constant dense<0xFF800000> : vector<12x8xf32>
    %15 = vector.multi_reduction <maximumf>, %14, %cst_8 [1] : vector<12x10x8xf32> to vector<12x8xf32>
    %c0_9 = arith.constant 0 : index
    %c0_10 = arith.constant 0 : index
    %16 = vector.load %arg8[%c0_9, %c0_10] : memref<12x24xf32, #tpu.memory_space<vmem>>, vector<12x8xf32>
    tpu.vector_store %arg8[%c0_9, %c0_10], %15 {strides = array<i32>} : memref<12x24xf32, #tpu.memory_space<vmem>>, vector<12x8xf32>,
    %17 = vector.extract_strided_slice %0 {offsets = [0, 0, 0], sizes = [12, 9, 32], strides = [1, 1, 1]} : vector<12x12x32xf32> to vector<12x9x32xf32>
    %18 = vector.extract_strided_slice %0 {offsets = [0, 1, 0], sizes = [12, 9, 32], strides = [1, 1, 1]} : vector<12x12x32xf32> to vector<12x9x32xf32>
    %19 = vector.extract_strided_slice %0 {offsets = [0, 2, 0], sizes = [12, 9, 32], strides = [1, 1, 1]} : vector<12x12x32xf32> to vector<12x9x32xf32>
    %20 = vector.extract_strided_slice %0 {offsets = [0, 3, 0], sizes = [12, 9, 32], strides = [1, 1, 1]} : vector<12x12x32xf32> to vector<12x9x32xf32>
    %21 = tpu.concatenate %17, %18, %19, %20 in 2 : vector<12x9x32xf32>, vector<12x9x32xf32>, vector<12x9x32xf32>, vector<12x9x32xf32> -> vector<12x9x128xf32>
    %22 = vector.shape_cast %21 : vector<12x9x128xf32> to vector<108x128xf32>
    %c0_11 = arith.constant 0 : index
    %c0_12 = arith.constant 0 : index
    %c0_13 = arith.constant 0 : index
    %23 = vector.load %arg4[%c0_11, %c0_12, %c0_13] : memref<4x32x8xf32, #tpu.memory_space<vmem>>, vector<4x32x8xf32>
    %24 = vector.shape_cast %23 : vector<4x32x8xf32> to vector<128x8xf32>
    %cst_14 = arith.constant dense<0.000000e+00> : vector<108x8xf32>
    %25 = tpu.matmul %22, %24, %cst_14 {dimension_numbers = #tpu.dot_dimension_numbers<[1], [0], [0], [1], [0, 0, 1, 1], [], []>} : vector<108x128xf32>, vector<128x8xf32>, vector<108x8xf32> -> vector<108x8xf32>
    %c0_15 = arith.constant 0 : index
    %c0_16 = arith.constant 0 : index
    %26 = vector.load %arg5[%c0_15, %c0_16] : memref<1x8xf32, #tpu.memory_space<vmem>>, vector<1x8xf32>
    %27 = vector.broadcast %26 : vector<1x8xf32> to vector<108x8xf32>
    %28 = arith.addf %25, %27 : vector<108x8xf32>
    %cst_17 = arith.constant 0.000000e+00 : f32
    %29 = vector.broadcast %cst_17 : f32 to vector<108x8xf32>
    %30 = arith.maximumf %28, %29 : vector<108x8xf32>
    %31 = vector.shape_cast %30 : vector<108x8xf32> to vector<12x9x8xf32>
    %cst_18 = arith.constant dense<0xFF800000> : vector<12x8xf32>
    %32 = vector.multi_reduction <maximumf>, %31, %cst_18 [1] : vector<12x9x8xf32> to vector<12x8xf32>
    %c0_19 = arith.constant 0 : index
    %c8 = arith.constant 8 : index
    %33 = vector.load %arg8[%c0_19, %c8] : memref<12x24xf32, #tpu.memory_space<vmem>>, vector<12x8xf32>
    tpu.vector_store %arg8[%c0_19, %c8], %32 {strides = array<i32>} : memref<12x24xf32, #tpu.memory_space<vmem>>, vector<12x8xf32>,
    %34 = vector.extract_strided_slice %0 {offsets = [0, 0, 0], sizes = [12, 8, 32], strides = [1, 1, 1]} : vector<12x12x32xf32> to vector<12x8x32xf32>
    %35 = vector.extract_strided_slice %0 {offsets = [0, 1, 0], sizes = [12, 8, 32], strides = [1, 1, 1]} : vector<12x12x32xf32> to vector<12x8x32xf32>
    %36 = vector.extract_strided_slice %0 {offsets = [0, 2, 0], sizes = [12, 8, 32], strides = [1, 1, 1]} : vector<12x12x32xf32> to vector<12x8x32xf32>
    %37 = vector.extract_strided_slice %0 {offsets = [0, 3, 0], sizes = [12, 8, 32], strides = [1, 1, 1]} : vector<12x12x32xf32> to vector<12x8x32xf32>
    %38 = vector.extract_strided_slice %0 {offsets = [0, 4, 0], sizes = [12, 8, 32], strides = [1, 1, 1]} : vector<12x12x32xf32> to vector<12x8x32xf32>
    %39 = tpu.concatenate %34, %35, %36, %37, %38 in 2 : vector<12x8x32xf32>, vector<12x8x32xf32>, vector<12x8x32xf32>, vector<12x8x32xf32>, vector<12x8x32xf32> -> vector<12x8x160xf32>
    %40 = vector.shape_cast %39 : vector<12x8x160xf32> to vector<96x160xf32>
    %c0_20 = arith.constant 0 : index
    %c0_21 = arith.constant 0 : index
    %c0_22 = arith.constant 0 : index
    %41 = vector.load %arg6[%c0_20, %c0_21, %c0_22] : memref<5x32x8xf32, #tpu.memory_space<vmem>>, vector<5x32x8xf32>
    %42 = vector.shape_cast %41 : vector<5x32x8xf32> to vector<160x8xf32>
    %cst_23 = arith.constant dense<0.000000e+00> : vector<96x8xf32>
    %43 = tpu.matmul %40, %42, %cst_23 {dimension_numbers = #tpu.dot_dimension_numbers<[1], [0], [0], [1], [0, 0, 1, 1], [], []>} : vector<96x160xf32>, vector<160x8xf32>, vector<96x8xf32> -> vector<96x8xf32>
    %c0_24 = arith.constant 0 : index
    %c0_25 = arith.constant 0 : index
    %44 = vector.load %arg7[%c0_24, %c0_25] : memref<1x8xf32, #tpu.memory_space<vmem>>, vector<1x8xf32>
    %45 = vector.broadcast %44 : vector<1x8xf32> to vector<96x8xf32>
    %46 = arith.addf %43, %45 : vector<96x8xf32>
    %cst_26 = arith.constant 0.000000e+00 : f32
    %47 = vector.broadcast %cst_26 : f32 to vector<96x8xf32>
    %48 = arith.maximumf %46, %47 : vector<96x8xf32>
    %49 = vector.shape_cast %48 : vector<96x8xf32> to vector<12x8x8xf32>
    %cst_27 = arith.constant dense<0xFF800000> : vector<12x8xf32>
    %50 = vector.multi_reduction <maximumf>, %49, %cst_27 [1] : vector<12x8x8xf32> to vector<12x8xf32>
    %c0_28 = arith.constant 0 : index
    %c16 = arith.constant 16 : index
    %51 = vector.load %arg8[%c0_28, %c16] : memref<12x24xf32, #tpu.memory_space<vmem>>, vector<12x8xf32>
    tpu.vector_store %arg8[%c0_28, %c16], %50 {strides = array<i32>} : memref<12x24xf32, #tpu.memory_space<vmem>>, vector<12x8xf32>,
    return
  }
  func.func @transform_0(%arg0: i32) -> (i32, i32, i32) {
    %c0_i32 = arith.constant 0 : i32
    %c0_i32_0 = arith.constant 0 : i32
    %c0_i32_1 = arith.constant 0 : i32
    return %arg0, %c0_i32, %c0_i32_0 : i32, i32, i32
  }
  func.func @transform_1(%arg0: i32) -> (i32, i32, i32) {
    %c0_i32 = arith.constant 0 : i32
    %c0_i32_0 = arith.constant 0 : i32
    %c0_i32_1 = arith.constant 0 : i32
    %c0_i32_2 = arith.constant 0 : i32
    return %c0_i32, %c0_i32_0, %c0_i32_1 : i32, i32, i32
  }
  func.func @transform_2(%arg0: i32) -> (i32, i32) {
    %c0_i32 = arith.constant 0 : i32
    %c0_i32_0 = arith.constant 0 : i32
    %c0_i32_1 = arith.constant 0 : i32
    return %c0_i32, %c0_i32_0 : i32, i32
  }
  func.func @transform_3(%arg0: i32) -> (i32, i32, i32) {
    %c0_i32 = arith.constant 0 : i32
    %c0_i32_0 = arith.constant 0 : i32
    %c0_i32_1 = arith.constant 0 : i32
    %c0_i32_2 = arith.constant 0 : i32
    return %c0_i32, %c0_i32_0, %c0_i32_1 : i32, i32, i32
  }
  func.func @transform_4(%arg0: i32) -> (i32, i32) {
    %c0_i32 = arith.constant 0 : i32
    %c0_i32_0 = arith.constant 0 : i32
    %c0_i32_1 = arith.constant 0 : i32
    return %c0_i32, %c0_i32_0 : i32, i32
  }
  func.func @transform_5(%arg0: i32) -> (i32, i32, i32) {
    %c0_i32 = arith.constant 0 : i32
    %c0_i32_0 = arith.constant 0 : i32
    %c0_i32_1 = arith.constant 0 : i32
    %c0_i32_2 = arith.constant 0 : i32
    return %c0_i32, %c0_i32_0, %c0_i32_1 : i32, i32, i32
  }
  func.func @transform_6(%arg0: i32) -> (i32, i32) {
    %c0_i32 = arith.constant 0 : i32
    %c0_i32_0 = arith.constant 0 : i32
    %c0_i32_1 = arith.constant 0 : i32
    return %c0_i32, %c0_i32_0 : i32, i32
  }
  func.func @transform_7(%arg0: i32) -> (i32, i32) {
    %c0_i32 = arith.constant 0 : i32
    %c0_i32_0 = arith.constant 0 : i32
    return %arg0, %c0_i32 : i32, i32
  }
}

</mosaic_0001>

<bundles_post_ra>
// kernel: tpu_custom_call.1
= control target key start
LH: loop header
LB: loop body
LE: loop exit
PB: predicated region body
PF: predicated region fallthrough
CT: control target
= control target key end

     0   :  { %vm75_vm0 = vcmask 1046528   ;;  %vm184_vm1 = vcmask 1045504   ;;  %s5886_s9 = smov 32   ;;  %vm1841_vm2 = vcmask 1044480   ;;  %s5887_s10 = smov 64   ;;  %s8194_s0 = inlined_call_operand.vmem [shape: f32[12,12,32], index: 0, kind: input, shape index: {}]   ;;  %s8195_s1 = inlined_call_operand.vmem [shape: f32[3,32,8], index: 1, kind: input, shape index: {}]   ;;  %s8196_s2 = inlined_call_operand.vmem [shape: f32[1,8], index: 2, kind: input, shape index: {}]   ;;  %s8197_s3 = inlined_call_operand.vmem [shape: f32[4,32,8], index: 3, kind: input, shape index: {}]   ;;  %s8198_s4 = inlined_call_operand.vmem [shape: f32[1,8], index: 4, kind: input, shape index: {}]   ;;  %s8199_s5 = inlined_call_operand.vmem [shape: f32[5,32,8], index: 5, kind: input, shape index: {}]   ;;  %s8200_s6 = inlined_call_operand.vmem [shape: f32[1,8], index: 6, kind: input, shape index: {}]   ;;  %s8201_s7 = inlined_call_operand.hbm [shape: f32[12,24], index: 7, kind: output, shape index: {}]  }
   0x1   :  { %v5940_v0 = vld [vmem:[%s8194_s0 + $0x10] sm:$0xff]  ;;  %v5945_v1 = vld [vmem:[%s8194_s0 + $0x18] sm:$0xf]  ;;  %v5950_v2 = vld [vmem:[%s8194_s0] sm:$0xff]  ;;  %s5888_s15 = smov 96  }
   0x2   :  { %v79_v3 = vrot.slane %v5940_v0, 1  ;;  %v80_v4 = vrot.slane %v5945_v1, 1  ;;  %v5957_v5 = vld [vmem:[%s8194_s0 + $0x8] sm:$0xf]  ;;  %v76_v6 = vrot.slane %v5950_v2, 1  ;;  %v188_v8 = vrot.slane %v5940_v0, 2 }
   0x3   :  { %v77_v7 = vrot.slane %v5957_v5, 1  ;;  %v189_v9 = vrot.slane %v5945_v1, 2  ;;  %v185_v10 = vrot.slane %v5950_v2, 2  ;;  %v186_v12 = vrot.slane %v5957_v5, 2  ;;  %v5986_v22 = vld [vmem:[%s8194_s0 + $0x20] sm:$0xff]  ;;  %v2769_v24 = vld [vmem:[%s8197_s3 + $0x78] sm:$0xff] }
   0x4   :  { %v81_v11 = vsel %vm75_vm0, %v79_v3, %v80_v4  ;;  %v1845_v15 = vrot.slane %v5940_v0, 3  ;;  %v1846_v16 = vrot.slane %v5945_v1, 3  ;;  %v1842_v18 = vrot.slane %v5950_v2, 3  ;;  %v5991_v23 = vld [vmem:[%s8194_s0 + $0x28] sm:$0xf]  ;;  %v2768_v25 = vld [vmem:[%s8197_s3 + $0x70] sm:$0xff]  ;;  %5734 = vmatprep.subr.mxu1 %v2769_v24 }
   0x5   :  { %116 = vrot.lane.b32.xlu1 %v81_v11, %s5886_s9  ;;  %v78_v13 = vsel %vm75_vm0, %v76_v6, %v77_v7  ;;  %v190_v14 = vsel %vm184_vm1, %v188_v8, %v189_v9  ;;  %v187_v17 = vsel %vm184_vm1, %v185_v10, %v186_v12  ;;  %v1843_v19 = vrot.slane %v5957_v5, 3  ;;  %5735 = vmatpush3.msra.mxu1 %v2769_v24  ;;  %v2767_v28 = vld [vmem:[%s8197_s3 + $0x68] sm:$0xff]  ;;  %v2766_v29 = vld [vmem:[%s8197_s3 + $0x60] sm:$0xff]  ;;  %v2765_v33 = vld [vmem:[%s8197_s3 + $0x58] sm:$0xff] }
   0x6   :  { %112 = vrot.lane.b32.xlu0 %v78_v13, %s5886_s9  ;;  %v1847_v20 = vsel %vm1841_vm2, %v1845_v15, %v1846_v16  ;;  %v82_v26 = vrot.slane %v5986_v22, 1  ;;  %v83_v27 = vrot.slane %v5991_v23, 1  ;;  %5736 = vmatprep.subr.mxu1 %v2768_v25  ;;  %v191_v31 = vrot.slane %v5986_v22, 2  ;;  %v2764_v34 = vld [vmem:[%s8197_s3 + $0x50] sm:$0xff] }
   0x7   :  { %v1844_v21 = vsel %vm1841_vm2, %v1842_v18, %v1843_v19  ;;  %5737 = vmatpush3.msra.mxu1 %v2768_v25  ;;  %v192_v32 = vrot.slane %v5991_v23, 2 }
   0x8   :  { %v84_v30 = vsel %vm75_vm0, %v82_v26, %v83_v27  ;;  %5738 = vmatprep.subr.mxu1 %v2767_v28 }
   0x9   :  { %225 = vrot.lane.b32.xlu1 %v190_v14, %s5887_s10  ;;  %5739 = vmatpush3.msra.mxu1 %v2767_v28 }
   0xa   :  { %221 = vrot.lane.b32.xlu0 %v187_v17, %s5887_s10  ;;  %5740 = vmatprep.subr.mxu1 %v2766_v29 }
   0xb   :  { %5741 = vmatpush3.msra.mxu1 %v2766_v29 }
   0xd   :  { %1882 = vrot.lane.b32.xlu1 %v1847_v20, %s5888_s15 }
   0xe   :  { %1878 = vrot.lane.b32.xlu0 %v1844_v21, %s5888_s15 }
  0x11   :  { %223 = vrot.lane.b32.xlu1 %v186_v12, %s5887_s10 }
  0x12   :  { %114 = vrot.lane.b32.xlu0 %v77_v7, %s5886_s9 }
  0x15   :  { %120 = vrot.lane.b32.xlu1 %v84_v30, %s5886_s9 }
  0x16   :  { %12 = vsyncpa [#allocation3], 0  ;;  %1880 = vrot.lane.b32.xlu0 %v1843_v19, %s5888_s15  ;;  %5742 = vmatprep.subr.mxu1 %v2765_v33  ;;  %v193_v35 = vsel %vm184_vm1, %v191_v31, %v192_v32  ;;  %v6026_v36 = vld [vmem:[%s8194_s0 + $0x30] sm:$0xff]  ;;  %v6031_v37 = vld [vmem:[%s8194_s0 + $0x38] sm:$0xf]  ;;  %v5889_v40 = vmov 0.0  }
  0x17   :  { %5743 = vmatpush3.msra.mxu1 %v2765_v33  ;;  %v666_v38 = vld [vmem:[%s8195_s1 + $0x58] sm:$0xff]  ;;  %v2763_v39 = vld [vmem:[%s8197_s3 + $0x48] sm:$0xff]  ;;  %5665 = vmatprep.subr.mxu0 %v5889_v40  ;;  %v665_v41 = vld [vmem:[%s8195_s1 + $0x50] sm:$0xff]  ;;  %v85_v42 = vrot.slane %v6026_v36, 1  ;;  %v86_v43 = vrot.slane %v6031_v37, 1  ;;  %v1848_v46 = vrot.slane %v5986_v22, 3 }
  0x18   :  { %5744 = vmatprep.subr.mxu1 %v2764_v34  ;;  %5666 = vmatpush3.msra.mxu0 %v666_v38  ;;  %v664_v44 = vld [vmem:[%s8195_s1 + $0x48] sm:$0xff]  ;;  %v2762_v45 = vld [vmem:[%s8197_s3 + $0x40] sm:$0xff]  ;;  %v1849_v47 = vrot.slane %v5991_v23, 3  ;;  %v194_v50 = vrot.slane %v6026_v36, 2  ;;  %v195_v51 = vrot.slane %v6031_v37, 2  ;;  %v662_v52 = vld [vmem:[%s8195_s1 + $0x38] sm:$0xff] }
  0x19   :  { %118 = vrot.lane.b32.xlu1 %v80_v4, %s5886_s9  ;;  %5745 = vmatpush3.msra.mxu1 %v2764_v34  ;;  %v663_v48 = vld [vmem:[%s8195_s1 + $0x40] sm:$0xff]  ;;  %v87_v49 = vsel %vm75_vm0, %v85_v42, %v86_v43  ;;  %v2761_v53 = vld [vmem:[%s8197_s3 + $0x38] sm:$0xff]  ;;  %v661_v55 = vld [vmem:[%s8195_s1 + $0x30] sm:$0xff]  ;;  %v1851_v57 = vrot.slane %v6026_v36, 3  ;;  %v1852_v58 = vrot.slane %v6031_v37, 3  ;;  %vm5890_vm3 = vmmov 0  }
  0x1a   :  { %229 = vrot.lane.b32.xlu0 %v193_v35, %s5887_s10  ;;  %5746 = vmatprep.subr.mxu1 %v2763_v39  ;;  %v1850_v54 = vsel %vm1841_vm2, %v1848_v46, %v1849_v47  ;;  %v196_v56 = vsel %vm184_vm1, %v194_v50, %v195_v51  ;;  %v6089_v59 = vld [vmem:[%s8194_s0 + $0x40] sm:$0xff]  ;;  %v6094_v60 = vld [vmem:[%s8194_s0 + $0x48] sm:$0xf]  ;;  %v2760_v62 = vld [vmem:[%s8197_s3 + $0x30] sm:$0xff]  ;;  %vm293_vm4 = vcmask 261120   ;;  %vm318_vm5 = vcmask 523264  }
  0x1b   :  { %5667 = vmatprep.subr.mxu0 %v5889_v40  ;;  %5747 = vmatpush3.msra.mxu1 %v2763_v39  ;;  %v660_v61 = vld [vmem:[%s8195_s1 + $0x28] sm:$0xff]  ;;  %v659_v63 = vld [vmem:[%s8195_s1 + $0x20] sm:$0xff]  ;;  %v1853_v3 = vsel %vm1841_vm2, %v1851_v57, %v1852_v58  ;;  %v88_v4 = vrot.slane %v6089_v59, 1  ;;  %v89_v6 = vrot.slane %v6094_v60, 1  ;;  %v6119_v7 = vld [vmem:[%s8194_s0 + $0x50] sm:$0xff]  ;;  %v197_v15 = vrot.slane %v6089_v59, 2 }
  0x1c   :  { %5668 = vmatpush3.msra.mxu0 %v665_v41  ;;  %5748 = vmatprep.subr.mxu1 %v2762_v45  ;;  %v6124_v8 = vld [vmem:[%s8194_s0 + $0x58] sm:$0xf]  ;;  %v2759_v10 = vld [vmem:[%s8197_s3 + $0x28] sm:$0xff]  ;;  %v91_v11 = vrot.slane %v6119_v7, 1  ;;  %v657_v13 = vld [vmem:[%s8195_s1 + $0x10] sm:$0xff]  ;;  %v198_v17 = vrot.slane %v6094_v60, 2 }
  0x1d   :  { %122 = vrot.lane.b32.xlu1 %v83_v27, %s5886_s9  ;;  %5669 = vmatprep.subr.mxu0 %v5889_v40  ;;  %v92_v12 = vrot.slane %v6124_v8, 1  ;;  %v90_v14 = vsel %vm75_vm0, %v88_v4, %v89_v6  ;;  %v656_v18 = vld [vmem:[%s8195_s1 + $0x8] sm:$0xff]  ;;  %v2758_v19 = vld [vmem:[%s8197_s3 + $0x20] sm:$0xff]  ;;  %v200_v21 = vrot.slane %v6119_v7, 2  ;;  %v201_v24 = vrot.slane %v6124_v8, 2  ;;  %v2757_v27 = vld [vmem:[%s8197_s3 + $0x18] sm:$0xff] }
  0x1e   :  { %227 = vrot.lane.b32.xlu0 %v189_v9, %s5887_s10  ;;  %5670 = vmatpush3.msra.mxu0 %v664_v44  ;;  %v658_v9 = vld [vmem:[%s8195_s1 + $0x18] sm:$0xff]  ;;  %v655_v25 = vld [vmem:[%s8195_s1] sm:$0xff]  ;;  %v199_v26 = vsel %vm184_vm1, %v197_v15, %v198_v17  ;;  %v1854_v29 = vrot.slane %v6089_v59, 3  ;;  %v1855_v30 = vrot.slane %v6094_v60, 3  ;;  %v2756_v31 = vld [vmem:[%s8197_s3 + $0x10] sm:$0xff]  ;;  %v1857_v35 = vrot.slane %v6119_v7, 3 }
  0x1f   :  { %5671 = vmatprep.subr.mxu0 %v5889_v40  ;;  %5749 = vmatpush3.msra.mxu1 %v2762_v45  ;;  %v93_v20 = vsel %vm75_vm0, %v91_v11, %v92_v12  ;;  %v202_v28 = vsel %vm184_vm1, %v200_v21, %v201_v24  ;;  %v2754_v34 = vld [vmem:[%s8197_s3] sm:$0xff]  ;;  %v1858_v38 = vrot.slane %v6124_v8, 3  ;;  %v6198_v39 = vld [vmem:[%s8194_s0 + $0x70] sm:$0xff]  ;;  %v40_v42 = vld [vmem:[%s8194_s0 + $0x68] sm:$0xf]  ;;  %vm929_vm6 = vcmask 785408  }
  0x20   :  { %5672 = vmatpush3.msra.mxu0 %v663_v48  ;;  %5750 = vmatprep.subr.mxu1 %v2761_v53  ;;  %v1856_v33 = vsel %vm1841_vm2, %v1854_v29, %v1855_v30  ;;  %v6208_v41 = vld [vmem:[%s8194_s0 + $0x60] sm:$0xff]  ;;  %v95_v48 = vrot.slane %v40_v42, 1  ;;  %v204_v50 = vrot.slane %v40_v42, 2  ;;  %v1861_v57 = vrot.slane %v40_v42, 3  ;;  %v6253_v4 = vld [vmem:[%s8194_s0 + $0x88] sm:$0xf] }
  0x21   :  { %231 = vrot.lane.b32.xlu1 %v192_v32, %s5887_s10  ;;  %5673 = vmatprep.subr.mxu0 %v5889_v40  ;;  %v2755_v32 = vld [vmem:[%s8197_s3 + $0x8] sm:$0xff]  ;;  %v1859_v45 = vsel %vm1841_vm2, %v1857_v35, %v1858_v38  ;;  %v94_v46 = vrot.slane %v6208_v41, 1  ;;  %v6273_v15 = vld [vmem:[%s8194_s0 + $0x98] sm:$0xf]  ;;  %v1867_v21 = vrot.slane %v6253_v4, 3  ;;  %v47_v8 = vld [vmem:[%s8194_s0 + $0xa0] sm:$0xff] }
  0x22   :  { %124 = vrot.lane.b32.xlu0 %v87_v49, %s5886_s9  ;;  %5674 = vmatpush3.msra.mxu0 %v662_v52  ;;  %v203_v49 = vrot.slane %v6208_v41, 2  ;;  %v213_v29 = vrot.slane %v6273_v15, 2  ;;  %v215_v35 = vrot.slane %v47_v8, 2  ;;  %v1872_v42 = vrot.slane %v47_v8, 3  ;;  %s5894_s18 = smov 16   ;;  %s5895_s19 = smov [#allocation2]  }
  0x23   :  { %5675 = vmatprep.subr.mxu0 %v5889_v40  ;;  %5689 = vmatprep.mubr.msk.f32.mxu0 %vm5890_vm3, %v5889_v40  ;;  %vm5197_vm7 = vcmask 1043456   ;;  %vm1697_vm8 = vcmask 64512   ;;  %vm1699_vm9 = vcmask 58368   ;;  %vm5057_vm10 = vcmask 57344   ;;  %s5543_s20 = sshll.u32 %s5895_s19, 4  ;;  %s5544_s20 = int_to_ptr.vmem [resolvable:$true] %s5543_s20 }
  0x24   :  { %5676 = vmatpush3.msra.mxu0 %v661_v55  ;;  %5751 = vmatpush3.msra.mxu1 %v2761_v53  ;;  %v205_v52 = vsel %vm184_vm1, %v203_v49, %v204_v50  ;;  %v206_v53 = vrot.slane %v6198_v39, 2  ;;  %vm1819_vm11 = vcmask 1041409   ;;  %vm1821_vm12 = vcmask 1042434   ;;  %s5864_s21 = scalar_lea.vmem %s5544_s20, 256  ;;  %p5869_p1 = scmp.lt.s32.totalorder %s5544_s20, %s5544_s20 }
  0x25   :  { %1886 = vrot.lane.b32.xlu1 %v1850_v54, %s5888_s15  ;;  %5677 = vmatprep.subr.mxu0 %v5889_v40  ;;  %vm1823_vm13 = vcmask 1043459   ;;  %vm1825_vm14 = vcmask 1044484   ;;  %vm1827_vm15 = vcmask 1045509   ;;  %p5865_p0 = scmp.ne.s32.totalorder %s5544_s20, %s5864_s21  ;;  %p5870_p2 = scmp.lt.s32.totalorder %s5864_s21, %s5864_s21 }
  0x26   :  { %233 = vrot.lane.b32.xlu0 %v196_v56, %s5887_s10  ;;  %5678 = vmatpush3.msra.mxu0 %v660_v61  ;;  %v1860_v56 = vrot.slane %v6208_v41, 3 }
  0x27   :  { %5679 = vmatprep.subr.mxu0 %v5889_v40  ;;  %5752 = vmatprep.subr.mxu1 %v2760_v62  ;;  %p5871_p3 = por %p5870_p2, %p5869_p1 }
  0x28   :  { %5680 = vmatpush3.msra.mxu0 %v659_v63  ;;  %5753 = vmatpush3.msra.mxu1 %v2760_v62  ;;  %v1862_v61 = vsel %vm1841_vm2, %v1860_v56, %v1861_v57  ;;  %v1863_v62 = vrot.slane %v6198_v39, 3 }
  0x29   :  { %126 = vrot.lane.b32.xlu1 %v86_v43, %s5886_s9  ;;  %5681 = vmatprep.subr.mxu0 %v5889_v40  ;;  %v97_v43 = vrot.slane %v6198_v39, 1  ;;  %p5872_p4 = pnand %p5871_p3, %p5865_p0 }
  0x2a   :  { %1890 = vrot.lane.b32.xlu0 %v1853_v3, %s5888_s15  ;;  %5682 = vmatpush3.msra.mxu0 %v658_v9  ;;  %v43_v3 = vld [vmem:[%s8194_s0 + $0x80] sm:$0xff]  ;;  %v101_v9 = vrot.slane %v6253_v4, 1 }
  0x2b   :  { %5683 = vmatprep.subr.mxu0 %v5889_v40  ;;  %5754 = vmatprep.subr.mxu1 %v2759_v10  ;;  %v209_v11 = vrot.slane %v43_v3, 2 }
  0x2c   :  { %5684 = vmatpush3.msra.mxu0 %v657_v13  ;;  %5755 = vmatpush3.msra.mxu1 %v2759_v10  ;;  %v210_v13 = vrot.slane %v6253_v4, 2 }
  0x2d   :  { %235 = vrot.lane.b32.xlu1 %v195_v51, %s5887_s10  ;;  %5685 = vmatprep.subr.mxu0 %v5889_v40  ;;  %v96_v51 = vsel %vm75_vm0, %v94_v46, %v95_v48  ;;  %v5891_v46 = vmov 1983009808  }
  0x2e   :  { %128 = vrot.lane.b32.xlu0 %v90_v14, %s5886_s9  ;;  %5686 = vmatpush3.msra.mxu0 %v656_v18  ;;  %v45_v14 = vld [vmem:[%s8194_s0 + $0x90] sm:$0xff]  ;;  %v104_v18 = vrot.slane %v6273_v15, 1 }
  0x2f   :  { %5687 = vmatprep.subr.mxu0 %v5889_v40  ;;  %5756 = vmatprep.subr.mxu1 %v2758_v19 }
  0x30   :  { %5688 = vmatpush3.msra.mxu0 %v655_v25  ;;  %5757 = vmatpush3.msra.mxu1 %v2758_v19  ;;  %v106_v25 = vrot.slane %v47_v8, 1 }
  0x31   :  { %132 = vrot.lane.b32.xlu1 %v93_v20, %s5886_s9  ;;  %5758 = vmatprep.subr.mxu1 %v2757_v27  ;;  %v1866_v20 = vrot.slane %v43_v3, 3 }
  0x32   :  { %237 = vrot.lane.b32.xlu0 %v199_v26, %s5887_s10  ;;  %5285 = vmatprep.subr.mxu0 %v5889_v40 }
  0x33   :  { %5759 = vmatpush3.msra.mxu1 %v2757_v27  ;;  %v1868_v27 = vsel %vm1841_vm2, %v1866_v20, %v1867_v21 }
  0x34   :  { %5760 = vmatprep.subr.mxu1 %v2756_v31 }
  0x35   :  { %241 = vrot.lane.b32.xlu1 %v202_v28, %s5887_s10  ;;  %5761 = vmatpush3.msra.mxu1 %v2756_v31  ;;  %v212_v28 = vrot.slane %v45_v14, 2  ;;  %v1869_v31 = vrot.slane %v45_v14, 3 }
  0x36   :  { %1884 = vrot.lane.b32.xlu0 %v1846_v16, %s5888_s15  ;;  %v6203_v16 = vld [vmem:[%s8194_s0 + $0x78] sm:$0xf]  ;;  %5762 = vmatprep.subr.mxu1 %v2755_v32 }
  0x37   :  { %5763 = vmatpush3.msra.mxu1 %v2755_v32  ;;  %v98_v44 = vrot.slane %v6203_v16, 1  ;;  %v207_v54 = vrot.slane %v6203_v16, 2  ;;  %v1864_v63 = vrot.slane %v6203_v16, 3  ;;  %v1870_v32 = vrot.slane %v6273_v15, 3 }
  0x38   :  { %5764 = vmatprep.subr.mxu1 %v2754_v34 }
  0x39   :  { %1894 = vrot.lane.b32.xlu1 %v1856_v33, %s5888_s15  ;;  %5765 = vmatpush3.msra.mxu1 %v2754_v34  ;;  %v208_v55 = vsel %vm184_vm1, %v206_v53, %v207_v54  ;;  %v214_v33 = vsel %vm184_vm1, %v212_v28, %v213_v29  ;;  %v1871_v34 = vsel %vm1841_vm2, %v1869_v31, %v1870_v32 }
  0x3a   :  { %1888 = vrot.lane.b32.xlu0 %v1849_v47, %s5888_s15  ;;  %5787 = vmatprep.subr.mxu1 %v5889_v40  ;;  %v99_v47 = vsel %vm75_vm0, %v97_v43, %v98_v44 }
  0x3d   :  { %130 = vrot.lane.b32.xlu1 %v89_v6, %s5886_s9  ;;  %v100_v6 = vrot.slane %v43_v3, 1 }
  0x3e   :  { %1898 = vrot.lane.b32.xlu0 %v1859_v45, %s5888_s15  ;;  %v6329_v45 = vld [vmem:[%s8194_s0 + $0xb8] sm:$0xf] }
  0x3f   :  { %v102_v10 = vsel %vm75_vm0, %v100_v6, %v101_v9 }
  0x41   :  { %140 = vrot.lane.b32.xlu1 %v99_v47, %s5886_s9  ;;  %v371_v47 = vlaneseq }
  0x42   :  { %136 = vrot.lane.b32.xlu0 %v96_v51, %s5886_s9  ;;  %v110_v51 = vrot.slane %v6329_v45, 1 }
  0x43   :  { %v372_v53 = vshrl.u32 %v371_v47, 7 }
  0x45   :  { %245 = vrot.lane.b32.xlu1 %v205_v52, %s5887_s10 }
  0x46   :  { %239 = vrot.lane.b32.xlu0 %v198_v17, %s5887_s10  ;;  %v103_v17 = vrot.slane %v45_v14, 1 }
  0x48   :  { %v105_v19 = vsel %vm75_vm0, %v103_v17, %v104_v18 }
  0x49   :  { %249 = vrot.lane.b32.xlu1 %v208_v55, %s5887_s10 }
  0x4a   :  { %1892 = vrot.lane.b32.xlu0 %v1852_v58, %s5888_s15  ;;  %v1865_v58 = vsel %vm1841_vm2, %v1863_v62, %v1864_v63 }
  0x4d   :  { %1902 = vrot.lane.b32.xlu1 %v1862_v61, %s5888_s15 }
  0x4e   :  { %1896 = vrot.lane.b32.xlu0 %v1855_v30, %s5888_s15 }
  0x51   :  { %1906 = vrot.lane.b32.xlu1 %v1865_v58, %s5888_s15 }
  0x52   :  { %134 = vrot.lane.b32.xlu0 %v92_v12, %s5886_s9  ;;  %v211_v12 = vsel %vm184_vm1, %v209_v11, %v210_v13 }
  0x55   :  { %144 = vrot.lane.b32.xlu1 %v102_v10, %s5886_s9 }
  0x56   :  { %138 = vrot.lane.b32.xlu0 %v95_v48, %s5886_s9  ;;  %v369_v48 = vunpack.c.l.s4 %v5891_v46 }
  0x58   :  { %v370_v52 = vunpack.c.0.s8 %v369_v48 }
  0x59   :  { %247 = vrot.lane.b32.xlu1 %v204_v50, %s5887_s10 }
  0x5a   :  { %243 = vrot.lane.b32.xlu0 %v201_v24, %s5887_s10  ;;  %v6293_v24 = vld [vmem:[%s8194_s0 + $0xa8] sm:$0xf]  ;;  %v6344_v3 = vsub.s32 %v370_v52, %v372_v53 }
  0x5b   :  { %v107_v26 = vrot.slane %v6293_v24, 1  ;;  %v1873_v43 = vrot.slane %v6293_v24, 3 }
  0x5d   :  { %1900 = vrot.lane.b32.xlu1 %v1858_v38, %s5888_s15  ;;  %v108_v30 = vsel %vm75_vm0, %v106_v25, %v107_v26  ;;  %v216_v38 = vrot.slane %v6293_v24, 2  ;;  %v1874_v49 = vsel %vm1841_vm2, %v1872_v42, %v1873_v43 }
  0x5e   :  { %253 = vrot.lane.b32.xlu0 %v211_v12, %s5887_s10 }
  0x5f   :  { %v217_v16 = vsel %vm184_vm1, %v215_v35, %v216_v38 }
  0x61   :  { %1904 = vrot.lane.b32.xlu1 %v1861_v57, %s5888_s15  ;;  %v219_v57 = vrot.slane %v6329_v45, 2 }
  0x62   :  { %148 = vrot.lane.b32.xlu0 %v105_v19, %s5886_s9 }
  0x65   :  { %142 = vrot.lane.b32.xlu1 %v98_v44, %s5886_s9  ;;  %v49_v44 = vld [vmem:[%s8194_s0 + $0xb0] sm:$0xff] }
  0x66   :  { %1910 = vrot.lane.b32.xlu0 %v1868_v27, %s5888_s15  ;;  %v109_v50 = vrot.slane %v49_v44, 1  ;;  %v218_v56 = vrot.slane %v49_v44, 2  ;;  %v1875_v17 = vrot.slane %v49_v44, 3 }
  0x68   :  { %v111_v62 = vsel %vm75_vm0, %v109_v50, %v110_v51  ;;  %v220_v6 = vsel %vm184_vm1, %v218_v56, %v219_v57  ;;  %vm1829_vm0 = vcmask 1046534   ;;  %vm1831_vm1 = vcmask 1047559  }
  0x69   :  { %152 = vrot.lane.b32.xlu1 %v108_v30, %s5886_s9 }
  0x6a   :  { %257 = vrot.lane.b32.xlu0 %v214_v33, %s5887_s10 }
  0x6d   :  { %1914 = vrot.lane.b32.xlu1 %v1871_v34, %s5888_s15 }
  0x6e   :  { %251 = vrot.lane.b32.xlu0 %v207_v54, %s5887_s10  ;;  %v5892_v54 = vmov 1966171168  }
  0x6f   :  { %v2000_v55 = vunpack.c.l.s4 %v5892_v54 }
  0x71   :  { %1908 = vrot.lane.b32.xlu1 %v1864_v63, %s5888_s15  ;;  %v2001_v58 = vunpack.c.0.s8 %v2000_v55 }
  0x72   :  { %261 = vrot.lane.b32.xlu0 %v217_v16, %s5887_s10 }
  0x75   :  { %146 = vrot.lane.b32.xlu1 %v101_v9, %s5886_s9 }
  0x76   :  { %1918 = vrot.lane.b32.xlu0 %v1874_v49, %s5888_s15 }
  0x77   :  { %v117_v61 = vpop.permute.xlu1 %116 }
  0x78   :  { %v113_v63 = vpop.permute.xlu0 %112  ;;  %v296_v9 = vsel %vm293_vm4, %v5940_v0, %v117_v61  ;;  %v6361_v0 = vsub.s32 %v2001_v58, %v372_v53 }
  0x79   :  { %150 = vrot.lane.b32.xlu1 %v104_v18, %s5886_s9  ;;  %v294_v11 = vsel %vm293_vm4, %v5950_v2, %v113_v63  ;;  %v1876_v18 = vrot.slane %v6329_v45, 3 }
  0x7a   :  { %156 = vrot.lane.b32.xlu0 %v111_v62, %s5886_s9 }
  0x7b   :  { %v226_v10 = vpop.permute.xlu1 %225  ;;  %v1877_v44 = vsel %vm1841_vm2, %v1875_v17, %v1876_v18  ;;  %vm1839_vm2 = vcmask 60416  }
  0x7c   :  { %v321_v14 = vsel %vm318_vm5, %v296_v9, %v226_v10  ;;  %v222_v12 = vpop.permute.xlu0 %221 }
  0x7d   :  { %v391_v19 = vcombine.high %v321_v14, %v321_v14  ;;  %v6357_v20 = vrot.slane %v321_v14, %v6344_v3  ;;  %v319_v8 = vsel %vm318_vm5, %v294_v11, %v222_v12  ;;  %265 = vrot.lane.b32.xlu1 %v220_v6, %s5887_s10 }
  0x7e   :  { %v367_v25 = vcombine.high %v319_v8, %v319_v8  ;;  %v374_v27 = vrot.slane %v319_v8, %v6344_v3  ;;  %255 = vrot.lane.b32.xlu0 %v210_v13, %s5887_s10 }
  0x7f   :  { %v6368_v2 = vrot.slane %v391_v19, %v6344_v3  ;;  %v406_v28 = vcombine.high %v6357_v20, %v6357_v20  ;;  %v1883_v30 = vpop.permute.xlu1 %1882 }
  0x80   :  { %v381_v31 = vrot.slane %v367_v25, %v6344_v3  ;;  %v382_v33 = vcombine.high %v374_v27, %v374_v27  ;;  %v6374_v34 = vsel %vm929_vm6, %v321_v14, %v1883_v30  ;;  %v1879_v35 = vpop.permute.xlu0 %1878 }
  0x81   :  { %v2061_v16 = vcombine.high %v6374_v34, %v6374_v34  ;;  %v2068_v13 = vrot.slane %v6374_v34, %v6361_v0  ;;  %v6381_v42 = vsel %vm929_vm6, %v319_v8, %v1879_v35  ;;  %1912 = vrot.lane.b32.xlu1 %v1867_v21, %s5888_s15  ;;  %v6390_v46 = vcombine.low %v406_v28, %v6368_v2 }
  0x82   :  { %v383_v48 = vcombine.high %v381_v31, %v381_v31  ;;  %v1998_v47 = vcombine.high %v6381_v42, %v6381_v42  ;;  %v2005_v49 = vrot.slane %v6381_v42, %v6361_v0  ;;  %259 = vrot.lane.b32.xlu0 %v213_v29, %s5887_s10  ;;  %v674_v4 = vcombine.low %v374_v27, %v382_v33 }
  0x83   :  { %v2075_v21 = vrot.slane %v2061_v16, %v6361_v0  ;;  %v2076_v50 = vcombine.high %v2068_v13, %v2068_v13  ;;  %v6401_v52 = vrot.slane %v2068_v13, %v6361_v0  ;;  %v224_v53 = vpop.permute.xlu1 %223  ;;  %v706_v10 = vrot.slane %v6390_v46, %v6344_v3 }
  0x84   :  { %v675_v54 = vcombine.low %v381_v31, %v383_v48  ;;  %v2012_v55 = vrot.slane %v1998_v47, %v6361_v0  ;;  %v2013_v56 = vcombine.high %v2005_v49, %v2005_v49  ;;  %v115_v61 = vpop.permute.xlu0 %114  ;;  %v682_v11 = vrot.slane %v674_v4, %v6344_v3 }
  0x85   :  { %v2077_v62 = vcombine.high %v2075_v21, %v2075_v21  ;;  %v2091_v63 = vrot.slane %v2075_v21, %v6361_v0  ;;  %v2098_v58 = vrot.slane %v2076_v50, %v6361_v0  ;;  %v2106_v29 = vcombine.high %v6401_v52, %v6401_v52  ;;  %1916 = vrot.lane.b32.xlu1 %v1870_v32, %s5888_s15 }
  0x86   :  { %v2014_v6 = vcombine.high %v2012_v55, %v2012_v55  ;;  %v2035_v9 = vrot.slane %v2013_v56, %v6361_v0  ;;  %1922 = vrot.lane.b32.xlu0 %v1877_v44, %s5888_s15  ;;  %v2021_v12 = vrot.slane %v2005_v49, %v6361_v0  ;;  %v2028_v17 = vrot.slane %v2012_v55, %v6361_v0 }
  0x87   :  { %v6417_v14 = vrot.slane %v2077_v62, %v6361_v0  ;;  %v121_v19 = vpop.permute.xlu1 %120  ;;  %v2107_v15 = vcombine.high %v2091_v63, %v2091_v63  ;;  %v2108_v32 = vcombine.high %v2098_v58, %v2098_v58  ;;  %v295_v8 = vsel %vm293_vm4, %v5957_v5, %v115_v61 }
  0x88   :  { %v1881_v25 = vpop.permute.xlu0 %1880  ;;  %v689_v27 = vrot.slane %v675_v54, %v6344_v3  ;;  %v2827_v28 = vcombine.low %v2098_v58, %v2106_v29  ;;  %v320_v30 = vsel %vm318_vm5, %v295_v8, %v224_v53  ;;  %v2042_v31 = vrot.slane %v2014_v6, %v6361_v0  ;;  %v6444_v53 = vld [vmem:[%s8199_s5 + $0x78] sm:$0xff] }
  0x89   :  { %263 = vrot.lane.b32.xlu1 %v216_v38, %s5887_s10  ;;  %v2777_v33 = vcombine.low %v2021_v12, %v2035_v9  ;;  %v390_v35 = vrot.slane %v320_v30, %v6344_v3  ;;  %v1951_v16 = vsel %vm929_vm6, %v320_v30, %v1881_v25  ;;  %v5571_v13 = vcombine.high %v2021_v12, %v2035_v9  ;;  %v6497_v30 = vld [vmem:[%s8199_s5 + $0x68] sm:$0xff] }
  0x8a   :  { %154 = vrot.lane.b32.xlu0 %v107_v26, %s5886_s9  ;;  %v690_v5 = vcombine.low %v682_v11, %v689_v27  ;;  %v2053_v44 = vrot.slane %v1951_v16, %v6361_v0  ;;  %v2779_v48 = vcombine.low %v2028_v17, %v2042_v31  ;;  %v5572_v47 = vcombine.high %v2028_v17, %v2042_v31 }
  0x8b   :  { %v119_v46 = vpop.permute.xlu1 %118  ;;  %v2787_v38 = vrot.slane %v2777_v33, %v6361_v0  ;;  %v2828_v49 = vcombine.low %v2108_v32, %v2091_v63  ;;  %v298_v4 = vsel %vm293_vm4, %v5986_v22, %v121_v19  ;;  %v691_v21 = vcombine.low %v390_v35, %v6357_v20  ;;  %v6504_v35 = vld [vmem:[%s8199_s5 + $0x60] sm:$0xff] }
  0x8c   :  { %5690 = vmatmul.mubr.msk.f32.vlgmr.msra.gmra.mxu0 %vm929_vm6, %v690_v5  ;;  %v230_v50 = vpop.permute.xlu0 %229  ;;  %v2794_v26 = vrot.slane %v5571_v13, %v6361_v0  ;;  %v2060_v54 = vrot.slane %v2053_v44, %v6361_v0  ;;  %v2801_v22 = vrot.slane %v2779_v48, %v6361_v0  ;;  %v2808_v62 = vrot.slane %v5572_v47, %v6361_v0 }
  0x8d   :  { %v323_v55 = vsel %vm318_vm5, %v298_v4, %v230_v50  ;;  %5692 = vmatprep.mubr.msk.f32.mxu0 %vm5890_vm3, %v5889_v40  ;;  %158 = vrot.lane.b32.xlu1 %v110_v51, %s5886_s9  ;;  %v699_v20 = vrot.slane %v691_v21, %v6344_v3  ;;  %v407_v29 = vcombine.high %v6368_v2, %v6368_v2 }
  0x8e   :  { %v415_v56 = vcombine.high %v323_v55, %v323_v55  ;;  %v422_v61 = vrot.slane %v323_v55, %v6344_v3  ;;  %1920 = vrot.lane.b32.xlu0 %v1873_v43, %s5888_s15  ;;  %v2826_v63 = vcombine.low %v2060_v54, %v6401_v52  ;;  %v2809_v51 = vcombine.low %v2787_v38, %v2794_v26 }
  0x8f   :  { %v123_v58 = vpop.permute.xlu1 %122  ;;  %v2829_v6 = vcombine.low %v6417_v14, %v2107_v15  ;;  %5286 = vmatpush1.msra.mxu0 %v6444_v53  ;;  %v297_v9 = vsel %vm293_vm4, %v5945_v1, %v119_v46  ;;  %v707_v12 = vcombine.low %v699_v20, %v706_v10  ;;  %v2843_v43 = vrot.slane %v2827_v28, %v6361_v0  ;;  %v6480_v1 = vld [vmem:[%s8199_s5 + $0x70] sm:$0xff] }
  0x90   :  { %v430_v11 = vcombine.high %v422_v61, %v422_v61  ;;  %v228_v24 = vpop.permute.xlu0 %227  ;;  %5287 = vmatprep.subr.mxu0 %v5889_v40  ;;  %v2836_v52 = vrot.slane %v2826_v63, %v6361_v0  ;;  %v2810_v2 = vcombine.low %v2801_v22, %v2808_v62  ;;  %v2850_v19 = vrot.slane %v2828_v49, %v6361_v0 }
  0x91   :  { %v6471_v17 = vsel %vm318_vm5, %v297_v9, %v228_v24  ;;  %1924 = vrot.lane.b32.xlu1 %v1876_v18, %s5888_s15  ;;  %v429_v10 = vrot.slane %v415_v56, %v6344_v3  ;;  %5693 = vmatmul.mubr.msk.f32.gmra.mxu0 %vm929_vm6, %v707_v12  ;;  %v2817_v8 = vrot.slane %v2809_v51, %v6361_v0  ;;  %v6545_v12 = vld [vmem:[%s8199_s5 + $0x58] sm:$0xff] }
  0x92   :  { %v709_v15 = vcombine.low %v422_v61, %v430_v11  ;;  %v414_v32 = vrot.slane %v6471_v17, %v6344_v3  ;;  %267 = vrot.lane.b32.xlu0 %v219_v57, %s5887_s10  ;;  %v2824_v25 = vrot.slane %v2810_v2, %v6361_v0  ;;  %v2857_v27 = vrot.slane %v2829_v6, %v6361_v0 }
  0x93   :  { %v232_v18 = vpop.permute.xlu1 %231  ;;  %v2858_v28 = vcombine.low %v2836_v52, %v2843_v43  ;;  %5695 = vmatprep.mubr.msk.f32.mxu0 %vm5890_vm3, %v5889_v40  ;;  %5288 = vmatpush1.msra.mxu0 %v6480_v1  ;;  %v299_v5 = vsel %vm293_vm4, %v5991_v23, %v123_v58  ;;  %v431_v46 = vcombine.high %v429_v10, %v429_v10 }
  0x94   :  { %v708_v31 = vcombine.low %v407_v29, %v414_v32  ;;  %v125_v33 = vpop.permute.xlu0 %124  ;;  %v2825_v45 = vcombine.low %v2817_v8, %v2824_v25  ;;  %v2859_v57 = vcombine.low %v2850_v19, %v2857_v27  ;;  %5289 = vmatprep.subr.mxu0 %v5889_v40  ;;  %v723_v16 = vrot.slane %v709_v15, %v6344_v3 }
  0x95   :  { %v2866_v44 = vrot.slane %v2858_v28, %v6361_v0  ;;  %5290 = vmatpush1.msra.mxu0 %v6497_v30  ;;  %v6513_v48 = vsel %vm318_vm5, %v299_v5, %v232_v18  ;;  %v300_v49 = vsel %vm293_vm4, %v6026_v36, %v125_v33  ;;  %v725_v56 = vcombine.low %v429_v10, %v431_v46  ;;  %v6580_v33 = vld [vmem:[%s8199_s5 + $0x50] sm:$0xff] }
  0x96   :  { %v716_v13 = vrot.slane %v708_v31, %v6344_v3  ;;  %5766 = vmatprep.mubr.f32.mxu1 %v2825_v45  ;;  %v2873_v38 = vrot.slane %v2859_v57, %v6361_v0  ;;  %5291 = vmatprep.subr.mxu0 %v5889_v40  ;;  %v438_v36 = vrot.slane %v6513_v48, %v6344_v3 }
  0x97   :  { %v1887_v47 = vpop.permute.xlu1 %1886  ;;  %5292 = vmatpush1.msra.mxu0 %v6504_v35  ;;  %v733_v15 = vrot.slane %v725_v56, %v6344_v3  ;;  %v2109_v5 = vcombine.high %v6417_v14, %v6417_v14 }
  0x98   :  { %v6520_v23 = vsel %vm929_vm6, %v323_v55, %v1887_v47  ;;  %v234_v4 = vpop.permute.xlu0 %233  ;;  %v724_v21 = vcombine.low %v716_v13, %v723_v16  ;;  %v2874_v54 = vcombine.low %v2866_v44, %v2873_v38  ;;  %5293 = vmatprep.subr.mxu0 %v5889_v40 }
  0x99   :  { %v2124_v50 = vcombine.high %v6520_v23, %v6520_v23  ;;  %v2131_v26 = vrot.slane %v6520_v23, %v6361_v0  ;;  %v325_v22 = vsel %vm318_vm5, %v300_v49, %v234_v4  ;;  %5294 = vmatpush1.msra.mxu0 %v6545_v12 }
  0x9a   :  { %v439_v55 = vcombine.high %v325_v22, %v325_v22  ;;  %v446_v20 = vrot.slane %v325_v22, %v6344_v3  ;;  %5696 = vmatmul.mubr.msk.f32.gmra.mxu0 %vm929_vm6, %v724_v21  ;;  %5767 = vmatmul.mubr.f32.vlgmr.msra.gmra.mxu1 %v2874_v54 }
  0x9b   :  { %v2138_v61 = vrot.slane %v2124_v50, %v6361_v0  ;;  %v2139_v62 = vcombine.high %v2131_v26, %v2131_v26  ;;  %v127_v63 = vpop.permute.xlu1 %126  ;;  %5698 = vmatprep.mubr.msk.f32.mxu0 %vm5890_vm3, %v5889_v40  ;;  %5807 = vmatpush1.msra.mxu1 %v6444_v53  ;;  %v6556_v52 = vrot.slane %v2131_v26, %v6361_v0 }
  0x9c   :  { %v726_v58 = vcombine.low %v438_v36, %v446_v20  ;;  %v1891_v29 = vpop.permute.xlu0 %1890  ;;  %v453_v6 = vrot.slane %v439_v55, %v6344_v3  ;;  %v454_v9 = vcombine.high %v446_v20, %v446_v20  ;;  %5788 = vmatprep.subr.mxu1 %v5889_v40  ;;  %v301_v19 = vsel %vm293_vm4, %v6031_v37, %v127_v63 }
  0x9d   :  { %v2140_v51 = vcombine.high %v2138_v61, %v2138_v61  ;;  %v6539_v11 = vsel %vm929_vm6, %v325_v22, %v1891_v29  ;;  %v6548_v24 = vrot.slane %v2139_v62, %v6361_v0  ;;  %5808 = vmatpush1.msra.mxu1 %v6480_v1  ;;  %v2154_v45 = vrot.slane %v2138_v61, %v6361_v0 }
  0x9e   :  { %v2187_v53 = vcombine.high %v6539_v11, %v6539_v11  ;;  %v2194_v43 = vrot.slane %v6539_v11, %v6361_v0  ;;  %v740_v2 = vrot.slane %v726_v58, %v6344_v3  ;;  %5789 = vmatprep.subr.mxu1 %v5889_v40  ;;  %v742_v27 = vcombine.low %v454_v9, %v453_v6 }
  0x9f   :  { %v236_v10 = vpop.permute.xlu1 %235  ;;  %v6564_v32 = vrot.slane %v2140_v51, %v6361_v0  ;;  %v455_v28 = vcombine.high %v453_v6, %v453_v6  ;;  %5809 = vmatpush1.msra.mxu1 %v6497_v30  ;;  %v2876_v57 = vcombine.low %v6556_v52, %v6548_v24  ;;  %5295 = vmatprep.subr.mxu0 %v5889_v40 }
  0xa0   :  { %v2201_v18 = vrot.slane %v2187_v53, %v6361_v0  ;;  %v2202_v8 = vcombine.high %v2194_v43, %v2194_v43  ;;  %v6568_v1 = vsel %vm318_vm5, %v301_v19, %v236_v10  ;;  %v129_v25 = vpop.permute.xlu0 %128  ;;  %v6572_v37 = vrot.slane %v2194_v43, %v6361_v0  ;;  %5790 = vmatprep.subr.mxu1 %v5889_v40 }
  0xa1   :  { %v462_v31 = vrot.slane %v6568_v1, %v6344_v3  ;;  %v5573_v30 = vcombine.high %v6556_v52, %v6548_v24  ;;  %v741_v46 = vcombine.low %v733_v15, %v740_v2  ;;  %v2878_v38 = vcombine.low %v2154_v45, %v6564_v32  ;;  %5296 = vmatpush1.msra.mxu0 %v6580_v33 }
  0xa2   :  { %v2224_v16 = vrot.slane %v2202_v8, %v6361_v0  ;;  %v2203_v13 = vcombine.high %v2201_v18, %v2201_v18  ;;  %v6594_v49 = vrot.slane %v2201_v18, %v6361_v0  ;;  %v302_v21 = vsel %vm293_vm4, %v6089_v59, %v129_v25  ;;  %5810 = vmatpush1.msra.mxu1 %v6504_v35  ;;  %v6633_v35 = vld [vmem:[%s8199_s5 + $0x48] sm:$0xff] }
  0xa3   :  { %v743_v44 = vcombine.low %v455_v28, %v462_v31  ;;  %v133_v47 = vpop.permute.xlu1 %132  ;;  %v2232_v26 = vcombine.high %v6572_v37, %v6572_v37  ;;  %5699 = vmatmul.mubr.msk.f32.gmra.mxu0 %vm929_vm6, %v741_v46  ;;  %v750_v36 = vrot.slane %v742_v27, %v6344_v3  ;;  %v5574_v55 = vcombine.high %v2154_v45, %v6564_v32 }
  0xa4   :  { %v2234_v4 = vcombine.high %v2224_v16, %v2224_v16  ;;  %v238_v50 = vpop.permute.xlu0 %237  ;;  %5701 = vmatprep.mubr.msk.f32.mxu0 %vm5890_vm3, %v5889_v40  ;;  %v6610_v59 = vrot.slane %v2876_v57, %v6361_v0  ;;  %v6613_v61 = vrot.slane %v2203_v13, %v6361_v0  ;;  %v304_v63 = vsel %vm293_vm4, %v6119_v7, %v133_v47  ;;  %v6666_v47 = vld [vmem:[%s8199_s5 + $0x40] sm:$0xff] }
  0xa5   :  { %v757_v54 = vrot.slane %v743_v44, %v6344_v3  ;;  %v327_v22 = vsel %vm318_vm5, %v302_v21, %v238_v50  ;;  %v2233_v51 = vcombine.high %v6594_v49, %v6594_v49  ;;  %5297 = vmatprep.subr.mxu0 %v5889_v40  ;;  %v2926_v43 = vcombine.low %v2224_v16, %v2232_v26 }
  0xa6   :  { %v463_v20 = vcombine.high %v327_v22, %v327_v22  ;;  %v470_v56 = vrot.slane %v327_v22, %v6344_v3  ;;  %v2927_v62 = vcombine.low %v2234_v4, %v6594_v49  ;;  %v2899_v32 = vrot.slane %v5573_v30, %v6361_v0  ;;  %5791 = vmatprep.subr.mxu1 %v5889_v40 }
  0xa7   :  { %v242_v58 = vpop.permute.xlu1 %241  ;;  %v758_v29 = vcombine.low %v750_v36, %v757_v54  ;;  %v2906_v8 = vrot.slane %v2878_v38, %v6361_v0  ;;  %v6644_v25 = vrot.slane %v5574_v55, %v6361_v0  ;;  %5298 = vmatpush1.msra.mxu0 %v6633_v35  ;;  %v2948_v46 = vrot.slane %v2926_v43, %v6361_v0 }
  0xa8   :  { %v477_v6 = vrot.slane %v463_v20, %v6344_v3  ;;  %v478_v9 = vcombine.high %v470_v56, %v470_v56  ;;  %v329_v24 = vsel %vm318_vm5, %v304_v63, %v242_v58  ;;  %v1885_v53 = vpop.permute.xlu0 %1884  ;;  %v2955_v27 = vrot.slane %v2927_v62, %v6361_v0  ;;  %5811 = vmatpush1.msra.mxu1 %v6545_v12 }
  0xa9   :  { %v487_v52 = vcombine.high %v329_v24, %v329_v24  ;;  %v6625_v2 = vrot.slane %v329_v24, %v6344_v3  ;;  %v1953_v7 = vsel %vm929_vm6, %v6471_v17, %v1885_v53  ;;  %5702 = vmatmul.mubr.msk.f32.gmra.mxu0 %vm929_vm6, %v758_v29  ;;  %5299 = vmatprep.subr.mxu0 %v5889_v40 }
  0xaa   :  { %v479_v19 = vcombine.high %v477_v6, %v477_v6  ;;  %v759_v10 = vcombine.low %v470_v56, %v478_v9  ;;  %v2116_v15 = vrot.slane %v1953_v7, %v6361_v0  ;;  %5704 = vmatprep.mubr.msk.f32.mxu0 %vm5890_vm3, %v5889_v40  ;;  %v2908_v26 = vcombine.low %v2899_v32, %v2906_v8 }
  0xab   :  { %v6640_v18 = vrot.slane %v487_v52, %v6344_v3  ;;  %v1895_v17 = vpop.permute.xlu1 %1894  ;;  %v502_v31 = vcombine.high %v6625_v2, %v6625_v2  ;;  %v6676_v54 = vcombine.low %v2948_v46, %v2955_v27  ;;  %5792 = vmatprep.subr.mxu1 %v5889_v40  ;;  %5300 = vmatpush1.msra.mxu0 %v6666_v47  ;;  %v6712_v52 = vld [vmem:[%s8199_s5 + $0x38] sm:$0xff] }
  0xac   :  { %v760_v28 = vcombine.low %v477_v6, %v479_v19  ;;  %v2123_v45 = vrot.slane %v2116_v15, %v6361_v0  ;;  %v6652_v57 = vsel %vm929_vm6, %v327_v22, %v1895_v17  ;;  %v1889_v16 = vpop.permute.xlu0 %1888  ;;  %v767_v38 = vrot.slane %v759_v10, %v6344_v3  ;;  %5812 = vmatpush1.msra.mxu1 %v6580_v33 }
  0xad   :  { %v2250_v30 = vcombine.high %v6652_v57, %v6652_v57  ;;  %v2257_v13 = vrot.slane %v6652_v57, %v6361_v0  ;;  %v1955_v44 = vsel %vm929_vm6, %v6513_v48, %v1889_v16  ;;  %v6680_v22 = vcombine.low %v502_v31, %v6640_v18  ;;  %5301 = vmatprep.subr.mxu0 %v5889_v40 }
  0xae   :  { %v2875_v49 = vcombine.low %v2109_v5, %v2123_v45  ;;  %v2179_v4 = vrot.slane %v1955_v44, %v6361_v0  ;;  %v774_v21 = vrot.slane %v760_v28, %v6344_v3  ;;  %v6698_v9 = vcombine.low %v6613_v61, %v2233_v51  ;;  %5793 = vmatprep.subr.mxu1 %v5889_v40 }
  0xaf   :  { %v2264_v48 = vrot.slane %v2250_v30, %v6361_v0  ;;  %v2265_v12 = vcombine.high %v2257_v13, %v2257_v13  ;;  %v131_v50 = vpop.permute.xlu1 %130  ;;  %v2273_v56 = vrot.slane %v2257_v13, %v6361_v0  ;;  %v2922_v32 = vrot.slane %v2908_v26, %v6361_v0  ;;  %5302 = vmatpush1.msra.mxu0 %v6712_v52 }
  0xb0   :  { %v2885_v14 = vrot.slane %v2875_v49, %v6361_v0  ;;  %v2186_v5 = vrot.slane %v2179_v4, %v6361_v0  ;;  %v1899_v36 = vpop.permute.xlu0 %1898  ;;  %v775_v55 = vcombine.low %v767_v38, %v774_v21  ;;  %v2235_v17 = vcombine.high %v6613_v61, %v6613_v61  ;;  %5813 = vmatpush1.msra.mxu1 %v6633_v35 }
  0xb1   :  { %v2266_v20 = vcombine.high %v2264_v48, %v2264_v48  ;;  %v2287_v62 = vrot.slane %v2265_v12, %v6361_v0  ;;  %v6688_v63 = vsel %vm929_vm6, %v329_v24, %v1899_v36  ;;  %v6701_v53 = vrot.slane %v2264_v48, %v6361_v0  ;;  %5303 = vmatprep.subr.mxu0 %v5889_v40 }
  0xb2   :  { %v2925_v58 = vcombine.low %v2186_v5, %v6572_v37  ;;  %v2313_v29 = vcombine.high %v6688_v63, %v6688_v63  ;;  %v2320_v6 = vrot.slane %v6688_v63, %v6361_v0  ;;  %5705 = vmatmul.mubr.msk.f32.gmra.mxu0 %vm929_vm6, %v775_v55  ;;  %v2907_v37 = vcombine.low %v2885_v14, %v6610_v59 }
  0xb3   :  { %v6704_v24 = vrot.slane %v2266_v20, %v6361_v0  ;;  %v2975_v33 = vcombine.low %v2273_v56, %v2287_v62  ;;  %v141_v43 = vpop.permute.xlu1 %140  ;;  %5707 = vmatprep.mubr.msk.f32.mxu0 %vm5890_vm3, %v5889_v40  ;;  %v5575_v51 = vcombine.high %v2273_v56, %v2287_v62  ;;  %v2971_v59 = vrot.slane %v6676_v54, %v6361_v0 }
  0xb4   :  { %v2941_v7 = vrot.slane %v2925_v58, %v6361_v0  ;;  %v2327_v19 = vrot.slane %v2313_v29, %v6361_v0  ;;  %v2328_v10 = vcombine.high %v2320_v6, %v2320_v6  ;;  %v137_v15 = vpop.permute.xlu0 %136  ;;  %v791_v8 = vrot.slane %v6680_v22, %v6344_v3  ;;  %5794 = vmatprep.subr.mxu1 %v5889_v40  ;;  %v6835_v22 = vld [vmem:[%s8199_s5 + $0x20] sm:$0xff] }
  0xb5   :  { %v3022_v27 = vcombine.low %v6701_v53, %v6704_v24  ;;  %v303_v28 = vsel %vm293_vm4, %v6094_v60, %v131_v50  ;;  %v6730_v31 = vrot.slane %v2320_v6, %v6361_v0  ;;  %v2983_v45 = vrot.slane %v6698_v9, %v6361_v0  ;;  %v6742_v60 = vld [vmem:[%s8199_s5 + $0x30] sm:$0xff]  ;;  %5814 = vmatpush1.msra.mxu1 %v6666_v47  ;;  %v6875_v9 = vld [vmem:[%s8199_s5 + $0x18] sm:$0xff] }
  0xb6   :  { %v2329_v16 = vcombine.high %v2327_v19, %v2327_v19  ;;  %v2350_v30 = vrot.slane %v2328_v10, %v6361_v0  ;;  %v2915_v44 = vrot.slane %v2907_v37, %v6361_v0  ;;  %v2956_v46 = vcombine.low %v6644_v25, %v2941_v7  ;;  %5304 = vmatpush1.msra.mxu0 %v6742_v60 }
  0xb7   :  { %v246_v13 = vpop.permute.xlu1 %245  ;;  %v6745_v38 = vrot.slane %v2327_v19, %v6361_v0  ;;  %v306_v49 = vsel %vm293_vm4, %v6208_v41, %v137_v15  ;;  %v2997_v21 = vrot.slane %v2975_v33, %v6361_v0  ;;  %v3004_v48 = vrot.slane %v5575_v51, %v6361_v0  ;;  %5305 = vmatprep.subr.mxu0 %v5889_v40 }
  0xb8   :  { %v240_v4 = vpop.permute.xlu0 %239  ;;  %v331_v35 = vsel %vm318_vm5, %v306_v49, %v246_v13  ;;  %v2923_v25 = vcombine.low %v2915_v44, %v2922_v32  ;;  %v2964_v50 = vrot.slane %v2956_v46, %v6361_v0  ;;  %v2358_v26 = vcombine.high %v6730_v31, %v6730_v31  ;;  %5795 = vmatprep.subr.mxu1 %v5889_v40 }
  0xb9   :  { %v328_v12 = vsel %vm318_vm5, %v303_v28, %v240_v4  ;;  %v511_v41 = vcombine.high %v331_v35, %v331_v35  ;;  %v518_v54 = vrot.slane %v331_v35, %v6344_v3  ;;  %v6762_v5 = vrot.slane %v2329_v16, %v6361_v0  ;;  %5815 = vmatpush1.msra.mxu1 %v6712_v52 }
  0xba   :  { %v486_v14 = vrot.slane %v328_v12, %v6344_v3  ;;  %v2360_v36 = vcombine.high %v2350_v30, %v2350_v30  ;;  %v308_v55 = vsel %vm293_vm4, %v6198_v39, %v141_v43  ;;  %5769 = vmatprep.mubr.f32.mxu1 %v2923_v25  ;;  %v2972_v56 = vcombine.low %v2964_v50, %v2971_v59 }
  0xbb   :  { %v250_v20 = vpop.permute.xlu1 %249  ;;  %v525_v62 = vrot.slane %v511_v41, %v6344_v3  ;;  %v3006_v33 = vcombine.low %v2997_v21, %v3004_v48  ;;  %v5576_v37 = vcombine.high %v6701_v53, %v6704_v24  ;;  %v2359_v51 = vcombine.high %v6745_v38, %v6745_v38  ;;  %5796 = vmatprep.subr.mxu1 %v5889_v40 }
  0xbc   :  { %v776_v58 = vcombine.low %v486_v14, %v6625_v2  ;;  %v333_v29 = vsel %vm318_vm5, %v308_v55, %v250_v20  ;;  %v1893_v6 = vpop.permute.xlu0 %1892  ;;  %v526_v39 = vcombine.high %v518_v54, %v518_v54  ;;  %5770 = vmatmul.mubr.f32.gmra.mxu1 %v2972_v56  ;;  %v6779_v2 = vld [vmem:[%s8199_s5 + $0x28] sm:$0xff]  ;;  %v6781_v7 = vcombine.low %v2350_v30, %v2358_v26 }
  0xbd   :  { %v1957_v43 = vsel %vm929_vm6, %v6568_v1, %v1893_v6  ;;  %v535_v19 = vcombine.high %v333_v29, %v333_v29  ;;  %v6787_v15 = vcombine.low %v2360_v36, %v6745_v38  ;;  %v6790_v32 = vrot.slane %v333_v29, %v6344_v3  ;;  %5306 = vmatpush1.msra.mxu0 %v6779_v2 }
  0xbe   :  { %v784_v47 = vrot.slane %v776_v58, %v6344_v3  ;;  %v2242_v10 = vrot.slane %v1957_v43, %v6361_v0  ;;  %v503_v59 = vcombine.high %v6640_v18, %v6640_v18  ;;  %v2361_v28 = vcombine.high %v6762_v5, %v6762_v5  ;;  %5307 = vmatprep.subr.mxu0 %v5889_v40  ;;  %v6969_v18 = vld [vmem:[%s8199_s5 + $0x8] sm:$0xff] }
  0xbf   :  { %v1903_v1 = vpop.permute.xlu1 %1902  ;;  %v527_v16 = vcombine.high %v525_v62, %v525_v62  ;;  %v6802_v46 = vrot.slane %v3006_v33, %v6361_v0  ;;  %v6805_v49 = vcombine.low %v518_v54, %v526_v39  ;;  %v3032_v61 = vrot.slane %v3022_v27, %v6361_v0  ;;  %5308 = vmatpush1.msra.mxu0 %v6835_v22 }
  0xc0   :  { %v2249_v30 = vrot.slane %v2242_v10, %v6361_v0  ;;  %v6799_v13 = vsel %vm929_vm6, %v331_v35, %v1903_v1  ;;  %v1897_v44 = vpop.permute.xlu0 %1896  ;;  %v6814_v35 = vrot.slane %v535_v19, %v6344_v3  ;;  %v792_v26 = vcombine.low %v784_v47, %v791_v8  ;;  %5816 = vmatpush1.msra.mxu1 %v6742_v60 }
  0xc1   :  { %v2376_v4 = vcombine.high %v6799_v13, %v6799_v13  ;;  %v2383_v21 = vrot.slane %v6799_v13, %v6361_v0  ;;  %v1959_v48 = vsel %vm929_vm6, %v328_v12, %v1897_v44  ;;  %v550_v12 = vcombine.high %v6790_v32, %v6790_v32  ;;  %5309 = vmatprep.subr.mxu0 %v5889_v40 }
  0xc2   :  { %v2974_v25 = vcombine.low %v2235_v17, %v2249_v30  ;;  %v2305_v50 = vrot.slane %v1959_v48, %v6361_v0  ;;  %5708 = vmatmul.mubr.msk.f32.gmra.mxu0 %vm929_vm6, %v792_v26  ;;  %v3039_v53 = vrot.slane %v5576_v37, %v6361_v0  ;;  %v808_v24 = vrot.slane %v6805_v49, %v6344_v3  ;;  %v6911_v26 = vld [vmem:[%s8194_s0 + $0x68] sm:$0xf] }
  0xc3   :  { %v2390_v52 = vrot.slane %v2376_v4, %v6361_v0  ;;  %v2391_v41 = vcombine.high %v2383_v21, %v2383_v21  ;;  %v1907_v54 = vpop.permute.xlu1 %1906  ;;  %v6846_v27 = vcombine.low %v525_v62, %v527_v16  ;;  %5710 = vmatprep.mubr.msk.f32.mxu0 %vm5890_vm3, %v5889_v40  ;;  %v6863_v6 = vcombine.low %v550_v12, %v6814_v35 }
  0xc4   :  { %v2990_v17 = vrot.slane %v2974_v25, %v6361_v0  ;;  %v2312_v8 = vrot.slane %v2305_v50, %v6361_v0  ;;  %v6841_v14 = vsel %vm929_vm6, %v333_v29, %v1907_v54  ;;  %v135_v36 = vpop.permute.xlu0 %134  ;;  %v6866_v33 = vrot.slane %v2383_v21, %v6361_v0  ;;  %5797 = vmatprep.subr.mxu1 %v5889_v40 }
  0xc5   :  { %v2392_v55 = vcombine.high %v2390_v52, %v2390_v52  ;;  %v2439_v20 = vcombine.high %v6841_v14, %v6841_v14  ;;  %v6853_v56 = vrot.slane %v2391_v41, %v6361_v0  ;;  %v2446_v29 = vrot.slane %v6841_v14, %v6361_v0  ;;  %5310 = vmatpush1.msra.mxu0 %v6875_v9 }
  0xc6   :  { %v3024_v58 = vcombine.low %v2312_v8, %v6730_v31  ;;  %v3005_v62 = vcombine.low %v2983_v45, %v2990_v17  ;;  %v3053_v31 = vrot.slane %v6781_v7, %v6361_v0  ;;  %v3054_v10 = vcombine.low %v3032_v61, %v3039_v53  ;;  %v6891_v7 = vld [vmem:[%s8194_s0 + $0x58] sm:$0xf]  ;;  %5817 = vmatpush1.msra.mxu1 %v6779_v2  ;;  %v6925_v53 = vld [vmem:[%s8199_s5 + $0x10] sm:$0xff] }
  0xc7   :  { %v2453_v37 = vrot.slane %v2439_v20, %v6361_v0  ;;  %v145_v39 = vpop.permute.xlu1 %144  ;;  %v2454_v43 = vcombine.high %v2446_v29, %v2446_v29  ;;  %v6879_v47 = vrot.slane %v2446_v29, %v6361_v0  ;;  %v6883_v1 = vrot.slane %v2390_v52, %v6361_v0  ;;  %5311 = vmatprep.subr.mxu0 %v5889_v40 }
  0xc8   :  { %v3046_v45 = vrot.slane %v3024_v58, %v6361_v0  ;;  %v139_v19 = vpop.permute.xlu0 %138  ;;  %v6886_v60 = vrot.slane %v2392_v55, %v6361_v0  ;;  %v305_v16 = vsel %vm293_vm4, %v6891_v7, %v135_v36  ;;  %v818_v30 = vrot.slane %v6846_v27, %v6344_v3  ;;  %5798 = vmatprep.subr.mxu1 %v5889_v40 }
  0xc9   :  { %v3074_v44 = vcombine.low %v6866_v33, %v6853_v56  ;;  %v5577_v4 = vcombine.high %v6866_v33, %v6853_v56  ;;  %v2476_v21 = vrot.slane %v2454_v43, %v6361_v0  ;;  %v3013_v48 = vrot.slane %v3005_v62, %v6361_v0  ;;  %v6940_v62 = vld [vmem:[%s8194_s0 + $0x80] sm:$0xff]  ;;  %5312 = vmatpush1.msra.mxu0 %v6925_v53 }
  0xca   :  { %v2455_v25 = vcombine.high %v2453_v37, %v2453_v37  ;;  %v6906_v50 = vrot.slane %v2453_v37, %v6361_v0  ;;  %v307_v12 = vsel %vm293_vm4, %v6911_v26, %v139_v19  ;;  %v3055_v41 = vcombine.low %v3046_v45, %v3053_v31  ;;  %5818 = vmatpush1.msra.mxu1 %v6835_v22 }
  0xcb   :  { %v248_v52 = vpop.permute.xlu1 %247  ;;  %v2484_v54 = vcombine.high %v6879_v47, %v6879_v47  ;;  %v3021_v17 = vcombine.low %v3013_v48, %v6802_v46  ;;  %v3062_v36 = vrot.slane %v3054_v10, %v6361_v0  ;;  %v3072_v46 = vcombine.low %v6762_v5, %v2359_v51  ;;  %5313 = vmatprep.subr.mxu0 %v5889_v40 }
  0xcc   :  { %v332_v61 = vsel %vm318_vm5, %v307_v12, %v248_v52  ;;  %v244_v8 = vpop.permute.xlu0 %243  ;;  %v3069_v20 = vrot.slane %v3055_v41, %v6361_v0  ;;  %v3121_v58 = vcombine.low %v6883_v1, %v6886_v60  ;;  %v2486_v29 = vcombine.high %v2476_v21, %v2476_v21  ;;  %5799 = vmatprep.subr.mxu1 %v5889_v40 }
  0xcd   :  { %v534_v55 = vrot.slane %v332_v61, %v6344_v3  ;;  %v330_v2 = vsel %vm318_vm5, %v305_v16, %v244_v8  ;;  %v310_v37 = vsel %vm293_vm4, %v6940_v62, %v145_v39  ;;  %5772 = vmatprep.mubr.f32.mxu1 %v3021_v17  ;;  %v3081_v43 = vrot.slane %v6787_v15, %v6361_v0 }
  0xce   :  { %v510_v31 = vrot.slane %v330_v2, %v6344_v3  ;;  %v3070_v45 = vcombine.low %v3062_v36, %v3069_v20  ;;  %v3088_v19 = vrot.slane %v3072_v46, %v6361_v0  ;;  %v5578_v10 = vcombine.high %v6883_v1, %v6886_v60  ;;  %5314 = vmatpush1.msra.mxu0 %v6969_v18 }
  0xcf   :  { %v811_v38 = vcombine.low %v534_v55, %v6790_v32  ;;  %v1901_v51 = vpop.permute.xlu1 %1900  ;;  %v6953_v16 = vrot.slane %v2455_v25, %v6361_v0  ;;  %v2485_v15 = vcombine.high %v6906_v50, %v6906_v50  ;;  %v6962_v12 = vcombine.low %v2476_v21, %v2484_v54  ;;  %5819 = vmatpush1.msra.mxu1 %v6875_v9 }
  0xd0   :  { %v793_v39 = vcombine.low %v503_v59, %v510_v31  ;;  %v1961_v32 = vsel %vm929_vm6, %v330_v2, %v1901_v51  ;;  %v254_v48 = vpop.permute.xlu0 %253  ;;  %5773 = vmatmul.mubr.f32.gmra.mxu1 %v3070_v45  ;;  %v6976_v21 = vcombine.low %v2486_v29, %v6906_v50  ;;  %v3103_v17 = vcombine.low %v3081_v43, %v3088_v19  ;;  %v7025_v45 = vld [vmem:[%s8199_s5] sm:$0xff] }
  0xd1   :  { %v2368_v52 = vrot.slane %v1961_v32, %v6361_v0  ;;  %v335_v1 = vsel %vm318_vm5, %v310_v37, %v254_v48  ;;  %v825_v59 = vrot.slane %v811_v38, %v6344_v3  ;;  %v3137_v8 = vrot.slane %v3121_v58, %v6361_v0  ;;  %5315 = vmatprep.subr.mxu0 %v5889_v40 }
  0xd2   :  { %v801_v60 = vrot.slane %v793_v39, %v6344_v3  ;;  %v559_v22 = vcombine.high %v335_v1, %v335_v1  ;;  %v566_v25 = vrot.slane %v335_v1, %v6344_v3  ;;  %v3102_v29 = vrot.slane %v3074_v44, %v6361_v0  ;;  %5800 = vmatprep.subr.mxu1 %v5889_v40 }
  0xd3   :  { %v2375_v41 = vrot.slane %v2368_v52, %v6361_v0  ;;  %v1905_v54 = vpop.permute.xlu1 %1904  ;;  %v826_v5 = vcombine.low %v818_v30, %v825_v59  ;;  %v3111_v9 = vrot.slane %v3103_v17, %v6361_v0  ;;  %v7016_v30 = vld [vmem:[%s8194_s0 + $0x90] sm:$0xff]  ;;  %v3144_v51 = vrot.slane %v5578_v10, %v6361_v0  ;;  %5316 = vmatpush1.msra.mxu0 %v7025_v45  ;;  %v7058_v17 = vld [vmem:[%s8199_s5 + $0x98] sm:$0xff] }
  0xd4   :  { %v573_v36 = vrot.slane %v559_v22, %v6344_v3  ;;  %v574_v55 = vcombine.high %v566_v25, %v566_v25  ;;  %v1963_v2 = vsel %vm929_vm6, %v332_v61, %v1905_v54  ;;  %v149_v20 = vpop.permute.xlu0 %148  ;;  %v809_v46 = vcombine.low %v801_v60, %v808_v24  ;;  %5820 = vmatpush1.msra.mxu1 %v6925_v53 }
  0xd5   :  { %v3073_v50 = vcombine.low %v2361_v28, %v2375_v41  ;;  %v2431_v58 = vrot.slane %v1963_v2, %v6361_v0  ;;  %v3130_v61 = vrot.slane %v5577_v4, %v6361_v0  ;;  %v551_v28 = vcombine.high %v6814_v35, %v6814_v35  ;;  %5341 = vmatprep.subr.mxu0 %v5889_v40 }
  0xd6   :  { %v575_v49 = vcombine.high %v573_v36, %v573_v36  ;;  %5711 = vmatmul.mubr.msk.f32.gmra.mxu0 %vm929_vm6, %v809_v46  ;;  %v2487_v24 = vcombine.high %v6953_v16, %v6953_v16  ;;  %v844_v37 = vcombine.low %v566_v25, %v574_v55  ;;  %v312_v31 = vsel %vm293_vm4, %v7016_v30, %v149_v20  ;;  %v7066_v20 = vld [vmem:[%s8194_s0 + $0x78] sm:$0xf] }
  0xd7   :  { %v3095_v44 = vrot.slane %v3073_v50, %v6361_v0  ;;  %v2438_v56 = vrot.slane %v2431_v58, %v6361_v0  ;;  %v143_v33 = vpop.permute.xlu1 %142  ;;  %5713 = vmatprep.mubr.msk.f32.mxu0 %vm5890_vm3, %v5889_v40  ;;  %v3152_v4 = vcombine.low %v3130_v61, %v3137_v8  ;;  %v835_v32 = vrot.slane %v6863_v6, %v6344_v3  ;;  %v7188_v6 = vld [vmem:[%s8199_s5 + $0x80] sm:$0xff] }
  0xd8   :  { %v845_v27 = vcombine.low %v573_v36, %v575_v49  ;;  %v1911_v38 = vpop.permute.xlu0 %1910  ;;  %v7040_v52 = vcombine.low %v6953_v16, %v2485_v15  ;;  %v852_v8 = vrot.slane %v844_v37, %v6344_v3  ;;  %v309_v53 = vsel %vm293_vm4, %v7066_v20, %v143_v33  ;;  %5801 = vmatprep.subr.mxu1 %v5889_v40 }
  0xd9   :  { %v3123_v43 = vcombine.low %v2438_v56, %v6879_v47  ;;  %v7029_v19 = vsel %vm929_vm6, %v335_v1, %v1911_v38  ;;  %v3104_v39 = vcombine.low %v3095_v44, %v3102_v29  ;;  %v3186_v47 = vrot.slane %v6976_v21, %v6361_v0  ;;  %5342 = vmatpush2.msra.mxu0 %v7058_v17  ;;  %v7085_v44 = vld [vmem:[%s8194_s0 + $0xa0] sm:$0xff] }
  0xda   :  { %v2502_v10 = vcombine.high %v7029_v19, %v7029_v19  ;;  %v2509_v48 = vrot.slane %v7029_v19, %v6361_v0  ;;  %5714 = vmatmul.mubr.msk.f32.gmra.mxu0 %vm929_vm6, %v826_v5  ;;  %v3160_v22 = vrot.slane %v3152_v4, %v6361_v0  ;;  %v859_v54 = vrot.slane %v845_v27, %v6344_v3 }
  0xdb   :  { %v3151_v1 = vrot.slane %v3123_v43, %v6361_v0  ;;  %v153_v59 = vpop.permute.xlu1 %152  ;;  %v3118_v60 = vrot.slane %v3104_v39, %v6361_v0  ;;  %5716 = vmatprep.mubr.msk.f32.mxu0 %vm5890_vm3, %v5889_v40  ;;  %v3179_v21 = vrot.slane %v6962_v12, %v6361_v0  ;;  %v3193_v4 = vrot.slane %v7040_v52, %v6361_v0  ;;  %v7227_v52 = vld [vmem:[%s8194_s0 + $0xb0] sm:$0xff] }
  0xdc   :  { %v2516_v25 = vrot.slane %v2502_v10, %v6361_v0  ;;  %v2517_v41 = vcombine.high %v2509_v48, %v2509_v48  ;;  %v258_v15 = vpop.permute.xlu0 %257  ;;  %v2525_v5 = vrot.slane %v2509_v48, %v6361_v0  ;;  %v314_v56 = vsel %vm293_vm4, %v7085_v44, %v153_v59  ;;  %5821 = vmatpush1.msra.mxu1 %v6969_v18 }
  0xdd   :  { %v337_v36 = vsel %vm318_vm5, %v312_v31, %v258_v15  ;;  %v3119_v55 = vcombine.low %v3111_v9, %v3118_v60  ;;  %v3153_v2 = vcombine.low %v3144_v51, %v3151_v1  ;;  %v7073_v50 = vcombine.low %v3179_v21, %v3186_v47  ;;  %5343 = vmatprep.subr.mxu0 %v5889_v40  ;;  %v7105_v51 = vld [vmem:[%s8199_s5 + $0x90] sm:$0xff] }
  0xde   :  { %v2518_v12 = vcombine.high %v2516_v25, %v2516_v25  ;;  %v7071_v46 = vrot.slane %v2517_v41, %v6361_v0  ;;  %v583_v58 = vcombine.high %v337_v36, %v337_v36  ;;  %v7077_v29 = vrot.slane %v337_v36, %v6344_v3  ;;  %5802 = vmatprep.subr.mxu1 %v5889_v40 }
  0xdf   :  { %v1915_v61 = vpop.permute.xlu1 %1914  ;;  %5775 = vmatprep.mubr.f32.mxu1 %v3119_v55  ;;  %v3167_v49 = vrot.slane %v3153_v2, %v6361_v0  ;;  %v7089_v9 = vcombine.low %v852_v8, %v859_v54  ;;  %v7095_v37 = vrot.slane %v2516_v25, %v6361_v0  ;;  %v3209_v10 = vrot.slane %v7073_v50, %v6361_v0  ;;  %v7140_v2 = vld [vmem:[%s8199_s5 + $0x88] sm:$0xff] }
  0xe0   :  { %v252_v33 = vpop.permute.xlu0 %251  ;;  %v7098_v27 = vsel %vm929_vm6, %v337_v36, %v1915_v61  ;;  %v7108_v43 = vrot.slane %v2518_v12, %v6361_v0  ;;  %v3218_v48 = vcombine.low %v2525_v5, %v7071_v46  ;;  %v7119_v47 = vrot.slane %v583_v58, %v6344_v3  ;;  %5344 = vmatpush2.msra.mxu0 %v7105_v51 }
  0xe1   :  { %v334_v31 = vsel %vm318_vm5, %v309_v53, %v252_v33  ;;  %v3168_v38 = vcombine.low %v3160_v22, %v3167_v49  ;;  %v2565_v18 = vcombine.high %v7098_v27, %v7098_v27  ;;  %v2572_v39 = vrot.slane %v7098_v27, %v6361_v0  ;;  %5822 = vmatpush1.msra.mxu1 %v7025_v45 }
  0xe2   :  { %v598_v1 = vcombine.high %v7077_v29, %v7077_v29  ;;  %v558_v59 = vrot.slane %v334_v31, %v6344_v3  ;;  %v5579_v21 = vcombine.high %v2525_v5, %v7071_v46  ;;  %v3220_v53 = vcombine.low %v7095_v37, %v7108_v43  ;;  %5345 = vmatprep.subr.mxu0 %v5889_v40 }
  0xe3   :  { %v1909_v60 = vpop.permute.xlu1 %1908  ;;  %5776 = vmatmul.mubr.f32.gmra.mxu1 %v3168_v38  ;;  %v2579_v22 = vrot.slane %v2565_v18, %v6361_v0  ;;  %v2580_v25 = vcombine.high %v2572_v39, %v2572_v39  ;;  %v7126_v41 = vrot.slane %v2572_v39, %v6361_v0  ;;  %v5580_v12 = vcombine.high %v7095_v37, %v7108_v43 }
  0xe4   :  { %v1965_v15 = vsel %vm929_vm6, %v334_v31, %v1909_v60  ;;  %v262_v54 = vpop.permute.xlu0 %261  ;;  %v828_v8 = vcombine.low %v551_v28, %v558_v59  ;;  %5803 = vmatprep.subr.mxu1 %v5889_v40  ;;  %v7153_v5 = vcombine.low %v598_v1, %v7119_v47  ;;  %v599_v31 = vcombine.high %v7119_v47, %v7119_v47 }
  0xe5   :  { %v2494_v36 = vrot.slane %v1965_v15, %v6361_v0  ;;  %v339_v55 = vsel %vm318_vm5, %v314_v56, %v262_v54  ;;  %v2581_v46 = vcombine.high %v2579_v22, %v2579_v22  ;;  %v2602_v35 = vrot.slane %v2580_v25, %v6361_v0  ;;  %5346 = vmatpush2.msra.mxu0 %v7140_v2 }
  0xe6   :  { %v842_v28 = vrot.slane %v828_v8, %v6344_v3  ;;  %v607_v58 = vcombine.high %v339_v55, %v339_v55  ;;  %v614_v61 = vrot.slane %v339_v55, %v6344_v3  ;;  %v7156_v56 = vrot.slane %v2579_v22, %v6361_v0  ;;  %5823 = vmatpush2.msra.mxu1 %v7058_v17 }
  0xe7   :  { %v2501_v45 = vrot.slane %v2494_v36, %v6361_v0  ;;  %v147_v49 = vpop.permute.xlu1 %146  ;;  %v2610_v33 = vcombine.high %v7126_v41, %v7126_v41  ;;  %v3228_v39 = vrot.slane %v3218_v48, %v6361_v0  ;;  %v3235_v60 = vrot.slane %v5579_v21, %v6361_v0  ;;  %5347 = vmatprep.subr.mxu0 %v5889_v40 }
  0xe8   :  { %v1919_v37 = vpop.permute.xlu0 %1918  ;;  %v621_v43 = vrot.slane %v607_v58, %v6344_v3  ;;  %v622_v18 = vcombine.high %v614_v61, %v614_v61  ;;  %v843_v59 = vcombine.low %v835_v32, %v842_v28  ;;  %v3242_v22 = vrot.slane %v3220_v53, %v6361_v0  ;;  %5804 = vmatprep.subr.mxu1 %v5889_v40  ;;  %v7203_v53 = vld [vmem:[%s8194_s0 + $0x88] sm:$0xf] }
  0xe9   :  { %v3172_v38 = vcombine.low %v2487_v24, %v2501_v45  ;;  %v7170_v1 = vsel %vm929_vm6, %v339_v55, %v1919_v37  ;;  %v7179_v16 = vrot.slane %v2581_v46, %v6361_v0  ;;  %v2612_v24 = vcombine.high %v2602_v35, %v2602_v35  ;;  %5348 = vmatpush2.msra.mxu0 %v7188_v6 }
  0xea   :  { %v2628_v17 = vcombine.high %v7170_v1, %v7170_v1  ;;  %v2611_v32 = vcombine.high %v7156_v56, %v7156_v56  ;;  %v7192_v15 = vcombine.low %v2602_v35, %v2610_v33  ;;  %v2635_v54 = vrot.slane %v7170_v1, %v6361_v0  ;;  %5717 = vmatmul.mubr.msk.f32.gmra.mxu0 %vm929_vm6, %v843_v59 }
  0xeb   :  { %v3200_v48 = vrot.slane %v3172_v38, %v6361_v0  ;;  %v151_v25 = vpop.permute.xlu1 %150  ;;  %v3249_v8 = vrot.slane %v5580_v12, %v6361_v0  ;;  %v623_v36 = vcombine.high %v621_v43, %v621_v43  ;;  %v7198_v55 = vcombine.low %v614_v61, %v622_v18  ;;  %5719 = vmatprep.mubr.msk.f32.mxu0 %vm5890_vm3, %v5889_v40 }
  0xec   :  { %v157_v21 = vpop.permute.xlu0 %156  ;;  %v311_v46 = vsel %vm293_vm4, %v7203_v53, %v147_v49  ;;  %v2642_v35 = vrot.slane %v2628_v17, %v6361_v0  ;;  %v2643_v28 = vcombine.high %v2635_v54, %v2635_v54  ;;  %v3250_v45 = vcombine.low %v3228_v39, %v3235_v60  ;;  %v7220_v49 = vld [vmem:[%s8194_s0 + $0x98] sm:$0xf]  ;;  %5824 = vmatpush2.msra.mxu1 %v7105_v51 }
  0xed   :  { %v3202_v12 = vcombine.low %v3193_v4, %v3200_v48  ;;  %v3251_v58 = vcombine.low %v3242_v22, %v3249_v8  ;;  %v7215_v61 = vcombine.low %v2612_v24, %v7156_v56  ;;  %v313_v37 = vsel %vm293_vm4, %v7220_v49, %v151_v25  ;;  %5805 = vmatprep.subr.mxu1 %v5889_v40 }
  0xee   :  { %v2644_v33 = vcombine.high %v2642_v35, %v2642_v35  ;;  %v316_v4 = vsel %vm293_vm4, %v7227_v52, %v157_v21  ;;  %v7233_v56 = vrot.slane %v2643_v28, %v6361_v0  ;;  %5720 = vmatmul.mubr.msk.f32.gmra.mxu0 %vm929_vm6, %v7089_v9  ;;  %v893_v22 = vrot.slane %v7198_v55, %v6344_v3 }
  0xef   :  { %v266_v38 = vpop.permute.xlu1 %265  ;;  %v3216_v59 = vrot.slane %v3202_v12, %v6361_v0  ;;  %v3265_v60 = vrot.slane %v3251_v58, %v6361_v0  ;;  %v7242_v24 = vcombine.low %v621_v43, %v623_v36  ;;  %v7245_v51 = vrot.slane %v2635_v54, %v6361_v0  ;;  %5722 = vmatprep.mubr.msk.f32.mxu0 %vm5890_vm3, %v5889_v40 }
  0xf0   :  { %v341_v18 = vsel %vm318_vm5, %v316_v4, %v266_v38  ;;  %v256_v39 = vpop.permute.xlu0 %255  ;;  %v7251_v9 = vrot.slane %v2642_v35, %v6361_v0  ;;  %v3258_v43 = vrot.slane %v3250_v45, %v6361_v0  ;;  %v7260_v54 = vrot.slane %v2644_v33, %v6361_v0  ;;  %5825 = vmatpush2.msra.mxu1 %v7140_v2 }
  0xf1   :  { %v336_v48 = vsel %vm318_vm5, %v311_v46, %v256_v39  ;;  %v3217_v25 = vcombine.low %v3209_v10, %v3216_v59  ;;  %v631_v21 = vcombine.high %v341_v18, %v341_v18  ;;  %v7263_v8 = vrot.slane %v341_v18, %v6344_v3  ;;  %5806 = vmatprep.subr.mxu1 %v5889_v40 }
  0xf2   :  { %v582_v17 = vrot.slane %v336_v48, %v6344_v3  ;;  %v2613_v55 = vcombine.high %v7179_v16, %v7179_v16  ;;  %v3317_v50 = vcombine.low %v7245_v51, %v7233_v56  ;;  %v3266_v28 = vcombine.low %v3258_v43, %v3265_v60  ;;  %5826 = vmatpush2.msra.mxu1 %v7188_v6 }
  0xf3   :  { %v1913_v36 = vpop.permute.xlu1 %1912  ;;  %5778 = vmatprep.mubr.f32.mxu1 %v3217_v25  ;;  %v5581_v12 = vcombine.high %v7245_v51, %v7233_v56  ;;  %v3270_v33 = vcombine.low %v7179_v16, %v2611_v32  ;;  %v876_v4 = vrot.slane %v7153_v5, %v6344_v3  ;;  %v3291_v38 = vrot.slane %v7215_v61, %v6361_v0 }
  0xf4   :  { %v861_v10 = vcombine.low %v582_v17, %v7077_v29  ;;  %v1967_v46 = vsel %vm929_vm6, %v336_v48, %v1913_v36  ;;  %v260_v35 = vpop.permute.xlu0 %259  ;;  %5779 = vmatmul.mubr.f32.gmra.mxu1 %v3266_v28  ;;  %v3319_v39 = vcombine.low %v7251_v9, %v7260_v54  ;;  %v646_v60 = vcombine.high %v7263_v8, %v7263_v8 }
  0xf5   :  { %v2557_v45 = vrot.slane %v1967_v46, %v6361_v0  ;;  %v338_v58 = vsel %vm318_vm5, %v313_v37, %v260_v35  ;;  %v7287_v37 = vrot.slane %v631_v21, %v6344_v3  ;;  %v3298_v59 = vrot.slane %v3270_v33, %v6361_v0 }
  0xf6   :  { %v869_v2 = vrot.slane %v861_v10, %v6344_v3  ;;  %v606_v29 = vrot.slane %v338_v58, %v6344_v3  ;;  %v3284_v6 = vrot.slane %v7192_v15, %v6361_v0  ;;  %v3340_v15 = vrot.slane %v5581_v12, %v6361_v0 }
  0xf7   :  { %v2564_v16 = vrot.slane %v2557_v45, %v6361_v0  ;;  %v1917_v32 = vpop.permute.xlu1 %1916  ;;  %v3300_v10 = vcombine.low %v3291_v38, %v3298_v59  ;;  %v3347_v35 = vrot.slane %v3319_v39, %v6361_v0  ;;  %v7324_v38 = vld [vmem:[%s8194_s0 + $0xa8] sm:$0xf]  ;;  %v903_v51 = vrot.slane %v7242_v24, %v6344_v3 }
  0xf8   :  { %v878_v5 = vcombine.low %v599_v31, %v606_v29  ;;  %v1969_v61 = vsel %vm929_vm6, %v338_v58, %v1917_v32  ;;  %v1923_v48 = vpop.permute.xlu0 %1922  ;;  %v877_v17 = vcombine.low %v869_v2, %v876_v4  ;;  %v5582_v29 = vcombine.high %v7251_v9, %v7260_v54 }
  0xf9   :  { %v3267_v25 = vcombine.low %v2564_v16, %v7126_v41  ;;  %v2620_v43 = vrot.slane %v1969_v61, %v6361_v0  ;;  %v7301_v21 = vsel %vm929_vm6, %v341_v18, %v1923_v48  ;;  %v3349_v59 = vcombine.low %v3340_v15, %v3347_v35 }
  0xfa   :  { %v886_v36 = vrot.slane %v878_v5, %v6344_v3  ;;  %v2691_v47 = vcombine.high %v7301_v21, %v7301_v21  ;;  %v2698_v31 = vrot.slane %v7301_v21, %v6361_v0  ;;  %5723 = vmatmul.mubr.msk.f32.gmra.mxu0 %vm929_vm6, %v877_v17  ;;  %v912_v48 = vcombine.low %v646_v60, %v7287_v37 }
  0xfb   :  { %v3277_v41 = vrot.slane %v3267_v25, %v6361_v0  ;;  %v2627_v46 = vrot.slane %v2620_v43, %v6361_v0  ;;  %v264_v18 = vpop.permute.xlu1 %263  ;;  %5725 = vmatprep.mubr.msk.f32.mxu0 %vm5890_vm3, %v5889_v40  ;;  %v647_v60 = vcombine.high %v7287_v37, %v7287_v37 }
  0xfc   :  { %v2705_v28 = vrot.slane %v2691_v47, %v6361_v0  ;;  %v2706_v45 = vcombine.high %v2698_v31, %v2698_v31  ;;  %v2714_v58 = vrot.slane %v2698_v31, %v6361_v0  ;;  %v155_v33 = vpop.permute.xlu0 %154  ;;  %v894_v2 = vcombine.low %v886_v36, %v893_v22 }
  0xfd   :  { %v3316_v4 = vcombine.low %v2613_v55, %v2627_v46  ;;  %v315_v12 = vsel %vm293_vm4, %v7324_v38, %v155_v33  ;;  %v3299_v39 = vcombine.low %v3277_v41, %v3284_v6  ;;  %v3314_v22 = vrot.slane %v3300_v10, %v6361_v0 }
  0xfe   :  { %v2728_v16 = vrot.slane %v2706_v45, %v6361_v0  ;;  %v2736_v32 = vcombine.high %v2714_v58, %v2714_v58  ;;  %5726 = vmatmul.mubr.msk.f32.gmra.mxu0 %vm929_vm6, %v894_v2  ;;  %v2707_v54 = vcombine.high %v2705_v28, %v2705_v28  ;;  %v340_v55 = vsel %vm318_vm5, %v315_v12, %v264_v18  ;;  %v7356_v45 = vld [vmem:[%s8194_s0 + $0xb8] sm:$0xf] }
  0xff   :  { %v3326_v9 = vrot.slane %v3316_v4, %v6361_v0  ;;  %v159_v5 = vpop.permute.xlu1 %158  ;;  %v3307_v61 = vrot.slane %v3299_v39, %v6361_v0  ;;  %5728 = vmatprep.mubr.msk.f32.mxu0 %vm5890_vm3, %v5889_v40  ;;  %v2721_v17 = vrot.slane %v2705_v28, %v6361_v0  ;;  %v3333_v6 = vrot.slane %v3317_v50, %v6361_v0 }
 0x100   :  { %v2738_v25 = vcombine.high %v2728_v16, %v2728_v16  ;;  %v1921_v43 = vpop.permute.xlu0 %1920  ;;  %v3367_v36 = vcombine.low %v2728_v16, %v2736_v32  ;;  %v630_v47 = vrot.slane %v340_v55, %v6344_v3  ;;  %v2735_v15 = vrot.slane %v2707_v54, %v6361_v0 }
 0x101   :  { %v1971_v31 = vsel %vm929_vm6, %v340_v55, %v1921_v43  ;;  %v3315_v10 = vcombine.low %v3307_v61, %v3314_v22  ;;  %v3348_v18 = vcombine.low %v3326_v9, %v3333_v6  ;;  %v3363_v50 = vrot.slane %v3349_v59, %v6361_v0  ;;  %v5849_v55 = vld [vmem:[%s8194_s0] sm:$0xff]  ;;  %v5850_v61 = vld [vmem:[%s8194_s0 + $0x8] sm:$0xf] }
 0x102   :  { %v3368_v41 = vcombine.low %v2738_v25, %v2721_v17  ;;  %v2683_v46 = vrot.slane %v1971_v31, %v6361_v0  ;;  %v896_v35 = vcombine.low %v630_v47, %v7263_v8  ;;  %v317_v37 = vsel %vm293_vm4, %v7356_v45, %v159_v5 }
 0x103   :  { %5781 = vmatprep.mubr.f32.mxu1 %v3315_v10  ;;  %v1925_v56 = vpop.permute.xlu1 %1924  ;;  %v3356_v8 = vrot.slane %v3348_v18, %v6361_v0  ;;  %v2737_v4 = vcombine.high %v2721_v17, %v2721_v17  ;;  %v3389_v39 = vrot.slane %v3367_v36, %v6361_v0  ;;  %v5198_v5 = vrot.slane %v5849_v55, 4 }
 0x104   :  { %v2690_v28 = vrot.slane %v2683_v46, %v6361_v0  ;;  %v268_v33 = vpop.permute.xlu0 %267  ;;  %v3396_v2 = vrot.slane %v3368_v41, %v6361_v0  ;;  %v910_v24 = vrot.slane %v896_v35, %v6344_v3  ;;  %v5199_v17 = vrot.slane %v5850_v61, 4  ;;  %v5852_v35 = vld [vmem:[%s8194_s0 + $0x18] sm:$0xf] }
 0x105   :  { %v342_v12 = vsel %vm318_vm5, %v317_v37, %v268_v33  ;;  %v3364_v59 = vcombine.low %v3356_v8, %v3363_v50  ;;  %v3375_v43 = vrot.slane %v5582_v29, %v6361_v0  ;;  %v2739_v36 = vcombine.high %v2735_v15, %v2735_v15  ;;  %v5851_v29 = vld [vmem:[%s8194_s0 + $0x10] sm:$0xff]  ;;  %v5853_v37 = vld [vmem:[%s8194_s0 + $0x40] sm:$0xff]  ;;  %v5854_v8 = vld [vmem:[%s8194_s0 + $0x48] sm:$0xf] }
 0x106   :  { %v3366_v16 = vcombine.low %v2690_v28, %v2714_v58  ;;  %v654_v32 = vrot.slane %v342_v12, %v6344_v3  ;;  %v1973_v22 = vsel %vm929_vm6, %v342_v12, %v1925_v56  ;;  %v911_v54 = vcombine.low %v903_v51, %v910_v24 }
 0x107   :  { %v2746_v9 = vrot.slane %v1973_v22, %v6361_v0  ;;  %5782 = vmatmul.mubr.f32.gmra.mxu1 %v3364_v59  ;;  %v3398_v6 = vcombine.low %v3389_v39, %v3396_v2  ;;  %v3414_v31 = vcombine.low %v2735_v15, %v2737_v4  ;;  %v920_v41 = vrot.slane %v912_v48, %v6344_v3  ;;  %v5855_v39 = vld [vmem:[%s8194_s0 + $0x20] sm:$0xff] }
 0x108   :  { %v3382_v58 = vrot.slane %v3366_v16, %v6361_v0  ;;  %v913_v25 = vcombine.low %v647_v60, %v654_v32  ;;  %5729 = vmatmul.mubr.msk.f32.gmra.mxu0 %vm929_vm6, %v911_v54  ;;  %v5201_v18 = vrot.slane %v5851_v29, 4  ;;  %v5202_v56 = vrot.slane %v5852_v35, 4  ;;  %v5856_v32 = vld [vmem:[%s8194_s0 + $0x28] sm:$0xf]  ;;  %v5857_v54 = vld [vmem:[%s8194_s0 + $0x50] sm:$0xff] }
 0x109   :  { %v2753_v47 = vrot.slane %v2746_v9, %v6361_v0  ;;  %5731 = vmatprep.mubr.msk.f32.mxu0 %vm5890_vm3, %v5889_v40  ;;  %v3412_v50 = vrot.slane %v3398_v6, %v6361_v0  ;;  %v5200_v40 = vsel %vm5197_vm7, %v5198_v5, %v5199_v17  ;;  %v3422_v48 = vrot.slane %v3414_v31, %v6361_v0  ;;  %v5858_v17 = vld [vmem:[%s8194_s0 + $0x30] sm:$0xff] }
 0x10a   :  { %v927_v10 = vrot.slane %v913_v25, %v6344_v3  ;;  %v3397_v46 = vcombine.low %v3375_v43, %v3382_v58  ;;  %v5210_v33 = vrot.slane %v5853_v37, 4  ;;  %v5211_v2 = vrot.slane %v5854_v8, 4  ;;  %v5859_v25 = vld [vmem:[%s8194_s0 + $0x38] sm:$0xf]  ;;  %v7484_v8 = vld [vmem:[%s8198_s4] ss:$0 sm:$0xff] }
 0x10b   :  { %v3415_v60 = vcombine.low %v2739_v36, %v2753_v47  ;;  %v5203_v12 = vsel %vm5197_vm7, %v5201_v18, %v5202_v56  ;;  %v5204_v16 = vrot.slane %v5855_v39, 4  ;;  %v5205_v22 = vrot.slane %v5856_v32, 4 }
 0x10c   :  { %v928_v15 = vcombine.low %v920_v41, %v927_v10  ;;  %v3405_v51 = vrot.slane %v3397_v46, %v6361_v0  ;;  %v5212_v9 = vsel %vm5197_vm7, %v5210_v33, %v5211_v2  ;;  %v5213_v55 = vrot.slane %v5857_v54, 4  ;;  %v5861_v10 = vld [vmem:[%s8194_s0 + $0x70] sm:$0xff] }
 0x10d   :  { %v3429_v28 = vrot.slane %v3415_v60, %v6361_v0  ;;  %v5214_v5 = vrot.slane %v6891_v7, 4  ;;  %v5206_v61 = vsel %vm5197_vm7, %v5204_v16, %v5205_v22  ;;  %v5207_v58 = vrot.slane %v5858_v17, 4 }
 0x10e   :  { %5732 = vmatmul.mubr.msk.f32.gmra.mxu0 %vm929_vm6, %v928_v15  ;;  %v3413_v4 = vcombine.low %v3405_v51, %v3412_v50  ;;  %v5208_v43 = vrot.slane %v5859_v25, 4  ;;  %v5217_v36 = vrot.slane %v6911_v26, 4  ;;  %v5219_v41 = vrot.slane %v5861_v10, 4 }
 0x10f   :  { %5596 = vmatprep.mubr.msk.f32.mxu0 %vm293_vm4, %v5200_v40  ;;  %v3430_v24 = vcombine.low %v3422_v48, %v3429_v28  ;;  %v5215_v7 = vsel %vm5197_vm7, %v5213_v55, %v5214_v5  ;;  %v5220_v46 = vrot.slane %v7066_v20, 4  ;;  %v5223_v26 = vrot.slane %v7203_v53, 4 }
 0x110   :  { %5784 = vmatprep.mubr.f32.mxu1 %v3413_v4  ;;  %v5209_v47 = vsel %vm5197_vm7, %v5207_v58, %v5208_v43  ;;  %v5226_v20 = vrot.slane %v7220_v49, 4  ;;  %v5228_v53 = vrot.slane %v7085_v44, 4  ;;  %v5232_v49 = vrot.slane %v7356_v45, 4 }
 0x111   :  { %v3437_v59 = vrot.slane %v3430_v24, %v6361_v0  ;;  %vm5193_vm3 = vcmask 130112   ;;  %vm5195_vm5 = vcmask 126016   ;;  %vm5536_vm6 = vcmask 191616  }
 0x112   :  { %5350 = vmatmul.mubr.f32.vlgmr.msra.gmra.mxu0 %v6381_v42  ;;  %v5860_v42 = vld [vmem:[%s8194_s0 + $0x60] sm:$0xff] }
 0x113   :  { %5785 = vmatmul.mubr.f32.gmra.mxu1 %v3437_v59  ;;  %5597 = vmatprep.mubr.msk.f32.mxu0 %vm293_vm4, %v5203_v12  ;;  %v5216_v6 = vrot.slane %v5860_v42, 4 }
 0x114   :  { %5600 = vmatprep.mubr.msk.f32.mxu1 %vm293_vm4, %v5212_v9 }
 0x115   :  { %v5218_v31 = vsel %vm5197_vm7, %v5216_v6, %v5217_v36 }
 0x116   :  { %5355 = vmatmul.mubr.f32.gmra.mxu0 %v6374_v34  ;;  %v5221_v34 = vsel %vm5197_vm7, %v5219_v41, %v5220_v46 }
 0x117   :  { %5370 = vmatmul.mubr.f32.vlgmr.msra.gmra.mxu1 %v6652_v57  ;;  %5598 = vmatprep.mubr.msk.f32.mxu0 %vm293_vm4, %v5206_v61  ;;  %v5222_v57 = vrot.slane %v6940_v62, 4 }
 0x118   :  { %5601 = vmatprep.mubr.msk.f32.mxu1 %vm293_vm4, %v5215_v7 }
 0x11a   :  { %5360 = vmatmul.mubr.f32.gmra.mxu0 %v6520_v23  ;;  %v5224_v23 = vsel %vm5197_vm7, %v5222_v57, %v5223_v26 }
 0x11b   :  { %5375 = vmatmul.mubr.f32.gmra.mxu1 %v6688_v63  ;;  %5599 = vmatprep.mubr.msk.f32.mxu0 %vm293_vm4, %v5209_v47  ;;  %v5225_v63 = vrot.slane %v7016_v30, 4  ;;  %v5231_v30 = vrot.slane %v7227_v52, 4 }
 0x11c   :  { %5602 = vmatprep.mubr.msk.f32.mxu1 %vm293_vm4, %v5218_v31 }
 0x11d   :  { %v5227_v62 = vsel %vm5197_vm7, %v5225_v63, %v5226_v20 }
 0x11e   :  { %5365 = vmatmul.mubr.f32.gmra.mxu0 %v6539_v11  ;;  %v5229_v11 = vrot.slane %v7324_v38, 4 }
 0x11f   :  { %5380 = vmatmul.mubr.f32.gmra.mxu1 %v6799_v13 }
 0x120   :  { %5603 = vmatprep.mubr.msk.f32.mxu1 %vm293_vm4, %v5221_v34  ;;  %v5230_v13 = vsel %vm5197_vm7, %v5228_v53, %v5229_v11 }
 0x123   :  { %5385 = vmatmul.mubr.f32.gmra.mxu1 %v6841_v14  ;;  %v5233_v14 = vsel %vm5197_vm7, %v5231_v30, %v5232_v49 }
 0x124   :  { %5604 = vmatprep.mubr.msk.f32.mxu1 %vm293_vm4, %v5224_v23 }
 0x127   :  { %5390 = vmatmul.mubr.f32.gmra.mxu1 %v7029_v19  ;;  %v7471_v19 = vld [vmem:[%s8196_s2] ss:$0 sm:$0xff] }
 0x128   :  { %5605 = vmatprep.mubr.msk.f32.mxu1 %vm293_vm4, %v5227_v62 }
 0x12b   :  { %5395 = vmatmul.mubr.f32.gmra.mxu1 %v7098_v27 }
 0x12c   :  { %5606 = vmatprep.mubr.msk.f32.mxu1 %vm293_vm4, %v5230_v13 }
 0x12f   :  { %5400 = vmatmul.mubr.f32.gmra.mxu1 %v7170_v1 }
 0x130   :  { %5607 = vmatprep.mubr.msk.f32.mxu1 %vm293_vm4, %v5233_v14  ;;  %vm5534_vm4 = vcmask 195712  }
 0x133   :  { %5405 = vmatmul.mubr.f32.gmra.mxu1 %v7301_v21 }
 0x14c   :  { %v1026_v44 = vpop.f32.mrf.mxu0 }
 0x14d   :  { %v1027_v52 = vadd.f32 %v7471_v19, %v1026_v44 }
 0x14e   :  { %v5691_v38 = vpop.f32.mrf.mxu0 }
 0x14f   :  { %v1100_v27 = vmax.f32 %v1027_v52, 0.0 }
 0x151   :  { %v1130_v45 = vcombine.high %v1100_v27, %v1100_v27  ;;  %v1137_v60 = vrot.slane %v1100_v27, %v6344_v3  ;;  %v1031_v29 = vpop.f32.mrf.mxu0 }
 0x152   :  { %v1032_v35 = vadd.f32 %v7471_v19, %v1031_v29 }
 0x153   :  { %v1144_v1 = vrot.slane %v1130_v45, %v6344_v3  ;;  %v1145_v18 = vcombine.high %v1137_v60, %v1137_v60  ;;  %v5694_v21 = vpop.f32.mrf.mxu0 }
 0x154   :  { %v1101_v51 = vmax.f32 %v1032_v35, 0.0 }
 0x155   :  { %v1146_v56 = vcombine.high %v1144_v1, %v1144_v1  ;;  %v1385_v15 = vcombine.low %v1137_v60, %v1145_v18 }
 0x156   :  { %v1147_v40 = vcombine.high %v1101_v51, %v1101_v51  ;;  %v1154_v48 = vrot.slane %v1101_v51, %v6344_v3 }
 0x157   :  { %v1386_v50 = vcombine.low %v1144_v1, %v1146_v56  ;;  %v1393_v28 = vrot.slane %v1385_v15, %v6344_v3 }
 0x158   :  { %v1408_v33 = vrot.slane %v1154_v48, %v6344_v3  ;;  %v1161_v24 = vrot.slane %v1147_v40, %v6344_v3  ;;  %v1162_v12 = vcombine.high %v1154_v48, %v1154_v48 }
 0x159   :  { %v1400_v37 = vrot.slane %v1386_v50, %v6344_v3 }
 0x15a   :  { %v1036_v2 = vpop.f32.mrf.mxu0  ;;  %v5768_v39 = vpop.f32.mrf.mxu1  ;;  %v1700_v9 = vsel %vm1699_vm9, %v1408_v33, -inf  ;;  %v1409_v58 = vcombine.low %v1162_v12, %v1161_v24  ;;  %v1163_v25 = vcombine.high %v1161_v24, %v1161_v24 }
 0x15b   :  { %v1401_v4 = vcombine.low %v1393_v28, %v1400_v37  ;;  %v1037_v16 = vadd.f32 %v7471_v19, %v1036_v2  ;;  %v3524_v32 = vadd.f32 %v5768_v39, %v7484_v8 }
 0x15c   :  { %v5697_v22 = vpop.f32.mrf.mxu0  ;;  %v3518_v55 = vpop.f32.mrf.mxu1  ;;  %v1417_v34 = vrot.slane %v1409_v58, %v6344_v3 }
 0x15d   :  { %v1698_v59 = vsel %vm1697_vm8, %v1401_v4, -inf  ;;  %v1102_v54 = vmax.f32 %v1037_v16, 0.0  ;;  %v3588_v61 = vmax.f32 %v3524_v32, 0.0  ;;  %v3519_v17 = vadd.f32 %v7484_v8, %v3518_v55 }
 0x15e   :  { %v1701_v5 = vmax.f32 %v1698_v59, %v1700_v9 }
 0x15f   :  { %v1164_v43 = vcombine.high %v1102_v54, %v1102_v54  ;;  %v1171_v7 = vrot.slane %v1102_v54, %v6344_v3  ;;  %v3671_v6 = vrot.slane %v3588_v61, %v6361_v0  ;;  %v3664_v36 = vcombine.high %v3588_v61, %v3588_v61 }
 0x160   :  { %v1702_v42 = vrot.slane %v1701_v5, 4  ;;  %v3587_v46 = vmax.f32 %v3519_v17, 0.0 }
 0x161   :  { %v1178_v47 = vrot.slane %v1164_v43, %v6344_v3  ;;  %v1179_v31 = vcombine.high %v1171_v7, %v1171_v7  ;;  %v1410_v10 = vcombine.low %v1163_v25, %v1171_v7  ;;  %v3679_v57 = vcombine.high %v3671_v6, %v3671_v6 }
 0x162   :  { %v1703_v41 = vmax.f32 %v1701_v5, %v1702_v42  ;;  %v7498_v23 = vrot.slane %v3671_v6, %v6361_v0  ;;  %v7502_v62 = vrot.slane %v3664_v36, %v6361_v0  ;;  %v3615_v30 = vcombine.high %v3587_v46, %v3587_v46 }
 0x163   :  { %v1424_v26 = vrot.slane %v1410_v10, %v6344_v3  ;;  %v1180_v63 = vcombine.high %v1178_v47, %v1178_v47  ;;  %v1432_v20 = vrot.slane %v1179_v31, %v6344_v3  ;;  %v1041_v11 = vpop.f32.mrf.mxu0  ;;  %v7505_v49 = vrot.slane %v3679_v57, %v6361_v0 }
 0x164   :  { %v1704_v13 = vrot.slane %v1703_v41, 2  ;;  %v4331_v52 = vrot.slane %v7498_v23, %v6361_v0  ;;  %v7513_v45 = vrot.slane %v7502_v62, %v6361_v0  ;;  %v3622_v29 = vrot.slane %v3587_v46, %v6361_v0 }
 0x165   :  { %v1425_v53 = vcombine.low %v1417_v34, %v1424_v26  ;;  %v5700_v44 = vpop.f32.mrf.mxu0  ;;  %v1433_v38 = vcombine.low %v1178_v47, %v1180_v63  ;;  %v1709_v27 = vsel %vm1699_vm9, %v1432_v20, -inf  ;;  %v3709_v35 = vcombine.high %v7498_v23, %v7498_v23 }
 0x166   :  { %v7516_v18 = vmax.f32 %v1703_v41, %v1704_v13  ;;  %v3629_v21 = vrot.slane %v3615_v30, %v6361_v0  ;;  %v1042_v56 = vadd.f32 %v7471_v19, %v1041_v11  ;;  %v3711_v15 = vcombine.high %v7505_v49, %v7505_v49 }
 0x167   :  { %v1708_v14 = vsel %vm1697_vm8, %v1425_v53, -inf  ;;  %v3630_v50 = vcombine.high %v3622_v29, %v3622_v29  ;;  %v4338_v28 = vrot.slane %v4331_v52, %v6361_v0  ;;  %v1441_v37 = vrot.slane %v1433_v38, %v6344_v3 }
 0x168   :  { %v1710_v60 = vmax.f32 %v1708_v14, %v1709_v27  ;;  %v3631_v33 = vcombine.high %v3629_v21, %v3629_v21  ;;  %v1103_v2 = vmax.f32 %v1042_v56, 0.0  ;;  %v3638_v24 = vrot.slane %v3622_v29, %v6361_v0 }
 0x169   :  { %v1046_v1 = vpop.f32.mrf.mxu0  ;;  %v3652_v12 = vrot.slane %v3630_v50, %v6361_v0  ;;  %v3645_v16 = vrot.slane %v3629_v21, %v6361_v0  ;;  %v1706_v63 = vrot.slane %v7516_v18, 1  ;;  %v4340_v30 = vcombine.low %v3711_v15, %v7513_v45 }
 0x16a   :  { %v1711_v51 = vrot.slane %v1710_v60, 4  ;;  %v1047_v40 = vadd.f32 %v7471_v19, %v1046_v1  ;;  %v3659_v32 = vrot.slane %v3631_v33, %v6361_v0  ;;  %v1181_v22 = vcombine.high %v1103_v2, %v1103_v2 }
 0x16b   :  { %v5703_v48 = vpop.f32.mrf.mxu0  ;;  %v1188_v59 = vrot.slane %v1103_v2, %v6344_v3  ;;  %v4276_v54 = vcombine.low %v3638_v24, %v3652_v12  ;;  %v5583_v55 = vcombine.high %v3638_v24, %v3652_v12  ;;  %v3680_v33 = vcombine.high %v7502_v62, %v7502_v62 }
 0x16c   :  { %v1712_v4 = vmax.f32 %v1710_v60, %v1711_v51  ;;  %v1104_v39 = vmax.f32 %v1047_v40, 0.0  ;;  %v4278_v61 = vcombine.low %v3645_v16, %v3659_v32  ;;  %v5584_v17 = vcombine.high %v3645_v16, %v3659_v32 }
 0x16d   :  { %v1195_v58 = vrot.slane %v1181_v22, %v6344_v3  ;;  %v1196_v25 = vcombine.high %v1188_v59, %v1188_v59  ;;  %v4286_v7 = vrot.slane %v4276_v54, %v6361_v0  ;;  %v4293_v42 = vrot.slane %v5583_v55, %v6361_v0 }
 0x16e   :  { %v1713_v9 = vrot.slane %v1712_v4, 2  ;;  %v1198_v5 = vcombine.high %v1104_v39, %v1104_v39  ;;  %v1205_v6 = vrot.slane %v1104_v39, %v6344_v3  ;;  %v4300_v36 = vrot.slane %v4278_v61, %v6361_v0 }
 0x16f   :  { %v4307_v47 = vrot.slane %v5584_v17, %v6361_v0  ;;  %v1434_v31 = vcombine.low %v1188_v59, %v1196_v25  ;;  %v1456_v10 = vrot.slane %v1195_v58, %v6344_v3  ;;  %v4308_v34 = vcombine.low %v4286_v7, %v4293_v42 }
 0x170   :  { %v1714_v43 = vmax.f32 %v1712_v4, %v1713_v9  ;;  %v1197_v57 = vcombine.high %v1195_v58, %v1195_v58  ;;  %v1212_v26 = vrot.slane %v1198_v5, %v6344_v3  ;;  %v1213_v11 = vcombine.high %v1205_v6, %v1205_v6 }
 0x171   :  { %v4309_v20 = vcombine.low %v4300_v36, %v4307_v47  ;;  %v1448_v53 = vrot.slane %v1434_v31, %v6344_v3  ;;  %v4316_v14 = vrot.slane %v4308_v34, %v6361_v0  ;;  %v1718_v21 = vsel %vm1699_vm9, %v1456_v10, -inf }
 0x172   :  { %v1051_v41 = vpop.f32.mrf.mxu0  ;;  %v1715_v46 = vrot.slane %v1714_v43, 1  ;;  %v1214_v44 = vcombine.high %v1212_v26, %v1212_v26  ;;  %v1457_v52 = vcombine.low %v1197_v57, %v1205_v6  ;;  %v1458_v60 = vcombine.low %v1213_v11, %v1212_v26 }
 0x173   :  { %v4323_v38 = vrot.slane %v4309_v20, %v6361_v0  ;;  %v1449_v27 = vcombine.low %v1441_v37, %v1448_v53  ;;  %v1052_v29 = vadd.f32 %v7471_v19, %v1051_v41  ;;  %v4339_v37 = vcombine.low %v7505_v49, %v3709_v35 }
 0x174   :  { %v5706_v13 = vpop.f32.mrf.mxu0  ;;  %v1716_v1 = vmax.f32 %v1714_v43, %v1715_v46  ;;  %v1465_v56 = vrot.slane %v1457_v52, %v6344_v3  ;;  %v1480_v51 = vrot.slane %v1214_v44, %v6344_v3  ;;  %v1472_v40 = vrot.slane %v1458_v60, %v6344_v3 }
 0x175   :  { %v4324_v50 = vcombine.low %v4316_v14, %v4323_v38  ;;  %v1717_v15 = vsel %vm1697_vm8, %v1449_v27, -inf  ;;  %v1105_v48 = vmax.f32 %v1052_v29, 0.0  ;;  %v5058_v2 = vsel %vm5057_vm10, %v4338_v28, -inf }
 0x176   :  { %v1719_v4 = vmax.f32 %v1717_v15, %v1718_v21  ;;  %v1707_v24 = vmax.f32 %v7516_v18, %v1706_v63  ;;  %v1473_v39 = vcombine.low %v1465_v56, %v1472_v40  ;;  %v4356_v32 = vrot.slane %v4340_v30, %v6361_v0 }
 0x177   :  { %v5056_v12 = vsel %vm1697_vm8, %v4324_v50, -inf  ;;  %v1215_v16 = vcombine.high %v1105_v48, %v1105_v48  ;;  %v1222_v62 = vrot.slane %v1105_v48, %v6344_v3  ;;  %v1727_v23 = vsel %vm1699_vm9, %v1480_v51, -inf }
 0x178   :  { %v5059_v22 = vmax.f32 %v5056_v12, %v5058_v2  ;;  %v1720_v59 = vrot.slane %v1719_v4, 4  ;;  %v1726_v9 = vsel %vm1697_vm8, %v1473_v39, -inf  ;;  %v7566_v35 = vsel %vm1819_vm11, %v1716_v1, %v1707_v24 }
 0x179   :  { %v1229_v49 = vrot.slane %v1215_v16, %v6344_v3  ;;  %v4349_v18 = vrot.slane %v4339_v37, %v6361_v0  ;;  %v1728_v55 = vmax.f32 %v1726_v9, %v1727_v23  ;;  %v3708_v61 = vrot.slane %v3680_v33, %v6361_v0 }
 0x17a   :  { %v5060_v28 = vrot.slane %v5059_v22, 4  ;;  %v1721_v54 = vmax.f32 %v1719_v4, %v1720_v59  ;;  %v3710_v17 = vcombine.high %v7513_v45, %v7513_v45  ;;  %v1230_v42 = vcombine.high %v1222_v62, %v1222_v62 }
 0x17b   :  { %v1231_v58 = vcombine.high %v1229_v49, %v1229_v49  ;;  %v7573_v43 = vcombine.low %v4349_v18, %v4356_v32  ;;  %v1729_v36 = vrot.slane %v1728_v55, 4  ;;  %v3712_v53 = vcombine.high %v3708_v61, %v3708_v61 }
 0x17c   :  { %v5771_v5 = vpop.f32.mrf.mxu1  ;;  %v1722_v7 = vrot.slane %v1721_v54, 2  ;;  %v5061_v10 = vmax.f32 %v5059_v22, %v5060_v28  ;;  %v4341_v46 = vcombine.low %v3708_v61, %v3710_v17  ;;  %v1481_v20 = vcombine.low %v1222_v62, %v1230_v42 }
 0x17d   :  { %v3534_v25 = vadd.f32 %v5771_v5, %v7484_v8  ;;  %v1482_v41 = vcombine.low %v1229_v49, %v1231_v58  ;;  %v4379_v45 = vrot.slane %v7573_v43, %v6361_v0  ;;  %v1730_v11 = vmax.f32 %v1728_v55, %v1729_v36 }
 0x17e   :  { %v3528_v6 = vpop.f32.mrf.mxu1  ;;  %v1723_v63 = vmax.f32 %v1721_v54, %v1722_v7  ;;  %v5062_v52 = vrot.slane %v5061_v10, 2  ;;  %v1489_v50 = vrot.slane %v1481_v20, %v6344_v3  ;;  %v4363_v4 = vrot.slane %v4341_v46, %v6361_v0 }
 0x17f   :  { %v3590_v47 = vmax.f32 %v3534_v25, 0.0  ;;  %v3529_v31 = vadd.f32 %v7484_v8, %v3528_v6  ;;  %v1496_v38 = vrot.slane %v1482_v41, %v6344_v3  ;;  %v1731_v37 = vrot.slane %v1730_v11, 2 }
 0x180   :  { %v1724_v33 = vrot.slane %v1723_v63, 1  ;;  %v7592_v16 = vmax.f32 %v5061_v10, %v5062_v52 }
 0x181   :  { %v3762_v34 = vcombine.high %v3590_v47, %v3590_v47  ;;  %v3769_v57 = vrot.slane %v3590_v47, %v6361_v0  ;;  %v3589_v26 = vmax.f32 %v3529_v31, 0.0  ;;  %v1497_v24 = vcombine.low %v1489_v50, %v1496_v38 }
 0x182   :  { %v1056_v44 = vpop.f32.mrf.mxu0  ;;  %v1732_v28 = vmax.f32 %v1730_v11, %v1731_v37  ;;  %v7600_v61 = vmax.f32 %v1723_v63, %v1724_v33 }
 0x183   :  { %v3776_v13 = vrot.slane %v3762_v34, %v6361_v0  ;;  %v3777_v30 = vcombine.high %v3769_v57, %v3769_v57  ;;  %v3785_v14 = vrot.slane %v3769_v57, %v6361_v0  ;;  %v3713_v27 = vcombine.high %v3589_v26, %v3589_v26 }
 0x184   :  { %v3720_v60 = vrot.slane %v3589_v26, %v6361_v0  ;;  %v5709_v51 = vpop.f32.mrf.mxu0  ;;  %v1057_v18 = vadd.f32 %v7471_v19, %v1056_v44  ;;  %v1733_v46 = vrot.slane %v1732_v28, 1 }
 0x185   :  { %v3778_v29 = vcombine.high %v3776_v13, %v3776_v13  ;;  %v3792_v1 = vrot.slane %v3776_v13, %v6361_v0  ;;  %v3799_v21 = vrot.slane %v3777_v30, %v6361_v0  ;;  %v3807_v56 = vcombine.high %v3785_v14, %v3785_v14 }
 0x186   :  { %v3727_v15 = vrot.slane %v3713_v27, %v6361_v0  ;;  %v3728_v40 = vcombine.high %v3720_v60, %v3720_v60  ;;  %v3736_v48 = vrot.slane %v3720_v60, %v6361_v0  ;;  %v1106_v36 = vmax.f32 %v1057_v18, 0.0 }
 0x187   :  { %v3809_v2 = vcombine.high %v3799_v21, %v3799_v21  ;;  %v7590_v12 = vrot.slane %v3778_v29, %v6361_v0  ;;  %v3808_v32 = vcombine.high %v3792_v1, %v3792_v1  ;;  %v4405_v22 = vcombine.low %v3785_v14, %v3799_v21 }
 0x188   :  { %v3729_v39 = vcombine.high %v3727_v15, %v3727_v15  ;;  %v4457_v59 = vrot.slane %v3807_v56, %v6361_v0  ;;  %v3750_v62 = vrot.slane %v3728_v40, %v6361_v0  ;;  %v3743_v9 = vrot.slane %v3727_v15, %v6361_v0 }
 0x189   :  { %v4342_v49 = vcombine.low %v3712_v53, %v3736_v48  ;;  %v4465_v54 = vcombine.low %v3809_v2, %v3792_v1  ;;  %v4433_v7 = vrot.slane %v4405_v22, %v6361_v0  ;;  %v4466_v6 = vcombine.low %v7590_v12, %v3808_v32 }
 0x18a   :  { %v3757_v23 = vrot.slane %v3729_v39, %v6361_v0  ;;  %v4394_v55 = vrot.slane %v3750_v62, %v6361_v0  ;;  %v5585_v5 = vcombine.high %v3736_v48, %v3750_v62  ;;  %v4464_v42 = vrot.slane %v4457_v59, %v6361_v0 }
 0x18b   :  { %v4370_v17 = vrot.slane %v4342_v49, %v6361_v0  ;;  %v4475_v34 = vrot.slane %v4465_v54, %v6361_v0  ;;  %v1239_v26 = vrot.slane %v1106_v36, %v6344_v3  ;;  %v1232_v11 = vcombine.high %v1106_v36, %v1106_v36 }
 0x18c   :  { %v4403_v58 = vcombine.low %v3743_v9, %v3757_v23  ;;  %v5586_v25 = vcombine.high %v3743_v9, %v3757_v23  ;;  %v4412_v31 = vrot.slane %v5585_v5, %v6361_v0  ;;  %v4401_v57 = vrot.slane %v4394_v55, %v6361_v0 }
 0x18d   :  { %v4372_v47 = vcombine.low %v4363_v4, %v4370_v17  ;;  %v4482_v30 = vrot.slane %v4466_v6, %v6361_v0  ;;  %v5076_v14 = vsel %vm5057_vm10, %v4464_v42, -inf  ;;  %v1504_v44 = vrot.slane %v1239_v26, %v6344_v3 }
 0x18e   :  { %v4419_v10 = vrot.slane %v4403_v58, %v6361_v0  ;;  %v4426_v41 = vrot.slane %v5586_v25, %v6361_v0  ;;  %v1735_v29 = vsel %vm1697_vm8, %v1497_v24, -inf  ;;  %v5067_v21 = vsel %vm5057_vm10, %v4401_v57, -inf }
 0x18f   :  { %v4386_v63 = vrot.slane %v4372_v47, %v6361_v0  ;;  %v1736_v56 = vsel %vm1699_vm9, %v1504_v44, -inf  ;;  %v7628_v43 = vrot.slane %v1232_v11, %v6344_v3  ;;  %v1247_v33 = vcombine.high %v1239_v26, %v1239_v26 }
 0x190   :  { %v4434_v20 = vcombine.low %v4412_v31, %v4419_v10  ;;  %v4435_v53 = vcombine.low %v4426_v41, %v4433_v7  ;;  %v5774_v13 = vpop.f32.mrf.mxu1  ;;  %v7631_v24 = vcombine.low %v4475_v34, %v4482_v30  ;;  %v7635_v18 = vmax.f32 %v1732_v28, %v1733_v46 }
 0x191   :  { %v3544_v52 = vadd.f32 %v5774_v13, %v7484_v8  ;;  %v4387_v38 = vcombine.low %v4379_v45, %v4386_v63  ;;  %v1737_v45 = vmax.f32 %v1735_v29, %v1736_v56  ;;  %v7639_v58 = vcombine.low %v1247_v33, %v7628_v43 }
 0x192   :  { %v4442_v27 = vrot.slane %v4434_v20, %v6361_v0  ;;  %v4449_v60 = vrot.slane %v4435_v53, %v6361_v0  ;;  %v3538_v1 = vpop.f32.mrf.mxu1  ;;  %v4505_v31 = vrot.slane %v7631_v24, %v6361_v0  ;;  %v3810_v41 = vcombine.high %v7590_v12, %v7590_v12 }
 0x193   :  { %v3592_v51 = vmax.f32 %v3544_v52, 0.0  ;;  %v3539_v50 = vadd.f32 %v7484_v8, %v3538_v1  ;;  %v5066_v40 = vsel %vm1697_vm8, %v4387_v38, -inf  ;;  %v1738_v32 = vrot.slane %v1737_v45, 4 }
 0x194   :  { %v4450_v15 = vcombine.low %v4442_v27, %v4449_v60  ;;  %v5068_v48 = vmax.f32 %v5066_v40, %v5067_v21  ;;  %v1248_v52 = vcombine.high %v7628_v43, %v7628_v43 }
 0x195   :  { %v3860_v37 = vcombine.high %v3592_v51, %v3592_v51  ;;  %v3867_v2 = vrot.slane %v3592_v51, %v6361_v0  ;;  %v3591_v22 = vmax.f32 %v3539_v50, 0.0  ;;  %v1739_v54 = vmax.f32 %v1737_v45, %v1738_v32 }
 0x196   :  { %v1061_v4 = vpop.f32.mrf.mxu0  ;;  %v5075_v39 = vsel %vm1697_vm8, %v4450_v15, -inf  ;;  %v5069_v59 = vrot.slane %v5068_v48, 4 }
 0x197   :  { %v5077_v62 = vmax.f32 %v5075_v39, %v5076_v14  ;;  %v3874_v9 = vrot.slane %v3860_v37, %v6361_v0  ;;  %v3875_v23 = vcombine.high %v3867_v2, %v3867_v2  ;;  %v3811_v55 = vcombine.high %v3591_v22, %v3591_v22 }
 0x198   :  { %v5712_v49 = vpop.f32.mrf.mxu0  ;;  %v3818_v5 = vrot.slane %v3591_v22, %v6361_v0  ;;  %v5070_v17 = vmax.f32 %v5068_v48, %v5069_v59  ;;  %v1740_v6 = vrot.slane %v1739_v54, 2  ;;  %v3883_v36 = vrot.slane %v3867_v2, %v6361_v0 }
 0x199   :  { %v3876_v25 = vcombine.high %v3874_v9, %v3874_v9  ;;  %v3890_v7 = vrot.slane %v3874_v9, %v6361_v0  ;;  %v3897_v47 = vrot.slane %v3875_v23, %v6361_v0  ;;  %v3825_v28 = vrot.slane %v3811_v55, %v6361_v0 }
 0x19a   :  { %v1066_v42 = vpop.f32.mrf.mxu0  ;;  %v5078_v10 = vrot.slane %v5077_v62, 4  ;;  %v3826_v46 = vcombine.high %v3818_v5, %v3818_v5  ;;  %v5071_v57 = vrot.slane %v5070_v17, 2  ;;  %v3834_v13 = vrot.slane %v3818_v5, %v6361_v0 }
 0x19b   :  { %v7650_v26 = vrot.slane %v3876_v25, %v6361_v0  ;;  %v3906_v63 = vcombine.high %v3890_v7, %v3890_v7  ;;  %v4530_v20 = vcombine.low %v3883_v36, %v3897_v47  ;;  %v5588_v53 = vcombine.high %v3883_v36, %v3897_v47 }
 0x19c   :  { %v5715_v34 = vpop.f32.mrf.mxu0  ;;  %v3827_v11 = vcombine.high %v3825_v28, %v3825_v28  ;;  %v1513_v14 = vrot.slane %v7639_v58, %v6344_v3  ;;  %v7656_v44 = vmax.f32 %v1739_v54, %v1740_v6  ;;  %v1062_v12 = vadd.f32 %v7471_v19, %v1061_v4 }
 0x19d   :  { %v7661_v38 = vmax.f32 %v5077_v62, %v5078_v10  ;;  %v4583_v27 = vrot.slane %v3890_v7, %v6361_v0  ;;  %v3848_v60 = vrot.slane %v3826_v46, %v6361_v0  ;;  %v7666_v1 = vmax.f32 %v5070_v17, %v5071_v57 }
 0x19e   :  { %v3855_v29 = vrot.slane %v3827_v11, %v6361_v0  ;;  %v4552_v21 = vrot.slane %v4530_v20, %v6361_v0  ;;  %v7670_v56 = vcombine.low %v7650_v26, %v3906_v63  ;;  %v3856_v51 = vcombine.high %v3834_v13, %v3834_v13 }
 0x19f   :  { %v4559_v50 = vrot.slane %v5588_v53, %v6361_v0  ;;  %v3841_v15 = vrot.slane %v3825_v28, %v6361_v0  ;;  %v3858_v40 = vcombine.high %v3848_v60, %v3848_v60  ;;  %v4467_v43 = vcombine.low %v3810_v41, %v3834_v13 }
 0x1a0   :  { %v1742_v45 = vrot.slane %v7656_v44, 1  ;;  %v4468_v48 = vcombine.low %v3848_v60, %v3856_v51  ;;  %v1107_v33 = vmax.f32 %v1062_v12, 0.0  ;;  %v1067_v37 = vadd.f32 %v7471_v19, %v1066_v42 }
 0x1a1   :  { %v7677_v4 = vrot.slane %v4583_v27, %v6361_v0  ;;  %v4489_v39 = vrot.slane %v4467_v43, %v6361_v0  ;;  %v4528_v32 = vcombine.low %v3841_v15, %v3855_v29  ;;  %v5587_v22 = vcombine.high %v3841_v15, %v3855_v29 }
 0x1a2   :  { %v4496_v59 = vrot.slane %v4468_v48, %v6361_v0  ;;  %v1249_v62 = vcombine.high %v1107_v33, %v1107_v33  ;;  %v1256_v9 = vrot.slane %v1107_v33, %v6344_v3  ;;  %v1108_v23 = vmax.f32 %v1067_v37, 0.0 }
 0x1a3   :  { %v5777_v2 = vpop.f32.mrf.mxu1  ;;  %v4561_v54 = vcombine.low %v4552_v21, %v4559_v50  ;;  %v4520_v55 = vrot.slane %v3858_v40, %v6361_v0  ;;  %v4538_v42 = vrot.slane %v4528_v32, %v6361_v0  ;;  %v4545_v6 = vrot.slane %v5587_v22, %v6361_v0 }
 0x1a4   :  { %v3554_v5 = vadd.f32 %v5777_v2, %v7484_v8  ;;  %v4498_v17 = vcombine.low %v4489_v39, %v4496_v59  ;;  %v1263_v58 = vrot.slane %v1249_v62, %v6344_v3  ;;  %v1264_v25 = vcombine.high %v1256_v9, %v1256_v9 }
 0x1a5   :  { %v1506_v7 = vcombine.low %v1248_v52, %v1256_v9  ;;  %v1266_v36 = vcombine.high %v1108_v23, %v1108_v23  ;;  %v1273_v47 = vrot.slane %v1108_v23, %v6344_v3  ;;  %v3548_v28 = vpop.f32.mrf.mxu1  ;;  %v4527_v57 = vrot.slane %v4520_v55, %v6361_v0 }
 0x1a6   :  { %v4512_v10 = vrot.slane %v4498_v17, %v6361_v0  ;;  %v1265_v41 = vcombine.high %v1263_v58, %v1263_v58  ;;  %v1528_v34 = vrot.slane %v1264_v25, %v6344_v3  ;;  %v3594_v53 = vmax.f32 %v3554_v5, 0.0 }
 0x1a7   :  { %v1520_v46 = vrot.slane %v1506_v7, %v6344_v3  ;;  %v7694_v63 = vrot.slane %v1266_v36, %v6344_v3  ;;  %v1281_v20 = vcombine.high %v1273_v47, %v1273_v47  ;;  %v3549_v52 = vadd.f32 %v7484_v8, %v3548_v28 }
 0x1a8   :  { %v4513_v11 = vcombine.low %v4505_v31, %v4512_v10  ;;  %v1529_v12 = vcombine.low %v1263_v58, %v1265_v41  ;;  %v4575_v27 = vrot.slane %v4561_v54, %v6361_v0  ;;  %v4560_v60 = vcombine.low %v4538_v42, %v4545_v6 }
 0x1a9   :  { %v1521_v13 = vcombine.low %v1513_v14, %v1520_v46  ;;  %v1530_v29 = vcombine.low %v1273_v47, %v1281_v20  ;;  %v3958_v21 = vcombine.high %v3594_v53, %v3594_v53  ;;  %v1745_v40 = vsel %vm1699_vm9, %v1528_v34, -inf }
 0x1aa   :  { %v7701_v51 = vpop.f32.mrf.mxu0  ;;  %v5084_v50 = vsel %vm1697_vm8, %v4513_v11, -inf  ;;  %v3965_v24 = vrot.slane %v3594_v53, %v6361_v0  ;;  %v1537_v31 = vrot.slane %v1529_v12, %v6344_v3  ;;  %v1552_v48 = vrot.slane %v7694_v63, %v6344_v3 }
 0x1ab   :  { %v1744_v15 = vsel %vm1697_vm8, %v1521_v13, -inf  ;;  %v1544_v43 = vrot.slane %v1530_v29, %v6344_v3  ;;  %v5085_v37 = vsel %vm5057_vm10, %v4527_v57, -inf  ;;  %v3972_v2 = vrot.slane %v3958_v21, %v6361_v0 }
 0x1ac   :  { %v1746_v14 = vmax.f32 %v1744_v15, %v1745_v40  ;;  %v5718_v33 = vpop.f32.mrf.mxu0  ;;  %v3973_v39 = vcombine.high %v3965_v24, %v3965_v24  ;;  %v3593_v32 = vmax.f32 %v3549_v52, 0.0  ;;  %v4568_v22 = vrot.slane %v4560_v60, %v6361_v0 }
 0x1ad   :  { %v5086_v59 = vmax.f32 %v5084_v50, %v5085_v37  ;;  %v1545_v9 = vcombine.low %v1537_v31, %v1544_v43  ;;  %v3974_v54 = vcombine.high %v3972_v2, %v3972_v2  ;;  %v3988_v55 = vrot.slane %v3972_v2, %v6361_v0 }
 0x1ae   :  { %v1747_v62 = vrot.slane %v1746_v14, 4  ;;  %v1076_v23 = vpop.f32.mrf.mxu0  ;;  %v3995_v5 = vrot.slane %v3973_v39, %v6361_v0  ;;  %v3909_v17 = vcombine.high %v3593_v32, %v3593_v32  ;;  %v1754_v7 = vsel %vm1699_vm9, %v1552_v48, -inf }
 0x1af   :  { %v1753_v25 = vsel %vm1697_vm8, %v1545_v9, -inf  ;;  %v3916_v42 = vrot.slane %v3593_v32, %v6361_v0  ;;  %v3981_v47 = vrot.slane %v3965_v24, %v6361_v0  ;;  %v7721_v28 = vrot.slane %v3974_v54, %v6361_v0 }
 0x1b0   :  { %v1748_v58 = vmax.f32 %v1746_v14, %v1747_v62  ;;  %v5721_v6 = vpop.f32.mrf.mxu0  ;;  %v1755_v36 = vmax.f32 %v1753_v25, %v1754_v7  ;;  %v4004_v10 = vcombine.high %v3988_v55, %v3988_v55  ;;  %v7726_v41 = vmax.f32 %v7656_v44, %v1742_v45 }
 0x1b1   :  { %v4576_v46 = vcombine.low %v4568_v22, %v4575_v27  ;;  %v3923_v34 = vrot.slane %v3909_v17, %v6361_v0  ;;  %v3924_v57 = vcombine.high %v3916_v42, %v3916_v42  ;;  %v5087_v20 = vrot.slane %v5086_v59, 4 }
 0x1b2   :  { %8205 = vst [vmem:[#allocation5_spill] sm:$0xff] %v7726_v41  ;;  %v1749_v53 = vrot.slane %v1748_v58, 2  ;;  %v1756_v11 = vrot.slane %v1755_v36, 4  ;;  %v4655_v13 = vcombine.low %v3981_v47, %v3995_v5  ;;  %v5590_v12 = vcombine.high %v3981_v47, %v3995_v5 }
 0x1b3   :  { %v3908_v52 = vcombine.high %v7650_v26, %v7650_v26  ;;  %v3925_v60 = vcombine.high %v3923_v34, %v3923_v34  ;;  %v3932_v29 = vrot.slane %v3916_v42, %v6361_v0  ;;  %v7734_v21 = vsel %vm5057_vm10, %v7677_v4, -inf }
 0x1b4   :  { %v7736_v44 = vmax.f32 %v1755_v36, %v1756_v11  ;;  %v4657_v45 = vcombine.low %v3988_v55, %v7721_v28  ;;  %v7740_v27 = vrot.slane %v4004_v10, %v6361_v0  ;;  %v5780_v50 = vpop.f32.mrf.mxu1  ;;  %v3946_v15 = vrot.slane %v3924_v57, %v6361_v0 }
 0x1b5   :  { %v3953_v40 = vrot.slane %v3925_v60, %v6361_v0  ;;  %v3954_v26 = vcombine.high %v3932_v29, %v3932_v29  ;;  %v4592_v24 = vcombine.low %v3908_v52, %v3932_v29  ;;  %v7744_v31 = vmax.f32 %v5086_v59, %v5087_v20 }
 0x1b6   :  { %v7747_v14 = vsel %vm1697_vm8, %v4576_v46, -inf  ;;  %v7749_v4 = vmax.f32 %v1748_v58, %v1749_v53  ;;  %v7752_v43 = vrot.slane %v4655_v13, %v6361_v0  ;;  %v7755_v48 = vrot.slane %v5590_v12, %v6361_v0  ;;  %v3558_v9 = vpop.f32.mrf.mxu1 }
 0x1b7   :  { %v3939_v33 = vrot.slane %v3923_v34, %v6361_v0  ;;  %v3956_v37 = vcombine.high %v3946_v15, %v3946_v15  ;;  %v4593_v2 = vcombine.low %v3946_v15, %v3954_v26  ;;  %v7761_v32 = vrot.slane %v4657_v45, %v6361_v0 }
 0x1b8   :  { %v4716_v22 = vrot.slane %v7740_v27, %v6361_v0  ;;  %v4608_v59 = vrot.slane %v4592_v24, %v6361_v0  ;;  %v1072_v62 = vadd.f32 %v7471_v19, %v7701_v51  ;;  %v4601_v5 = vrot.slane %v7670_v56, %v6361_v0 }
 0x1b9   :  { %v4594_v55 = vcombine.low %v3956_v37, %v3939_v33  ;;  %v5589_v17 = vcombine.high %v3939_v33, %v3953_v40  ;;  %v4646_v25 = vrot.slane %v3953_v40, %v6361_v0  ;;  %v1077_v42 = vadd.f32 %v7471_v19, %v1076_v23 }
 0x1ba   :  { %v7758_v39 = vpop.f32.mrf.mxu0  ;;  %v1109_v7 = vmax.f32 %v1072_v62, 0.0  ;;  %v3564_v6 = vadd.f32 %v5780_v50, %v7484_v8  ;;  %v4615_v36 = vrot.slane %v4593_v2, %v6361_v0  ;;  %v1282_v47 = vcombine.high %v7694_v63, %v7694_v63 }
 0x1bb   :  { %v4622_v51 = vrot.slane %v4594_v55, %v6361_v0  ;;  %v3559_v10 = vadd.f32 %v7484_v8, %v3558_v9  ;;  %v4623_v56 = vcombine.low %v4601_v5, %v4608_v59  ;;  %v1110_v20 = vmax.f32 %v1077_v42, 0.0 }
 0x1bc   :  { %v5724_v58 = vpop.f32.mrf.mxu0  ;;  %v1283_v34 = vcombine.high %v1109_v7, %v1109_v7  ;;  %v1290_v57 = vrot.slane %v1109_v7, %v6344_v3  ;;  %v4687_v23 = vcombine.low %v7755_v48, %v7761_v32  ;;  %v4664_v11 = vrot.slane %v5589_v17, %v6361_v0 }
 0x1bd   :  { %v4624_v53 = vcombine.low %v4615_v36, %v4622_v51  ;;  %v3596_v13 = vmax.f32 %v3564_v6, 0.0  ;;  %v7786_v52 = vrot.slane %v4646_v25, %v6361_v0  ;;  %v1300_v29 = vcombine.high %v1110_v20, %v1110_v20 }
 0x1be   :  { %v7779_v46 = vpop.f32.mrf.mxu0  ;;  %v1297_v8 = vrot.slane %v1283_v34, %v6344_v3  ;;  %v1298_v63 = vcombine.high %v1290_v57, %v1290_v57  ;;  %v1553_v60 = vcombine.low %v1282_v47, %v1290_v57  ;;  %v1307_v45 = vrot.slane %v1110_v20, %v6344_v3 }
 0x1bf   :  { %v4056_v50 = vcombine.high %v3596_v13, %v3596_v13  ;;  %v3595_v15 = vmax.f32 %v3559_v10, 0.0  ;;  %v4631_v40 = vrot.slane %v4623_v56, %v6361_v0  ;;  %v4638_v26 = vrot.slane %v4624_v53, %v6361_v0 }
 0x1c0   :  { %v5727_v12 = vpop.f32.mrf.mxu0  ;;  %v1299_v24 = vcombine.high %v1297_v8, %v1297_v8  ;;  %v1554_v33 = vcombine.low %v1298_v63, %v1297_v8  ;;  %v4686_v37 = vcombine.low %v4664_v11, %v7752_v43  ;;  %v1314_v2 = vrot.slane %v1300_v29, %v6344_v3 }
 0x1c1   :  { %v1315_v59 = vcombine.high %v1307_v45, %v1307_v45  ;;  %v4063_v62 = vrot.slane %v3596_v13, %v6361_v0  ;;  %v1561_v9 = vrot.slane %v1553_v60, %v6344_v3  ;;  %v4070_v17 = vrot.slane %v4056_v50, %v6361_v0 }
 0x1c2   :  { %v1568_v55 = vrot.slane %v1554_v33, %v6344_v3  ;;  %v1576_v5 = vrot.slane %v1299_v24, %v6344_v3  ;;  %v1316_v58 = vcombine.high %v1314_v2, %v1314_v2  ;;  %v4007_v42 = vcombine.high %v3595_v15, %v3595_v15 }
 0x1c3   :  { %v1577_v25 = vcombine.low %v1307_v45, %v1315_v59  ;;  %v4071_v7 = vcombine.high %v4063_v62, %v4063_v62  ;;  %v4639_v6 = vcombine.low %v4631_v40, %v4638_v26  ;;  %v4072_v51 = vcombine.high %v4070_v17, %v4070_v17 }
 0x1c4   :  { %v1569_v36 = vcombine.low %v1561_v9, %v1568_v55  ;;  %v1763_v43 = vsel %vm1699_vm9, %v1576_v5, -inf  ;;  %v1578_v47 = vcombine.low %v1314_v2, %v1316_v58  ;;  %v4079_v56 = vrot.slane %v4063_v62, %v6361_v0 }
 0x1c5   :  { %v1585_v10 = vrot.slane %v1577_v25, %v6344_v3  ;;  %v4086_v34 = vrot.slane %v4070_v17, %v6361_v0  ;;  %v4093_v20 = vrot.slane %v4071_v7, %v6361_v0  ;;  %v4100_v53 = vrot.slane %v4072_v51, %v6361_v0 }
 0x1c6   :  { %v1762_v57 = vsel %vm1697_vm8, %v1569_v36, -inf  ;;  %v4014_v11 = vrot.slane %v3595_v15, %v6361_v0  ;;  %v1592_v8 = vrot.slane %v1578_v47, %v6344_v3  ;;  %v4021_v63 = vrot.slane %v4007_v42, %v6361_v0 }
 0x1c7   :  { %v7807_v12 = vmax.f32 %v1762_v57, %v1763_v43  ;;  %v1082_v60 = vadd.f32 %v7471_v19, %v7758_v39  ;;  %v4780_v29 = vcombine.low %v4079_v56, %v4093_v20  ;;  %v5591_v45 = vcombine.high %v4079_v56, %v4093_v20  ;;  %v5783_v19 = vpop.f32.mrf.mxu1 }
 0x1c8   :  { %v1091_v13 = vpop.f32.mrf.mxu0  ;;  %v4782_v50 = vcombine.low %v4086_v34, %v4100_v53  ;;  %v5592_v40 = vcombine.high %v4086_v34, %v4100_v53  ;;  %v7814_v24 = vrot.slane %v4686_v37, %v6361_v0  ;;  %v5102_v15 = vsel %vm1697_vm8, %v4639_v6, -inf }
 0x1c9   :  { %v4022_v33 = vcombine.high %v4014_v11, %v4014_v11  ;;  %v4023_v2 = vcombine.high %v4021_v63, %v4021_v63  ;;  %v1593_v59 = vcombine.low %v1585_v10, %v1592_v8  ;;  %v4790_v62 = vrot.slane %v4780_v29, %v6361_v0 }
 0x1ca   :  { %v5730_v26 = vpop.f32.mrf.mxu0  ;;  %v4797_v9 = vrot.slane %v5591_v45, %v6361_v0  ;;  %v4804_v55 = vrot.slane %v4782_v50, %v6361_v0  ;;  %v4811_v39 = vrot.slane %v5592_v40, %v6361_v0  ;;  %v4030_v5 = vrot.slane %v4014_v11, %v6361_v0 }
 0x1cb   :  { %v4037_v17 = vrot.slane %v4021_v63, %v6361_v0  ;;  %v4044_v37 = vrot.slane %v4022_v33, %v6361_v0  ;;  %v7830_v25 = vrot.slane %v4687_v23, %v6361_v0  ;;  %v7836_v7 = vsel %vm5057_vm10, %v4716_v22, -inf  ;;  %v3568_v23 = vpop.f32.mrf.mxu1 }
 0x1cc   :  { %v7839_v42 = vrot.slane %v4023_v2, %v6361_v0  ;;  %v1111_v6 = vmax.f32 %v1082_v60, 0.0  ;;  %v5103_v36 = vsel %vm5057_vm10, %v7786_v52, -inf  ;;  %v4812_v43 = vcombine.low %v4790_v62, %v4797_v9 }
 0x1cd   :  { %v4052_v51 = vcombine.high %v4030_v5, %v4030_v5  ;;  %v4054_v47 = vcombine.high %v4044_v37, %v4044_v37  ;;  %v7845_v32 = vmax.f32 %v5102_v15, %v5103_v36  ;;  %v4006_v27 = vcombine.high %v7721_v28, %v7721_v28  ;;  %v7860_v28 = vld [vmem:[%s8196_s2] ss:$0 sm:$0xff] }
 0x1ce   :  { %v7824_v58 = vpop.f32.mrf.mxu0  ;;  %v1317_v22 = vcombine.high %v1111_v6, %v1111_v6  ;;  %v4813_v34 = vcombine.low %v4804_v55, %v4811_v39  ;;  %v4053_v57 = vcombine.high %v4037_v17, %v4037_v17  ;;  %v1771_v52 = vsel %vm1697_vm8, %v1593_v59, -inf  ;;  %v7882_v39 = vld [vmem:[%s8198_s4] ss:$0 sm:$0xff] }
 0x1cf   :  { %v4055_v53 = vcombine.high %v7839_v42, %v7839_v42  ;;  %v1324_v11 = vrot.slane %v1111_v6, %v6344_v3  ;;  %v1087_v63 = vadd.f32 %v7860_v28, %v7779_v46  ;;  %v7867_v29 = vrot.slane %v4812_v43, %v6361_v0 }
 0x1d0   :  { %v5733_v10 = vpop.f32.mrf.mxu0  ;;  %v1331_v8 = vrot.slane %v1317_v22, %v6344_v3  ;;  %v4717_v45 = vcombine.low %v4006_v27, %v4030_v5  ;;  %v4718_v50 = vcombine.low %v4044_v37, %v4052_v51  ;;  %v7869_v40 = vcombine.low %v4054_v47, %v4037_v17 }
 0x1d1   :  { %v1332_v15 = vcombine.high %v1324_v11, %v1324_v11  ;;  %v1600_v33 = vrot.slane %v1324_v11, %v6344_v3  ;;  %v1112_v2 = vmax.f32 %v1087_v63, 0.0  ;;  %v7875_v9 = vrot.slane %v4813_v34, %v6361_v0 }
 0x1d2   :  { %v7851_v20 = vpop.f32.mrf.mxu0  ;;  %v1333_v59 = vcombine.high %v1331_v8, %v1331_v8  ;;  %v4720_v46 = vcombine.low %v7839_v42, %v4053_v57  ;;  %v1092_v55 = vadd.f32 %v7860_v28, %v1091_v13  ;;  %v3574_v5 = vadd.f32 %v7882_v39, %v5783_v19 }
 0x1d3   :  { %v7864_v60 = vpop.f32.mrf.mxu1  ;;  %v1601_v37 = vcombine.low %v1332_v15, %v1331_v8  ;;  %v1772_v6 = vsel %vm1699_vm9, %v1600_v33, -inf  ;;  %v1334_v36 = vcombine.high %v1112_v2, %v1112_v2  ;;  %v1341_v43 = vrot.slane %v1112_v2, %v6344_v3 }
 0x1d4   :  { %v5353_v26 = vpop.f32.mrf.mxu0  ;;  %v4727_v42 = vrot.slane %v4717_v45, %v6361_v0  ;;  %v4734_v13 = vrot.slane %v4718_v50, %v6361_v0  ;;  %v1773_v47 = vmax.f32 %v1771_v52, %v1772_v6  ;;  %v1113_v10 = vmax.f32 %v1092_v55, 0.0 }
 0x1d5   :  { %v7872_v62 = vpop.f32.mrf.mxu1  ;;  %v4741_v19 = vrot.slane %v7869_v40, %v6361_v0  ;;  %v1348_v22 = vrot.slane %v1334_v36, %v6344_v3  ;;  %v1349_v34 = vcombine.high %v1341_v43, %v1341_v43  ;;  %v1602_v57 = vcombine.low %v1333_v59, %v1341_v43 }
 0x1d6   :  { %v7885_v17 = vpop.f32.mrf.mxu0  ;;  %v1609_v8 = vrot.slane %v1601_v37, %v6344_v3  ;;  %v1774_v63 = vrot.slane %v1773_v47, 4  ;;  %v1351_v26 = vcombine.high %v1113_v10, %v1113_v10  ;;  %v1358_v15 = vrot.slane %v1113_v10, %v6344_v3 }
 0x1d7   :  { %v7889_v51 = vpop.f32.mrf.mxu1  ;;  %v1350_v50 = vcombine.high %v1348_v22, %v1348_v22  ;;  %v1616_v52 = vrot.slane %v1602_v57, %v6344_v3  ;;  %v1624_v33 = vrot.slane %v1349_v34, %v6344_v3  ;;  %v3598_v2 = vmax.f32 %v3574_v5, 0.0 }
 0x1d8   :  { %v5358_v27 = vpop.f32.mrf.mxu0  ;;  %v4748_v55 = vrot.slane %v4720_v46, %v6361_v0  ;;  %v7906_v59 = vrot.slane %v1351_v26, %v6344_v3  ;;  %v1366_v37 = vcombine.high %v1358_v15, %v1358_v15  ;;  %v3569_v6 = vadd.f32 %v7882_v39, %v3568_v23 }
 0x1d9   :  { %v5373_v11 = vpop.f32.mrf.mxu1  ;;  %v1775_v43 = vmax.f32 %v1773_v47, %v1774_v63  ;;  %v1617_v10 = vcombine.low %v1609_v8, %v1616_v52  ;;  %v1625_v27 = vcombine.low %v1348_v22, %v1350_v50  ;;  %v4749_v57 = vcombine.low %v4727_v42, %v4734_v13 }
 0x1da   :  { %v7898_v45 = vpop.f32.mrf.mxu0  ;;  %v4154_v11 = vcombine.high %v3598_v2, %v3598_v2  ;;  %v7910_v34 = vrot.slane %v4055_v53, %v6361_v0  ;;  %v1626_v5 = vcombine.low %v1358_v15, %v1366_v37  ;;  %v4161_v54 = vrot.slane %v3598_v2, %v6361_v0 }
 0x1db   :  { %v7902_v40 = vpop.f32.mrf.mxu1  ;;  %v1780_v26 = vsel %vm1697_vm8, %v1617_v10, -inf  ;;  %v1781_v48 = vsel %vm1699_vm9, %v1624_v33, -inf  ;;  %v3597_v47 = vmax.f32 %v3569_v6, 0.0  ;;  %v1648_v13 = vrot.slane %v7906_v59, %v6344_v3 }
 0x1dc   :  { %v5363_v36 = vpop.f32.mrf.mxu0  ;;  %v4168_v23 = vrot.slane %v4154_v11, %v6361_v0  ;;  %v1782_v42 = vmax.f32 %v1780_v26, %v1781_v48  ;;  %v1640_v53 = vrot.slane %v1626_v5, %v6344_v3  ;;  %v4750_v63 = vcombine.low %v4741_v19, %v4748_v55 }
 0x1dd   :  { %v5378_v56 = vpop.f32.mrf.mxu1  ;;  %v1776_v15 = vrot.slane %v1775_v43, 2  ;;  %v4169_v50 = vcombine.high %v4161_v54, %v4161_v54  ;;  %v4177_v6 = vrot.slane %v4161_v54, %v6361_v0  ;;  %v4105_v36 = vcombine.high %v3597_v47, %v3597_v47 }
 0x1de   :  { %v7913_v46 = vpop.f32.mrf.mxu0  ;;  %v1633_v56 = vrot.slane %v1625_v27, %v6344_v3  ;;  %v4170_v52 = vcombine.high %v4168_v23, %v4168_v23  ;;  %v1783_v33 = vrot.slane %v1782_v42, 4  ;;  %v4184_v10 = vrot.slane %v4168_v23, %v6361_v0 }
 0x1df   :  { %v7918_v8 = vpop.f32.mrf.mxu1  ;;  %v4191_v48 = vrot.slane %v4169_v50, %v6361_v0  ;;  %v4112_v11 = vrot.slane %v3597_v47, %v6361_v0  ;;  %v1790_v26 = vsel %vm1699_vm9, %v1648_v13, -inf  ;;  %v4764_v47 = vrot.slane %v4750_v63, %v6361_v0 }
 0x1e0   :  { %v5368_v22 = vpop.f32.mrf.mxu0  ;;  %v1641_v37 = vcombine.low %v1633_v56, %v1640_v53  ;;  %v4198_v27 = vrot.slane %v4170_v52, %v6361_v0  ;;  %v1784_v19 = vmax.f32 %v1782_v42, %v1783_v33  ;;  %v4119_v56 = vrot.slane %v4105_v36, %v6361_v0 }
 0x1e1   :  { %v5383_v2 = vpop.f32.mrf.mxu1  ;;  %v5593_v23 = vcombine.high %v4177_v6, %v4191_v48  ;;  %v4757_v52 = vrot.slane %v4749_v57, %v6361_v0  ;;  %v7938_v42 = vmax.f32 %v1775_v43, %v1776_v15  ;;  %v4128_v57 = vrot.slane %v4112_v11, %v6361_v0 }
 0x1e2   :  { %v1789_v55 = vsel %vm1697_vm8, %v1641_v37, -inf  ;;  %v4907_v22 = vcombine.low %v4184_v10, %v4198_v27  ;;  %v4120_v2 = vcombine.high %v4112_v11, %v4112_v11  ;;  %v4121_v49 = vcombine.high %v4119_v56, %v4119_v56 }
 0x1e3   :  { %v7929_v5 = vpop.f32.mrf.mxu1  ;;  %v1791_v53 = vmax.f32 %v1789_v55, %v1790_v26  ;;  %8206 = vst [vmem:[#allocation6_spill] sm:$0xff] %v7938_v42  ;;  %v4916_v33 = vrot.slane %v5593_v23, %v6361_v0  ;;  %v1097_v37 = vadd.f32 %v7860_v28, %v7824_v58  ;;  %v1785_v55 = vrot.slane %v1784_v19, 2  ;;  %v7955_v28 = vld [vmem:[%s8200_s6] ss:$0 sm:$0xff]  ;;  %s5893_s6 = smov 8  }
 0x1e4   :  { %v4923_v13 = vrot.slane %v4907_v22, %v6361_v0  ;;  %v4898_v26 = vrot.slane %v4191_v48, %v6361_v0  ;;  %v4135_v63 = vrot.slane %v4119_v56, %v6361_v0  ;;  %v5594_v54 = vcombine.high %v4184_v10, %v4198_v27 }
 0x1e5   :  { %v5388_v50 = vpop.f32.mrf.mxu1  ;;  %v4142_v15 = vrot.slane %v4120_v2, %v6361_v0  ;;  %v4149_v22 = vrot.slane %v4121_v49, %v6361_v0  ;;  %v4150_v30 = vcombine.high %v4128_v57, %v4128_v57  ;;  %v4835_v58 = vrot.slane %v4128_v57, %v6361_v0 }
 0x1e6   :  { %v1792_v50 = vrot.slane %v1791_v53, 4  ;;  %v4938_v43 = vcombine.low %v4916_v33, %v4923_v13  ;;  %v4151_v41 = vcombine.high %v4135_v63, %v4135_v63  ;;  %v7957_v48 = vcombine.low %v4757_v52, %v4764_v47 }
 0x1e7   :  { %v7944_v36 = vpop.f32.mrf.mxu1  ;;  %v4152_v10 = vcombine.high %v4142_v15, %v4142_v15  ;;  %v4828_v27 = vcombine.low %v7867_v29, %v7875_v9  ;;  %v7964_v49 = vmax.f32 %v1784_v19, %v1785_v55  ;;  %v7967_v2 = vrot.slane %v4898_v26, %v6361_v0 }
 0x1e8   :  { %v4153_v33 = vcombine.high %v4149_v22, %v4149_v22  ;;  %v4842_v13 = vrot.slane %v4835_v58, %v6361_v0  ;;  %v7971_v57 = vrot.slane %v5594_v54, %v6361_v0  ;;  %v1114_v47 = vmax.f32 %v1097_v37, 0.0 }
 0x1e9   :  { %v5393_v23 = vpop.f32.mrf.mxu1  ;;  %8207 = vst [vmem:[#allocation7_spill] sm:$0xff] %v7964_v49  ;;  %v4844_v52 = vcombine.low %v4152_v10, %v4135_v63  ;;  %v7975_v29 = vmax.f32 %v1791_v53, %v1792_v50  ;;  %v7978_v9 = vrot.slane %v4938_v43, %v6361_v0  ;;  %v4843_v19 = vcombine.low %v4142_v15, %v4150_v30 }
 0x1ea   :  { %v5352_v23 = vadd.f32 %v7955_v28, %v7851_v20  ;;  %v4845_v55 = vcombine.low %v4149_v22, %v4151_v41  ;;  %v4846_v26 = vcombine.low %v4153_v33, %v4177_v6  ;;  %v1367_v58 = vcombine.high %v7906_v59, %v7906_v59 }
 0x1eb   :  { %v7962_v56 = vpop.f32.mrf.mxu1  ;;  %v1368_v42 = vcombine.high %v1114_v47, %v1114_v47  ;;  %v1375_v54 = vrot.slane %v1114_v47, %v6344_v3  ;;  %v4860_v37 = vrot.slane %v4844_v52, %v6361_v0  ;;  %v5130_v20 = vsel %vm5057_vm10, %v4842_v13, -inf }
 0x1ec   :  { %v5410_v53 = vmax.f32 %v5352_v23, 0.0  ;;  %v3584_v50 = vadd.f32 %v7882_v39, %v7864_v60  ;;  %v5129_v30 = vsel %vm1697_vm8, %v4828_v27, -inf  ;;  %v3579_v59 = vadd.f32 %v7882_v39, %v7872_v62 }
 0x1ed   :  { %v5398_v11 = vpop.f32.mrf.mxu1  ;;  %v1382_v41 = vrot.slane %v1368_v42, %v6344_v3  ;;  %v1383_v6 = vcombine.high %v1375_v54, %v1375_v54  ;;  %v4853_v15 = vrot.slane %v4843_v19, %v6361_v0  ;;  %v1649_v22 = vcombine.low %v1367_v58, %v1375_v54 }
 0x1ee   :  { %v5422_v11 = vsel %vm1697_vm8, %v5410_v53, -inf  ;;  %v3600_v10 = vmax.f32 %v3584_v50, 0.0  ;;  %v4867_v33 = vrot.slane %v4845_v55, %v6361_v0  ;;  %v5131_v13 = vmax.f32 %v5129_v30, %v5130_v20 }
 0x1ef   :  { %v7983_v63 = vpop.f32.mrf.mxu1  ;;  %v1384_v52 = vcombine.high %v1382_v41, %v1382_v41  ;;  %v1650_v60 = vcombine.low %v1383_v6, %v1382_v41  ;;  %v4874_v42 = vrot.slane %v4846_v26, %v6361_v0  ;;  %v4875_v27 = vcombine.low %v4853_v15, %v4860_v37 }
 0x1f0   :  { %v5423_v23 = vrot.slane %v5422_v11, 4  ;;  %v4258_v62 = vrot.slane %v3600_v10, %v6361_v0  ;;  %v1657_v39 = vrot.slane %v1649_v22, %v6344_v3  ;;  %v3599_v54 = vmax.f32 %v3579_v59, 0.0 }
 0x1f1   :  { %v5403_v43 = vpop.f32.mrf.mxu1  ;;  %v1664_v19 = vrot.slane %v1650_v60, %v6344_v3  ;;  %v1672_v58 = vrot.slane %v1384_v52, %v6344_v3  ;;  %v5357_v30 = vadd.f32 %v7955_v28, %v7885_v17  ;;  %v5132_v26 = vrot.slane %v5131_v13, 4 }
 0x1f2   :  { %v5424_v55 = vmax.f32 %v5422_v11, %v5423_v23  ;;  %v4259_v20 = vcombine.high %v4258_v62, %v4258_v62  ;;  %v4266_v50 = vrot.slane %v4258_v62, %v6361_v0  ;;  %v4203_v41 = vcombine.high %v3599_v54, %v3599_v54 }
 0x1f3   :  { %v7996_v47 = vpop.f32.mrf.mxu1  ;;  %v1665_v37 = vcombine.low %v1657_v39, %v1664_v19  ;;  %v4210_v6 = vrot.slane %v3599_v54, %v6361_v0  ;;  %v4876_v43 = vcombine.low %v4867_v33, %v4874_v42  ;;  %v1799_v15 = vsel %vm1699_vm9, %v1672_v58, -inf }
 0x1f4   :  { %v5425_v22 = vrot.slane %v5424_v55, 2  ;;  %v4273_v3 = vrot.slane %v4259_v20, %v6361_v0  ;;  %v4217_v11 = vrot.slane %v4203_v41, %v6361_v0  ;;  %v4274_v23 = vcombine.high %v4266_v50, %v4266_v50 }
 0x1f5   :  { %v5408_v53 = vpop.f32.mrf.mxu1  ;;  %v1798_v59 = vsel %vm1697_vm8, %v1665_v37, -inf  ;;  %v4218_v10 = vcombine.high %v4210_v6, %v4210_v6  ;;  %v4226_v52 = vrot.slane %v4210_v6, %v6361_v0  ;;  %v5411_v62 = vmax.f32 %v5357_v30, 0.0 }
 0x1f6   :  { %v8012_v60 = vmax.f32 %v1798_v59, %v1799_v15  ;;  %v5426_v17 = vmax.f32 %v5424_v55, %v5425_v22  ;;  %v4219_v39 = vcombine.high %v4217_v11, %v4217_v11  ;;  %v4233_v33 = vrot.slane %v4217_v11, %v6361_v0 }
 0x1f7   :  { %v4240_v42 = vrot.slane %v4218_v10, %v6361_v0  ;;  %v4248_v19 = vcombine.high %v4226_v52, %v4226_v52  ;;  %v4883_v58 = vrot.slane %v4875_v27, %v6361_v0  ;;  %v4890_v54 = vrot.slane %v4876_v43, %v6361_v0 }
 0x1f8   :  { %v8018_v53 = vmax.f32 %v5131_v13, %v5132_v26  ;;  %v4275_v20 = vcombine.high %v4273_v3, %v4273_v3  ;;  %v4247_v37 = vrot.slane %v4219_v39, %v6361_v0  ;;  %v4249_v41 = vcombine.high %v4233_v33, %v4233_v33 }
 0x1f9   :  { %v4250_v6 = vcombine.high %v4240_v42, %v4240_v42  ;;  %v4909_v55 = vcombine.low %v4226_v52, %v4240_v42  ;;  %v5427_v15 = vrot.slane %v5426_v17, 1  ;;  %v4972_v30 = vcombine.low %v4273_v3, %v4274_v23 }
 0x1fa   :  { %v4961_v22 = vrot.slane %v4248_v19, %v6361_v0  ;;  %v5429_v59 = vsel %vm1697_vm8, %v5411_v62, -inf  ;;  %v4251_v11 = vcombine.high %v4247_v37, %v4247_v37  ;;  %v4970_v49 = vcombine.low %v4247_v37, %v4249_v41 }
 0x1fb   :  { %v4937_v10 = vrot.slane %v4909_v55, %v6361_v0  ;;  %v4969_v27 = vcombine.low %v4250_v6, %v4233_v33  ;;  %v5430_v26 = vrot.slane %v5429_v59, 4  ;;  %v5372_v43 = vadd.f32 %v7955_v28, %v7889_v51 }
 0x1fc   :  { %v4968_v13 = vrot.slane %v4961_v22, %v6361_v0  ;;  %v5362_v52 = vadd.f32 %v7955_v28, %v7898_v45  ;;  %v4971_v23 = vcombine.low %v4251_v11, %v4266_v50  ;;  %v4986_v62 = vrot.slane %v4970_v49, %v6361_v0 }
 0x1fd   :  { %v4939_v3 = vcombine.low %v7971_v57, %v4937_v10  ;;  %v4979_v39 = vrot.slane %v4969_v27, %v6361_v0  ;;  %v8032_v42 = vcombine.low %v4883_v58, %v4890_v54  ;;  %v5431_v33 = vmax.f32 %v5429_v59, %v5430_v26 }
 0x1fe   :  { %v5414_v19 = vmax.f32 %v5372_v43, 0.0  ;;  %v5412_v37 = vmax.f32 %v5362_v52, 0.0  ;;  %v5000_v41 = vrot.slane %v4972_v30, %v6361_v0  ;;  %v8036_v6 = vrot.slane %v4275_v20, %v6361_v0 }
 0x1ff   :  { %v4953_v51 = vrot.slane %v4939_v3, %v6361_v0  ;;  %v5377_v45 = vadd.f32 %v7955_v28, %v7902_v40  ;;  %v4993_v57 = vrot.slane %v4971_v23, %v6361_v0  ;;  %v5432_v50 = vrot.slane %v5431_v33, 2 }
 0x200   :  { %v5450_v49 = vsel %vm1697_vm8, %v5414_v19, -inf  ;;  %v5436_v58 = vsel %vm1697_vm8, %v5412_v37, -inf  ;;  %v5428_v54 = vmax.f32 %v5426_v17, %v5427_v15  ;;  %v8044_v55 = vcombine.low %v4979_v39, %v4986_v62 }
 0x201   :  { %v5148_v30 = vsel %vm5057_vm10, %v4968_v13, -inf  ;;  %v5451_v22 = vrot.slane %v5450_v49, 4  ;;  %v4954_v20 = vcombine.low %v7978_v9, %v4953_v51  ;;  %v5433_v59 = vmax.f32 %v5431_v33, %v5432_v50 }
 0x202   :  { %v5437_v11 = vrot.slane %v5436_v58, 4  ;;  %v5415_v10 = vmax.f32 %v5377_v45, 0.0  ;;  %v8208_v40 = vrot.slane %v7592_v16, 1  ;;  %v5080_v43 = vrot.slane %v7661_v38, 2 }
 0x203   :  { %v5452_v27 = vmax.f32 %v5450_v49, %v5451_v22  ;;  %v5089_v52 = vrot.slane %v7744_v31, 2  ;;  %v8053_v17 = vcombine.low %v4993_v57, %v5000_v41  ;;  %v5434_v15 = vrot.slane %v5433_v59, 1 }
 0x204   :  { %v5065_v26 = vmax.f32 %v7592_v16, %v8208_v40  ;;  %v5438_v3 = vmax.f32 %v5436_v58, %v5437_v11  ;;  %v5457_v13 = vsel %vm1697_vm8, %v5415_v10, -inf  ;;  %v5081_v39 = vmax.f32 %v7661_v38, %v5080_v43 }
 0x205   :  { %v5453_v23 = vrot.slane %v5452_v27, 2  ;;  %v5458_v9 = vrot.slane %v5457_v13, 4  ;;  %v5090_v62 = vmax.f32 %v7744_v31, %v5089_v52  ;;  %v5147_v33 = vsel %vm1697_vm8, %v4954_v20, -inf }
 0x206   :  { %v5439_v16 = vrot.slane %v5438_v3, 2  ;;  %v5095_v19 = vmax.f32 %v7747_v14, %v7734_v21  ;;  %v5105_v37 = vrot.slane %v7845_v32, 4  ;;  %v5009_v41 = vrot.slane %v8044_v55, %v6361_v0 }
 0x207   :  { %v5459_v51 = vmax.f32 %v5457_v13, %v5458_v9  ;;  %v5082_v45 = vrot.slane %v5081_v39, 1  ;;  %v5091_v57 = vrot.slane %v5090_v62, 1  ;;  %v5435_v50 = vmax.f32 %v5433_v59, %v5434_v15 }
 0x208   :  { %v5440_v49 = vmax.f32 %v5438_v3, %v5439_v16  ;;  %v5096_v38 = vrot.slane %v5095_v19, 4  ;;  %v5106_v31 = vmax.f32 %v7845_v32, %v5105_v37  ;;  %v8065_v58 = vmax.f32 %v5147_v33, %v5148_v30 }
 0x209   :  { %v8067_v22 = vmax.f32 %v5452_v27, %v5453_v23  ;;  %v5460_v20 = vrot.slane %v5459_v51, 2  ;;  %v8209_v21 = vrot.slane %v7666_v1, 1  ;;  %v5083_v11 = vmax.f32 %v5081_v39, %v5082_v45 }
 0x20a   :  { %v5097_v10 = vmax.f32 %v5095_v19, %v5096_v38  ;;  %v5107_v40 = vrot.slane %v5106_v31, 2  ;;  %v8210_v43 = vcombine.low %v7814_v24, %v7830_v25  ;;  %v5441_v52 = vrot.slane %v5440_v49, 1 }
 0x20b   :  { %v5074_v14 = vmax.f32 %v7666_v1, %v8209_v21  ;;  %v5092_v32 = vmax.f32 %v5090_v62, %v5091_v57  ;;  %v5120_v27 = vsel %vm1697_vm8, %v7957_v48, -inf  ;;  %v8080_v15 = vsel %vm1819_vm11, %v5435_v50, %v5428_v54 }
 0x20c   :  { %v5111_v59 = vsel %vm1697_vm8, %v8210_v43, -inf  ;;  %v5098_v1 = vrot.slane %v5097_v10, 2  ;;  %v5108_v3 = vmax.f32 %v5106_v31, %v5107_v40  ;;  %v8211_v13 = vrot.slane %v7910_v34, %v6361_v0 }
 0x20d   :  { %v5113_v30 = vmax.f32 %v5111_v59, %v7836_v7  ;;  %v5455_v25 = vrot.slane %v8067_v22, 1  ;;  %v5177_v7 = vsel %vm1819_vm11, %v5074_v14, %v5065_v26  ;;  %v8088_v39 = vmax.f32 %v5459_v51, %v5460_v20 }
 0x20e   :  { %v5121_v24 = vsel %vm5057_vm10, %v8211_v13, -inf  ;;  %v5099_v48 = vmax.f32 %v5097_v10, %v5098_v1  ;;  %v5109_v62 = vrot.slane %v5108_v3, 1  ;;  %v5178_v54 = vsel %vm1821_vm12, %v5083_v11, %v5177_v7 }
 0x20f   :  { %v5114_v23 = vrot.slane %v5113_v30, 4  ;;  %v5122_v9 = vmax.f32 %v5120_v27, %v5121_v24  ;;  %v8091_v33 = vmax.f32 %v5440_v49, %v5441_v52  ;;  %v5179_v34 = vsel %vm1823_vm13, %v5092_v32, %v5178_v54 }
 0x210   :  { %v5100_v37 = vrot.slane %v5099_v48, 1  ;;  %v5110_v45 = vmax.f32 %v5108_v3, %v5109_v62  ;;  %v5367_v57 = vadd.f32 %v7955_v28, %v7913_v46  ;;  %v5382_v26 = vadd.f32 %v7955_v28, %v7918_v8 }
 0x211   :  { %v5115_v16 = vmax.f32 %v5113_v30, %v5114_v23  ;;  %v5123_v19 = vrot.slane %v5122_v9, 4  ;;  %v5387_v38 = vadd.f32 %v7955_v28, %v7929_v5  ;;  %v5392_v49 = vadd.f32 %v7955_v28, %v7944_v36 }
 0x212   :  { %v5101_v31 = vmax.f32 %v5099_v48, %v5100_v37  ;;  %v5413_v20 = vmax.f32 %v5367_v57, 0.0  ;;  %v5416_v21 = vmax.f32 %v5382_v26, 0.0  ;;  %v5397_v14 = vadd.f32 %v7955_v28, %v7962_v56 }
 0x213   :  { %v5116_v51 = vrot.slane %v5115_v16, 2  ;;  %v5124_v50 = vmax.f32 %v5122_v9, %v5123_v19  ;;  %v5417_v10 = vmax.f32 %v5387_v38, 0.0  ;;  %v5418_v40 = vmax.f32 %v5392_v49, 0.0 }
 0x214   :  { %v5180_v8 = vsel %vm1825_vm14, %v5101_v31, %v5179_v34  ;;  %v5443_v43 = vsel %vm1697_vm8, %v5413_v20, -inf  ;;  %v5464_v5 = vsel %vm1697_vm8, %v5416_v21, -inf  ;;  %v5419_v59 = vmax.f32 %v5397_v14, 0.0 }
 0x215   :  { %v5117_v11 = vmax.f32 %v5115_v16, %v5116_v51  ;;  %v5125_v46 = vrot.slane %v5124_v50, 2  ;;  %v5181_v32 = vsel %vm1827_vm15, %v5110_v45, %v5180_v8  ;;  %v5444_v30 = vrot.slane %v5443_v43, 4 }
 0x216   :  { %v5465_v27 = vrot.slane %v5464_v5, 4  ;;  %v5471_v1 = vsel %vm1697_vm8, %v5417_v10, -inf  ;;  %v5478_v56 = vsel %vm1697_vm8, %v5418_v40, -inf  ;;  %v5485_v3 = vsel %vm1697_vm8, %v5419_v59, -inf }
 0x217   :  { %v5118_v52 = vrot.slane %v5117_v11, 1  ;;  %v5126_v36 = vmax.f32 %v5124_v50, %v5125_v46  ;;  %v5445_v23 = vmax.f32 %v5443_v43, %v5444_v30  ;;  %v5472_v9 = vrot.slane %v5471_v1, 4 }
 0x218   :  { %v5466_v7 = vmax.f32 %v5464_v5, %v5465_v27  ;;  %v5479_v48 = vrot.slane %v5478_v56, 4  ;;  %v5486_v62 = vrot.slane %v5485_v3, 4  ;;  %v5402_v54 = vadd.f32 %v7955_v28, %v7983_v63 }
 0x219   :  { %v5119_v13 = vmax.f32 %v5117_v11, %v5118_v52  ;;  %v5127_v24 = vrot.slane %v5126_v36, 1  ;;  %v5446_v34 = vrot.slane %v5445_v23, 2  ;;  %v5473_v37 = vmax.f32 %v5471_v1, %v5472_v9 }
 0x21a   :  { %v5467_v45 = vrot.slane %v5466_v7, 2  ;;  %v5480_v57 = vmax.f32 %v5478_v56, %v5479_v48  ;;  %v5487_v26 = vmax.f32 %v5485_v3, %v5486_v62  ;;  %v5420_v51 = vmax.f32 %v5402_v54, 0.0 }
 0x21b   :  { %v5128_v16 = vmax.f32 %v5126_v36, %v5127_v24  ;;  %v5182_v19 = vsel %vm1829_vm0, %v5119_v13, %v5181_v32  ;;  %v5447_v38 = vmax.f32 %v5445_v23, %v5446_v34  ;;  %v5474_v49 = vrot.slane %v5473_v37, 2 }
 0x21c   :  { %v5407_v31 = vadd.f32 %v7955_v28, %v7996_v47  ;;  %v5462_v20 = vrot.slane %v8088_v39, 1  ;;  %v5468_v63 = vmax.f32 %v5466_v7, %v5467_v45  ;;  %v5481_v21 = vrot.slane %v5480_v57, 2 }
 0x21d   :  { %v5183_v50 = vsel %vm1831_vm1, %v5128_v16, %v5182_v19  ;;  %v5492_v14 = vsel %vm1697_vm8, %v5420_v51, -inf  ;;  %v5448_v11 = vrot.slane %v5447_v38, 1  ;;  %v5475_v46 = vmax.f32 %v5473_v37, %v5474_v49 }
 0x21e   :  { %5187 = vrot.lane.b32.xlu0 %v5183_v50, %s5893_s6  ;;  %v5493_v10 = vrot.slane %v5492_v14, 4  ;;  %v5421_v40 = vmax.f32 %v5407_v31, 0.0  ;;  %v5456_v8 = vmax.f32 %v8067_v22, %v5455_v25  ;;  %v5469_v43 = vrot.slane %v5468_v63, 1 }
 0x21f   :  { %v5488_v5 = vrot.slane %v5487_v26, 2  ;;  %v5016_v28 = vrot.slane %v8053_v17, %v6361_v0  ;;  %v5449_v47 = vmax.f32 %v5447_v38, %v5448_v11  ;;  %v5476_v59 = vrot.slane %v5475_v46, 1 }
 0x220   :  { %v5494_v52 = vmax.f32 %v5492_v14, %v5493_v10  ;;  %v5499_v36 = vsel %vm1697_vm8, %v5421_v40, -inf  ;;  %v5519_v32 = vsel %vm1821_vm12, %v8091_v33, %v8080_v15  ;;  %v5463_v30 = vmax.f32 %v8088_v39, %v5462_v20 }
 0x221   :  { %v5482_v27 = vmax.f32 %v5480_v57, %v5481_v21  ;;  %v5500_v1 = vrot.slane %v5499_v36, 4  ;;  %v5477_v22 = vmax.f32 %v5475_v46, %v5476_v59  ;;  %v5520_v25 = vsel %vm1823_vm13, %v5449_v47, %v5519_v32 }
 0x222   :  { %v5495_v56 = vrot.slane %v5494_v52, 2  ;;  %v5017_v17 = vcombine.low %v5009_v41, %v5016_v28  ;;  %v5031_v3 = vrot.slane %v8036_v6, %v6361_v0  ;;  %v5470_v13 = vmax.f32 %v5468_v63, %v5469_v43 }
 0x223   :  { %v5501_v24 = vmax.f32 %v5499_v36, %v5500_v1  ;;  %v5521_v23 = vsel %vm1825_vm14, %v5456_v8, %v5520_v25  ;;  %v5139_v15 = vsel %vm5057_vm10, %v7967_v2, -inf  ;;  %v5489_v39 = vmax.f32 %v5487_v26, %v5488_v5 }
 0x224   :  { %v5522_v33 = vsel %vm1827_vm15, %v5463_v30, %v5521_v23  ;;  %v5138_v9 = vsel %vm1697_vm8, %v8032_v42, -inf  ;;  %v5134_v55 = vrot.slane %v8018_v53, 2  ;;  %v5150_v0 = vrot.slane %v8065_v58, 4 }
 0x225   :  { %v5523_v7 = vsel %vm1829_vm0, %v5470_v13, %v5522_v33  ;;  %v5140_v41 = vmax.f32 %v5138_v9, %v5139_v15  ;;  %v5483_v6 = vrot.slane %v5482_v27, 1  ;;  %v5496_v48 = vmax.f32 %v5494_v52, %v5495_v56  ;;  %v8216_v33 = vld [vmem:[#allocation6_spill] sm:$0xff] }
 0x226   :  { %v5524_v62 = vsel %vm1831_vm1, %v5477_v22, %v5523_v7  ;;  %v5156_v54 = vsel %vm1697_vm8, %v5017_v17, -inf  ;;  %v5502_v2 = vrot.slane %v5501_v24, 2  ;;  %v5151_v42 = vmax.f32 %v8065_v58, %v5150_v0 }
 0x227   :  { %5528 = vrot.lane.b32.xlu0 %v5524_v62, %s5894_s18  ;;  %v5141_v16 = vrot.slane %v5140_v41, 4  ;;  %v5157_v19 = vsel %vm5057_vm10, %v5031_v3, -inf  ;;  %v1794_v34 = vrot.slane %v7975_v29, 2  ;;  %v1801_v37 = vrot.slane %v8012_v60, 4  ;;  %v8215_v3 = vld [vmem:[#allocation7_spill] sm:$0xff] }
 0x228   :  { %v5490_v45 = vrot.slane %v5489_v39, 1  ;;  %v5158_v57 = vmax.f32 %v5156_v54, %v5157_v19  ;;  %v5135_v26 = vmax.f32 %v8018_v53, %v5134_v55  ;;  %v5152_v50 = vrot.slane %v5151_v42, 2 }
 0x229   :  { %v5142_v51 = vmax.f32 %v5140_v41, %v5141_v16  ;;  %v1751_v38 = vrot.slane %v7749_v4, 1  ;;  %v5484_v49 = vmax.f32 %v5482_v27, %v5483_v6  ;;  %v5497_v31 = vrot.slane %v5496_v48, 1 }
 0x22a   :  { %v5159_v20 = vrot.slane %v5158_v57, 4  ;;  %v8212_v63 = vrot.slane %v7736_v44, 2  ;;  %v5503_v21 = vmax.f32 %v5501_v24, %v5502_v2  ;;  %v5153_v11 = vmax.f32 %v5151_v42, %v5152_v50 }
 0x22b   :  { %v5143_v14 = vrot.slane %v5142_v51, 2  ;;  %v1752_v46 = vmax.f32 %v7749_v4, %v1751_v38  ;;  %v8213_v53 = vrot.slane %v7807_v12, 4  ;;  %v1822_v43 = vsel %vm1821_vm12, %v7600_v61, %v7566_v35  ;;  %v8214_v4 = vld [vmem:[#allocation5_spill] sm:$0xff] }
 0x22c   :  { %v1759_v58 = vmax.f32 %v7736_v44, %v8212_v63  ;;  %v5160_v10 = vmax.f32 %v5158_v57, %v5159_v20  ;;  %v5136_v5 = vrot.slane %v5135_v26, 1  ;;  %v5154_v47 = vrot.slane %v5153_v11, 1 }
 0x22d   :  { %v1766_v8 = vmax.f32 %v7807_v12, %v8213_v53  ;;  %v5144_v28 = vmax.f32 %v5142_v51, %v5143_v14  ;;  %v1824_v44 = vsel %vm1823_vm13, %v7635_v18, %v1822_v43  ;;  %v5491_v30 = vmax.f32 %v5489_v39, %v5490_v45 }
 0x22e   :  { %v1760_v40 = vrot.slane %v1759_v58, 1  ;;  %v5161_v59 = vrot.slane %v5160_v10, 2  ;;  %v1826_v32 = vsel %vm1825_vm14, %v8214_v4, %v1824_v44  ;;  %v5504_v27 = vrot.slane %v5503_v21, 1 }
 0x22f   :  { %v1767_v36 = vrot.slane %v1766_v8, 2  ;;  %v5145_v1 = vrot.slane %v5144_v28, 1  ;;  %v1828_v12 = vsel %vm1827_vm15, %v1752_v46, %v1826_v32  ;;  %v5155_v56 = vmax.f32 %v5153_v11, %v5154_v47 }
 0x230   :  { %v1761_v52 = vmax.f32 %v1759_v58, %v1760_v40  ;;  %v5162_v22 = vmax.f32 %v5160_v10, %v5161_v59  ;;  %v5137_v25 = vmax.f32 %v5135_v26, %v5136_v5  ;;  %v1787_v18 = vrot.slane %v8215_v3, 1 }
 0x231   :  { %v1768_v35 = vmax.f32 %v1766_v8, %v1767_v36  ;;  %v5146_v17 = vmax.f32 %v5144_v28, %v5145_v1  ;;  %v1795_v13 = vmax.f32 %v7975_v29, %v1794_v34  ;;  %v5498_v24 = vmax.f32 %v5496_v48, %v5497_v31 }
 0x232   :  { %v1830_v61 = vsel %vm1829_vm0, %v1761_v52, %v1828_v12  ;;  %v5163_v23 = vrot.slane %v5162_v22, 1  ;;  %v8217_v39 = vrot.slane %v8216_v33, 1  ;;  %v1788_v55 = vmax.f32 %v8215_v3, %v1787_v18 }
 0x233   :  { %v1769_v15 = vrot.slane %v1768_v35, 1  ;;  %v5184_v7 = vsel %vm1819_vm11, %v5146_v17, %v5137_v25  ;;  %v1796_v41 = vrot.slane %v1795_v13, 1  ;;  %v1802_v0 = vmax.f32 %v8012_v60, %v1801_v37 }
 0x234   :  { %v1779_v9 = vmax.f32 %v8216_v33, %v8217_v39  ;;  %v5164_v6 = vmax.f32 %v5162_v22, %v5163_v23  ;;  %v5185_v62 = vsel %vm1821_vm12, %v5155_v56, %v5184_v7  ;;  %v5505_v54 = vmax.f32 %v5503_v21, %v5504_v27 }
 0x235   :  { %v1770_v2 = vmax.f32 %v1768_v35, %v1769_v15  ;;  %v1797_v29 = vmax.f32 %v1795_v13, %v1796_v41  ;;  %v1803_v16 = vrot.slane %v1802_v0, 2  ;;  %v5525_v19 = vsel %vm1819_vm11, %v5491_v30, %v5484_v49 }
 0x236   :  { %v1833_v48 = vsel %vm1819_vm11, %v1788_v55, %v1779_v9  ;;  %v5186_v42 = vsel %vm1823_vm13, %v5164_v6, %v5185_v62  ;;  %v5526_v45 = vsel %vm1821_vm12, %v5498_v24, %v5525_v19 }
 0x237   :  { %v1832_v34 = vsel %vm1831_vm1, %v1770_v2, %v1830_v61  ;;  %5189 = vrot.lane.b32.xlu1 %v5186_v42, %s5893_s6  ;;  %v1834_v60 = vsel %vm1821_vm12, %v1797_v29, %v1833_v48  ;;  %v1804_v37 = vmax.f32 %v1802_v0, %v1803_v16  ;;  %v5527_v57 = vsel %vm1823_vm13, %v5505_v54, %v5526_v45 }
 0x238   :  { %1838 = vst.msk [vmem:[#allocation2] sm:$0xff] %vm1697_vm8, %v1832_v34 }
 0x239   :  { %v1805_v26 = vrot.slane %v1804_v37, 1 }
 0x23b   :  { %5530 = vrot.lane.b32.xlu1 %v5527_v57, %s5894_s18  ;;  %v1806_v51 = vmax.f32 %v1804_v37, %v1805_v26 }
 0x23d   :  { %v1835_v50 = vsel %vm1823_vm13, %v1806_v51, %v1834_v60 }
 0x23e   :  { %1840 = vst.msk [vmem:[#allocation2 + $0x8] sm:$0xf] %vm1839_vm2, %v1835_v50 }
 0x290   :  { %v5188_v38 = vpop.permute.xlu0 %5187 }
 0x291   :  { %5194 = vst.msk [vmem:[#allocation2] sm:$0xff] %vm5193_vm3, %v5188_v38 }
 0x299   :  { %v5529_v49 = vpop.permute.xlu0 %5528 }
 0x29a   :  { %5535 = vst.msk [vmem:[#allocation2] sm:$0xff] %vm5534_vm4, %v5529_v49 }
 0x2a9   :  { %v5190_v31 = vpop.permute.xlu1 %5189 }
 0x2aa   :  { %5196 = vst.msk [vmem:[#allocation2 + $0x8] sm:$0xf] %vm5195_vm5, %v5190_v31 }
 0x2ad   :  { %v5531_v20 = vpop.permute.xlu1 %5530 }
 0x2ae   :  { %5537 = vst.msk [vmem:[#allocation2 + $0x8] sm:$0xf] %vm5536_vm6, %v5531_v20 }
 0x2af   :  { %5875 = shalt.err (!%p5872_p4)
}
 0x2b0   :  { %s5896_s22 = smov 128  }
 0x2b1   :  { %5549 = dma.vmem_to_hbm [thread:$0]  %s5544_s20, 256, %s8201_s7, [#allocation3], %s5896_s22, %s5896_s22, %s5893_s6  }
 0x2b2   :  { %5884 = dma.done.wait [#allocation3], 256  }
 0x2b3   :  { %5885 = vsyncadd [#allocation3], 4294967040 }
 0x2b4   :  { %5553 = vsyncpa [#allocation3], 1 }

</bundles_post_ra>
